<compile_context>
chip_gen: v6e
topology: v6e:2x2x1
jax: 0.10.0
libtpu: 0.0.40
codegen_flags: <defaults>
</compile_context>

<pallas_src>
import functools

import jax
import jax.numpy as jnp
from jax.experimental import pallas as pl
from jax.experimental.pallas import tpu as pltpu


HIDDEN_ENC = [32, 64, 128, 256]
HIDDEN_DEC = [128, 64, 32]


def _round_up(x, m):
    return ((x + m - 1) // m) * m


# -----------------------------------------------------------------------------
# Pallas kernels
# -----------------------------------------------------------------------------
def _matmul_bias_act_kernel(a_ref, b_ref, bias_ref, o_ref, *, apply_relu):
    """o = act(a @ b + bias); a/b are bf16, accumulation in f32 on the MXU."""
    acc = jnp.dot(a_ref[...], b_ref[...], preferred_element_type=jnp.float32)
    acc = acc + bias_ref[...]                     # bias is (1, Np) f32, broadcasts
    if apply_relu:
        acc = jnp.maximum(acc, 0.0)
    o_ref[...] = acc.astype(o_ref.dtype)


def pallas_linear(a, w_p, bias_p, n_out, relu=False, out_dtype=jnp.bfloat16):
    """y = a @ W + bias (optional ReLU).

    a:      (M, K)   activations (cast to bf16 MXU operands)
    w_p:    (Kp, Np) bf16 weights, pre-padded with zeros to multiples of 128
    bias_p: (1, Np)  f32 bias, zero-padded
    Returns (M, n_out) in out_dtype.
    """
    M, K = a.shape
    Kp, Np = w_p.shape

    # Right-size the M tile: at least the 8-row sublane minimum, at most 128.
    tm = min(_round_up(M, 8), 128)
    # Give the grid >= 2 steps when there is enough work so v7x's two
    # TensorCores both get a share (neutral on single-TC v5e/v6e).
    if tm >= 64 and _round_up(M, tm) == tm:
        tm = _round_up(-(-M // 2), 8)
    Mp = _round_up(M, tm)

    a_p = jnp.pad(a.astype(jnp.bfloat16), ((0, Mp - M), (0, Kp - K)))

    out = pl.pallas_call(
        functools.partial(_matmul_bias_act_kernel, apply_relu=relu),
        out_shape=jax.ShapeDtypeStruct((Mp, Np), out_dtype),
        grid=(Mp // tm,),
        in_specs=[
            pl.BlockSpec((tm, Kp), lambda i: (i, 0)),
            pl.BlockSpec((Kp, Np), lambda i: (0, 0)),
            pl.BlockSpec((1, Np), lambda i: (0, 0)),
        ],
        out_specs=pl.BlockSpec((tm, Np), lambda i: (i, 0)),
        compiler_params=pltpu.CompilerParams(dimension_semantics=("parallel",)),
    )(a_p, w_p, bias_p)
    return out[:M, :n_out]


def _enc_head_kernel(a_ref, w_ref, bias_ref, eps_ref, mu_ref, lv_ref, z_ref, *, L):
    """Fused fc_mu + fc_log_var + reparameterization in a single MXU pass."""
    acc = jnp.dot(a_ref[...], w_ref[...], preferred_element_type=jnp.float32)
    acc = acc + bias_ref[...]
    mu = acc[:, :L]
    lv = acc[:, L:2 * L]
    mu_ref[...] = mu
    lv_ref[...] = lv
    z_ref[...] = mu + eps_ref[...] * jnp.exp(0.5 * lv)


def pallas_encoder_head(feat, w_head, bias_head, eps):
    """Returns (mu, log_var, z) with z = mu + eps * exp(0.5*log_var)."""
    B, K = feat.shape
    Kp, two_l = w_head.shape
    L = two_l // 2
    Mp = _round_up(B, 8)
    feat_p = jnp.pad(feat.astype(jnp.bfloat16), ((0, Mp - B), (0, Kp - K)))
    eps_p = jnp.pad(eps.astype(jnp.float32), ((0, Mp - B), (0, 0)))
    mu, lv, z = pl.pallas_call(
        functools.partial(_enc_head_kernel, L=L),
        out_shape=(
            jax.ShapeDtypeStruct((Mp, L), jnp.float32),
            jax.ShapeDtypeStruct((Mp, L), jnp.float32),
            jax.ShapeDtypeStruct((Mp, L), jnp.float32),
        ),
    )(feat_p, w_head, bias_head, eps_p)
    return mu[:B], lv[:B], z[:B]


# -----------------------------------------------------------------------------
# im2col-based conv / conv-transpose wrappers (glue in plain JAX, matmul in Pallas)
# -----------------------------------------------------------------------------
# TODO(synk): move the kh*kw tap loop onto a Pallas reduction grid axis with a
# VMEM f32 accumulator so activations are DMA'd once instead of kh*kw times;
# the bf16 XLA pad/slice/concat glue below is kept for correctness at these sizes.
def _im2col(x, kh, kw, stride, pad):
    """x: (N,H,W,C) -> patches (N,Ho,Wo,kh*kw*C), ordering (i, j, c)."""
    N, H, W, C = x.shape
    sh, sw = stride
    ph, pw = pad
    xp = jnp.pad(x, ((0, 0), (ph, ph), (pw, pw), (0, 0)))
    Ho = (H + 2 * ph - kh) // sh + 1
    Wo = (W + 2 * pw - kw) // sw + 1
    cols = []
    for i in range(kh):
        for j in range(kw):
            patch = xp[:, i:i + sh * (Ho - 1) + 1:sh, j:j + sw * (Wo - 1) + 1:sw, :]
            cols.append(patch)
    return jnp.concatenate(cols, axis=-1), Ho, Wo


def conv2d(x, w_p, b_p, n_out, kh, kw, stride, pad, relu, out_dtype=jnp.bfloat16):
    """x: NHWC; w_p/b_p are pre-padded matmul weights from prepare_params."""
    Nb = x.shape[0]
    patches, Ho, Wo = _im2col(x, kh, kw, stride, pad)
    a = patches.reshape(Nb * Ho * Wo, patches.shape[-1])
    out = pallas_linear(a, w_p, b_p, n_out, relu=relu, out_dtype=out_dtype)
    return out.reshape(Nb, Ho, Wo, n_out)


def _pad_or_crop_hw(x, pt, pb, plft, prt):
    x = jnp.pad(x, ((0, 0),
                    (max(pt, 0), max(pb, 0)),
                    (max(plft, 0), max(prt, 0)),
                    (0, 0)))
    _, H, W, _ = x.shape
    return x[:, max(-pt, 0):H - max(-pb, 0), max(-plft, 0):W - max(-prt, 0), :]


def conv_transpose2d(x, w_p, b_p, n_out, kh, kw, stride, pad, out_pad, relu,
                     out_dtype=jnp.bfloat16):
    """x: NHWC.  Lowered as: dilate input by stride, pad by (k-1-p) (negative
    pad = crop), then stride-1 convolution with the flipped/transposed kernel
    (already folded into w_p at prep time)."""
    N, H, W, C = x.shape
    sh, sw = stride
    xd = jnp.zeros((N, (H - 1) * sh + 1, (W - 1) * sw + 1, C), x.dtype)
    xd = xd.at[:, ::sh, ::sw, :].set(x)
    pt = kh - 1 - pad[0]
    pb = kh - 1 - pad[0] + out_pad[0]
    plft = kw - 1 - pad[1]
    prt = kw - 1 - pad[1] + out_pad[1]
    xd = _pad_or_crop_hw(xd, pt, pb, plft, prt)

    patches, Ho, Wo = _im2col(xd, kh, kw, (1, 1), (0, 0))
    a = patches.reshape(N * Ho * Wo, patches.shape[-1])
    out = pallas_linear(a, w_p, b_p, n_out, relu=relu, out_dtype=out_dtype)
    return out.reshape(N, Ho, Wo, n_out)


# -----------------------------------------------------------------------------
# Parameter init (deterministic, synthetic, PyTorch layouts) and prep
# -----------------------------------------------------------------------------
def init_vae_params(key, image_H, image_W, in_ch, out_ch, latent_dim):
    def _normal(key, shape, fan_in):
        return jax.random.normal(key, shape, dtype=jnp.float32) / jnp.sqrt(float(fan_in))

    keys = iter(jax.random.split(key, 64))
    params = {}

    # Encoder convs: Conv2d(k=3, s=2, p=1), PyTorch weight (Cout, Cin, 3, 3)
    enc_convs = []
    cin = in_ch
    for cout in HIDDEN_ENC:
        w = _normal(next(keys), (cout, cin, 3, 3), cin * 9)
        b = _normal(next(keys), (cout,), cin * 9)
        enc_convs.append((w, b))
        cin = cout
    params["enc_convs"] = enc_convs

    # Encoder output spatial size
    oh, ow = image_H, image_W
    for _ in HIDDEN_ENC:
        oh = (oh - 3 + 2 * 1) // 2 + 1
        ow = (ow - 3 + 2 * 1) // 2 + 1
    fc_dim = HIDDEN_ENC[-1] * oh * ow
    params["enc_oh"], params["enc_ow"] = oh, ow

    params["fc_mu_w"] = _normal(next(keys), (latent_dim, fc_dim), fc_dim)   # (out, in)
    params["fc_mu_b"] = _normal(next(keys), (latent_dim,), fc_dim)
    params["fc_lv_w"] = _normal(next(keys), (latent_dim, fc_dim), fc_dim)
    params["fc_lv_b"] = _normal(next(keys), (latent_dim,), fc_dim)

    # Decoder fc: latent -> H*W*256
    dec_fc_out = oh * ow * HIDDEN_ENC[-1]
    params["dec_fc_w"] = _normal(next(keys), (dec_fc_out, latent_dim), latent_dim)
    params["dec_fc_b"] = _normal(next(keys), (dec_fc_out,), latent_dim)

    # Decoder ConvTranspose2d layers, PyTorch weight (Cin, Cout, kh, kw)
    dec_convT = []
    cin = HIDDEN_ENC[-1]
    for cout in HIDDEN_DEC:
        w = _normal(next(keys), (cin, cout, 3, 3), cin * 9)
        b = _normal(next(keys), (cout,), cin * 9)
        dec_convT.append((w, b))
        cin = cout
    # pred layer: name_id=1 -> kernel (3,3), stride 2, padding (2,4), output_padding 0
    w = _normal(next(keys), (cin, out_ch, 3, 3), cin * 9)
    b = _normal(next(keys), (out_ch,), cin * 9)
    dec_convT.append((w, b))
    params["dec_convT"] = dec_convT
    return params


def _prep_matmul_weights(wmat, bias):
    """Zero-pad (K,N) weight to lane-aligned (Kp,Np) bf16 and bias to (1,Np) f32."""
    K, N = wmat.shape
    Kp, Np = _round_up(K, 128), _round_up(N, 128)
    w_p = jnp.zeros((Kp, Np), jnp.bfloat16).at[:K, :N].set(wmat.astype(jnp.bfloat16))
    b_p = jnp.zeros((1, Np), jnp.float32).at[0, :N].set(bias.astype(jnp.float32))
    return w_p, b_p, K, N


def prepare_params(params):
    """One-time conversion of PyTorch-layout params to padded bf16 matmul form."""
    oh, ow = params["enc_oh"], params["enc_ow"]
    C = HIDDEN_ENC[-1]
    prep = {"enc_oh": oh, "enc_ow": ow}

    enc = []
    for (w, b) in params["enc_convs"]:
        Cout, Cin, kh, kw = w.shape
        wmat = jnp.transpose(w, (2, 3, 1, 0)).reshape(kh * kw * Cin, Cout)
        enc.append(_prep_matmul_weights(wmat, b) + (kh, kw))
    prep["enc_convs"] = enc

    # fc_mu / fc_log_var: fold torch's NCHW flatten order into NHWC column order
    # (so the forward flattens NHWC activations directly, no transpose), then
    # concatenate both heads along the output axis -> one fused matmul.
    def _cols_nchw_to_nhwc(w2d):
        out_dim = w2d.shape[0]
        return (w2d.reshape(out_dim, C, oh, ow)
                .transpose(0, 2, 3, 1)
                .reshape(out_dim, C * oh * ow))

    w_mu = _cols_nchw_to_nhwc(params["fc_mu_w"])
    w_lv = _cols_nchw_to_nhwc(params["fc_lv_w"])
    w_head = jnp.concatenate([w_mu, w_lv], axis=0).T            # (fc_dim, 2L)
    b_head = jnp.concatenate([params["fc_mu_b"], params["fc_lv_b"]])
    K = w_head.shape[0]
    Kp = _round_up(K, 128)
    prep["head_w"] = jnp.pad(w_head.astype(jnp.bfloat16), ((0, Kp - K), (0, 0)))
    prep["head_b"] = b_head.reshape(1, -1).astype(jnp.float32)

    # Decoder fc: fold the NCHW output order into NHWC so its output reshapes
    # directly to (B, oh, ow, C) with no transpose.
    w_fc = (params["dec_fc_w"].reshape(C, oh, ow, -1)
            .transpose(1, 2, 0, 3)
            .reshape(C * oh * ow, -1))                           # (dec_out, L)
    b_fc = params["dec_fc_b"].reshape(C, oh, ow).transpose(1, 2, 0).reshape(-1)
    prep["dec_fc"] = _prep_matmul_weights(w_fc.T, b_fc)

    dec = []
    for (w, b) in params["dec_convT"]:
        Cin, Cout, kh, kw = w.shape
        wflip = jnp.flip(jnp.flip(w, axis=2), axis=3)            # (Cin,Cout,kh,kw)
        wmat = jnp.transpose(wflip, (2, 3, 0, 1)).reshape(kh * kw * Cin, Cout)
        dec.append(_prep_matmul_weights(wmat, b) + (kh, kw))
    prep["dec_convT"] = dec
    return prep


# -----------------------------------------------------------------------------
# VAE forward
# -----------------------------------------------------------------------------
def vae_forward(prep, x_nchw, eps):
    """x_nchw: (B, Cin, H, W) float32.  Returns (recon NCHW f32, mu, log_var)."""
    B = x_nchw.shape[0]
    x = jnp.transpose(x_nchw, (0, 2, 3, 1)).astype(jnp.bfloat16)   # -> NHWC, bf16

    # ----- Encoder -----
    for (w_p, b_p, _k, n, kh, kw) in prep["enc_convs"]:
        x = conv2d(x, w_p, b_p, n, kh, kw, stride=(2, 2), pad=(1, 1), relu=True)
    feat = x.reshape(B, -1)            # NHWC flatten (NCHW order folded in weights)

    # ----- fc_mu + fc_log_var + reparameterization (one fused kernel) -----
    mu, log_var, z = pallas_encoder_head(feat, prep["head_w"], prep["head_b"], eps)

    # ----- Decoder -----
    w_p, b_p, _k, n = prep["dec_fc"]
    h = pallas_linear(z.reshape(B, -1), w_p, b_p, n, relu=False)
    oh, ow = prep["enc_oh"], prep["enc_ow"]
    h = h.reshape(B, oh, ow, HIDDEN_ENC[-1])     # NHWC directly (order folded in fc)
    for (w_p, b_p, _k, n, kh, kw) in prep["dec_convT"][:-1]:
        h = conv_transpose2d(h, w_p, b_p, n, kh, kw, stride=(2, 2), pad=(1, 1),
                             out_pad=(1, 1), relu=True)
    w_p, b_p, _k, n, kh, kw = prep["dec_convT"][-1]
    h = conv_transpose2d(h, w_p, b_p, n, kh, kw, stride=(2, 2), pad=(2, 4),
                         out_pad=(0, 0), relu=False, out_dtype=jnp.float32)
    recon = jnp.transpose(h, (0, 3, 1, 2))                         # -> NCHW
    return recon, mu, log_var


# -----------------------------------------------------------------------------
if __name__ == "__main__":
    B, Cin, H, W = 2, 4, 16, 16
    Cout_img = 3
    latent_dim = 32

    key = jax.random.PRNGKey(0)
    k_param, k_x, k_eps = jax.random.split(key, 3)

    params = init_vae_params(k_param, H, W, Cin, Cout_img, latent_dim)
    prep = prepare_params(params)

    x = jax.random.normal(k_x, (B, Cin, H, W), dtype=jnp.float32)
    eps = jax.random.normal(k_eps, (B, latent_dim), dtype=jnp.float32)  # randn_like(std)

    forward = jax.jit(functools.partial(vae_forward, prep))
    recon, mu, log_var = forward(x, eps)
    recon = jax.block_until_ready(recon)
    mu = jax.block_until_ready(mu)
    log_var = jax.block_until_ready(log_var)

    # Expected shapes: encoder 16->8->4->2->1; decoder 1->2->4->8; pred layer:
    # H: (8-1)*2 - 2*2 + 3 = 13, W: (8-1)*2 - 2*4 + 3 = 9.
    assert mu.shape == (B, latent_dim) and log_var.shape == (B, latent_dim)
    assert recon.shape == (B, Cout_img, 13, 9), recon.shape
    assert bool(jnp.all(jnp.isfinite(recon)))
    assert bool(jnp.all(jnp.isfinite(mu))) and bool(jnp.all(jnp.isfinite(log_var)))

    print("KERNEL_OK")
</pallas_src>

<mosaic_0001>
module attributes {stable_mosaic.version = 11 : i64} {
  func.func @_matmul_bias_act_kernel(%arg0: i32, %arg1: memref<64x128xbf16, #tpu.memory_space<vmem>>, %arg2: memref<128x128xbf16, #tpu.memory_space<vmem>>, %arg3: memref<1x128xf32, #tpu.memory_space<vmem>>, %arg4: memref<64x128xbf16, #tpu.memory_space<vmem>>) attributes {dimension_semantics = [#tpu.dimension_semantics<parallel>], iteration_bounds = array<i64: 2>, scalar_prefetch = 0 : i64, scratch_operands = 0 : i64, tpu.core_type = #tpu.core_type<tc>, window_params = [{transform_indices = @transform_0, window_bounds = array<i64: 64, 128>}, {pipeline_mode = #tpu.pipeline_mode<synchronous>, transform_indices = @transform_1, window_bounds = array<i64: 128, 128>}, {pipeline_mode = #tpu.pipeline_mode<synchronous>, transform_indices = @transform_2, window_bounds = array<i64: 1, 128>}, {transform_indices = @transform_3, window_bounds = array<i64: 64, 128>}]} {
    %c0 = arith.constant 0 : index
    %c0_0 = arith.constant 0 : index
    %0 = vector.load %arg1[%c0, %c0_0] : memref<64x128xbf16, #tpu.memory_space<vmem>>, vector<64x128xbf16>
    %c0_1 = arith.constant 0 : index
    %c0_2 = arith.constant 0 : index
    %1 = vector.load %arg2[%c0_1, %c0_2] : memref<128x128xbf16, #tpu.memory_space<vmem>>, vector<128x128xbf16>
    %cst = arith.constant dense<0.000000e+00> : vector<64x128xf32>
    %2 = tpu.matmul %0, %1, %cst {dimension_numbers = #tpu.dot_dimension_numbers<[1], [0], [0], [1], [0, 0, 1, 1], [], []>} : vector<64x128xbf16>, vector<128x128xbf16>, vector<64x128xf32> -> vector<64x128xf32>
    %c0_3 = arith.constant 0 : index
    %c0_4 = arith.constant 0 : index
    %3 = vector.load %arg3[%c0_3, %c0_4] : memref<1x128xf32, #tpu.memory_space<vmem>>, vector<1x128xf32>
    %4 = vector.broadcast %3 : vector<1x128xf32> to vector<64x128xf32>
    %5 = arith.addf %2, %4 : vector<64x128xf32>
    %cst_5 = arith.constant 0.000000e+00 : f32
    %6 = vector.broadcast %cst_5 : f32 to vector<64x128xf32>
    %7 = arith.maximumf %5, %6 : vector<64x128xf32>
    %8 = arith.truncf %7 : vector<64x128xf32> to vector<64x128xbf16>
    %c0_6 = arith.constant 0 : index
    %c0_7 = arith.constant 0 : index
    %9 = vector.load %arg4[%c0_6, %c0_7] : memref<64x128xbf16, #tpu.memory_space<vmem>>, vector<64x128xbf16>
    tpu.vector_store %arg4[%c0_6, %c0_7], %8 {strides = array<i32>} : memref<64x128xbf16, #tpu.memory_space<vmem>>, vector<64x128xbf16>,
    return
  }
  func.func @transform_0(%arg0: i32) -> (i32, i32) {
    %c0_i32 = arith.constant 0 : i32
    %c0_i32_0 = arith.constant 0 : i32
    return %arg0, %c0_i32 : i32, i32
  }
  func.func @transform_1(%arg0: i32) -> (i32, i32) {
    %c0_i32 = arith.constant 0 : i32
    %c0_i32_0 = arith.constant 0 : i32
    %c0_i32_1 = arith.constant 0 : i32
    return %c0_i32, %c0_i32_0 : i32, i32
  }
  func.func @transform_2(%arg0: i32) -> (i32, i32) {
    %c0_i32 = arith.constant 0 : i32
    %c0_i32_0 = arith.constant 0 : i32
    %c0_i32_1 = arith.constant 0 : i32
    return %c0_i32, %c0_i32_0 : i32, i32
  }
  func.func @transform_3(%arg0: i32) -> (i32, i32) {
    %c0_i32 = arith.constant 0 : i32
    %c0_i32_0 = arith.constant 0 : i32
    return %arg0, %c0_i32 : i32, i32
  }
}

module attributes {stable_mosaic.version = 11 : i64} {
  func.func @_matmul_bias_act_kernel(%arg0: i32, %arg1: memref<32x384xbf16, #tpu.memory_space<vmem>>, %arg2: memref<384x128xbf16, #tpu.memory_space<vmem>>, %arg3: memref<1x128xf32, #tpu.memory_space<vmem>>, %arg4: memref<32x128xbf16, #tpu.memory_space<vmem>>) attributes {dimension_semantics = [#tpu.dimension_semantics<parallel>], iteration_bounds = array<i64: 1>, scalar_prefetch = 0 : i64, scratch_operands = 0 : i64, tpu.core_type = #tpu.core_type<tc>, window_params = [{transform_indices = @transform_0, window_bounds = array<i64: 32, 384>}, {pipeline_mode = #tpu.pipeline_mode<synchronous>, transform_indices = @transform_1, window_bounds = array<i64: 384, 128>}, {pipeline_mode = #tpu.pipeline_mode<synchronous>, transform_indices = @transform_2, window_bounds = array<i64: 1, 128>}, {transform_indices = @transform_3, window_bounds = array<i64: 32, 128>}]} {
    %c0 = arith.constant 0 : index
    %c0_0 = arith.constant 0 : index
    %0 = vector.load %arg1[%c0, %c0_0] : memref<32x384xbf16, #tpu.memory_space<vmem>>, vector<32x384xbf16>
    %c0_1 = arith.constant 0 : index
    %c0_2 = arith.constant 0 : index
    %1 = vector.load %arg2[%c0_1, %c0_2] : memref<384x128xbf16, #tpu.memory_space<vmem>>, vector<384x128xbf16>
    %cst = arith.constant dense<0.000000e+00> : vector<32x128xf32>
    %2 = tpu.matmul %0, %1, %cst {dimension_numbers = #tpu.dot_dimension_numbers<[1], [0], [0], [1], [0, 0, 1, 1], [], []>} : vector<32x384xbf16>, vector<384x128xbf16>, vector<32x128xf32> -> vector<32x128xf32>
    %c0_3 = arith.constant 0 : index
    %c0_4 = arith.constant 0 : index
    %3 = vector.load %arg3[%c0_3, %c0_4] : memref<1x128xf32, #tpu.memory_space<vmem>>, vector<1x128xf32>
    %4 = vector.broadcast %3 : vector<1x128xf32> to vector<32x128xf32>
    %5 = arith.addf %2, %4 : vector<32x128xf32>
    %cst_5 = arith.constant 0.000000e+00 : f32
    %6 = vector.broadcast %cst_5 : f32 to vector<32x128xf32>
    %7 = arith.maximumf %5, %6 : vector<32x128xf32>
    %8 = arith.truncf %7 : vector<32x128xf32> to vector<32x128xbf16>
    %c0_6 = arith.constant 0 : index
    %c0_7 = arith.constant 0 : index
    %9 = vector.load %arg4[%c0_6, %c0_7] : memref<32x128xbf16, #tpu.memory_space<vmem>>, vector<32x128xbf16>
    tpu.vector_store %arg4[%c0_6, %c0_7], %8 {strides = array<i32>} : memref<32x128xbf16, #tpu.memory_space<vmem>>, vector<32x128xbf16>,
    return
  }
  func.func @transform_0(%arg0: i32) -> (i32, i32) {
    %c0_i32 = arith.constant 0 : i32
    %c0_i32_0 = arith.constant 0 : i32
    return %arg0, %c0_i32 : i32, i32
  }
  func.func @transform_1(%arg0: i32) -> (i32, i32) {
    %c0_i32 = arith.constant 0 : i32
    %c0_i32_0 = arith.constant 0 : i32
    %c0_i32_1 = arith.constant 0 : i32
    return %c0_i32, %c0_i32_0 : i32, i32
  }
  func.func @transform_2(%arg0: i32) -> (i32, i32) {
    %c0_i32 = arith.constant 0 : i32
    %c0_i32_0 = arith.constant 0 : i32
    %c0_i32_1 = arith.constant 0 : i32
    return %c0_i32, %c0_i32_0 : i32, i32
  }
  func.func @transform_3(%arg0: i32) -> (i32, i32) {
    %c0_i32 = arith.constant 0 : i32
    %c0_i32_0 = arith.constant 0 : i32
    return %arg0, %c0_i32 : i32, i32
  }
}

module attributes {stable_mosaic.version = 11 : i64} {
  func.func @_matmul_bias_act_kernel(%arg0: i32, %arg1: memref<8x640xbf16, #tpu.memory_space<vmem>>, %arg2: memref<640x128xbf16, #tpu.memory_space<vmem>>, %arg3: memref<1x128xf32, #tpu.memory_space<vmem>>, %arg4: memref<8x128xbf16, #tpu.memory_space<vmem>>) attributes {dimension_semantics = [#tpu.dimension_semantics<parallel>], iteration_bounds = array<i64: 1>, scalar_prefetch = 0 : i64, scratch_operands = 0 : i64, tpu.core_type = #tpu.core_type<tc>, window_params = [{transform_indices = @transform_0, window_bounds = array<i64: 8, 640>}, {pipeline_mode = #tpu.pipeline_mode<synchronous>, transform_indices = @transform_1, window_bounds = array<i64: 640, 128>}, {pipeline_mode = #tpu.pipeline_mode<synchronous>, transform_indices = @transform_2, window_bounds = array<i64: 1, 128>}, {transform_indices = @transform_3, window_bounds = array<i64: 8, 128>}]} {
    %c0 = arith.constant 0 : index
    %c0_0 = arith.constant 0 : index
    %0 = vector.load %arg1[%c0, %c0_0] : memref<8x640xbf16, #tpu.memory_space<vmem>>, vector<8x640xbf16>
    %c0_1 = arith.constant 0 : index
    %c0_2 = arith.constant 0 : index
    %1 = vector.load %arg2[%c0_1, %c0_2] : memref<640x128xbf16, #tpu.memory_space<vmem>>, vector<640x128xbf16>
    %cst = arith.constant dense<0.000000e+00> : vector<8x128xf32>
    %2 = tpu.matmul %0, %1, %cst {dimension_numbers = #tpu.dot_dimension_numbers<[1], [0], [0], [1], [0, 0, 1, 1], [], []>} : vector<8x640xbf16>, vector<640x128xbf16>, vector<8x128xf32> -> vector<8x128xf32>
    %c0_3 = arith.constant 0 : index
    %c0_4 = arith.constant 0 : index
    %3 = vector.load %arg3[%c0_3, %c0_4] : memref<1x128xf32, #tpu.memory_space<vmem>>, vector<1x128xf32>
    %4 = vector.broadcast %3 : vector<1x128xf32> to vector<8x128xf32>
    %5 = arith.addf %2, %4 : vector<8x128xf32>
    %cst_5 = arith.constant 0.000000e+00 : f32
    %6 = vector.broadcast %cst_5 : f32 to vector<8x128xf32>
    %7 = arith.maximumf %5, %6 : vector<8x128xf32>
    %8 = arith.truncf %7 : vector<8x128xf32> to vector<8x128xbf16>
    %c0_6 = arith.constant 0 : index
    %c0_7 = arith.constant 0 : index
    %9 = vector.load %arg4[%c0_6, %c0_7] : memref<8x128xbf16, #tpu.memory_space<vmem>>, vector<8x128xbf16>
    tpu.vector_store %arg4[%c0_6, %c0_7], %8 {strides = array<i32>} : memref<8x128xbf16, #tpu.memory_space<vmem>>, vector<8x128xbf16>,
    return
  }
  func.func @transform_0(%arg0: i32) -> (i32, i32) {
    %c0_i32 = arith.constant 0 : i32
    %c0_i32_0 = arith.constant 0 : i32
    return %arg0, %c0_i32 : i32, i32
  }
  func.func @transform_1(%arg0: i32) -> (i32, i32) {
    %c0_i32 = arith.constant 0 : i32
    %c0_i32_0 = arith.constant 0 : i32
    %c0_i32_1 = arith.constant 0 : i32
    return %c0_i32, %c0_i32_0 : i32, i32
  }
  func.func @transform_2(%arg0: i32) -> (i32, i32) {
    %c0_i32 = arith.constant 0 : i32
    %c0_i32_0 = arith.constant 0 : i32
    %c0_i32_1 = arith.constant 0 : i32
    return %c0_i32, %c0_i32_0 : i32, i32
  }
  func.func @transform_3(%arg0: i32) -> (i32, i32) {
    %c0_i32 = arith.constant 0 : i32
    %c0_i32_0 = arith.constant 0 : i32
    return %arg0, %c0_i32 : i32, i32
  }
}

module attributes {stable_mosaic.version = 11 : i64} {
  func.func @_enc_head_kernel(%arg0: memref<8x256xbf16, #tpu.memory_space<vmem>>, %arg1: memref<256x64xbf16, #tpu.memory_space<vmem>>, %arg2: memref<1x64xf32, #tpu.memory_space<vmem>>, %arg3: memref<8x32xf32, #tpu.memory_space<vmem>>, %arg4: memref<8x32xf32, #tpu.memory_space<vmem>>, %arg5: memref<8x32xf32, #tpu.memory_space<vmem>>, %arg6: memref<8x32xf32, #tpu.memory_space<vmem>>) attributes {dimension_semantics = [], scalar_prefetch = 0 : i64, scratch_operands = 0 : i64, tpu.core_type = #tpu.core_type<tc>} {
    %c0 = arith.constant 0 : index
    %c0_0 = arith.constant 0 : index
    %0 = vector.load %arg0[%c0, %c0_0] : memref<8x256xbf16, #tpu.memory_space<vmem>>, vector<8x256xbf16>
    %c0_1 = arith.constant 0 : index
    %c0_2 = arith.constant 0 : index
    %1 = vector.load %arg1[%c0_1, %c0_2] : memref<256x64xbf16, #tpu.memory_space<vmem>>, vector<256x64xbf16>
    %cst = arith.constant dense<0.000000e+00> : vector<8x64xf32>
    %2 = tpu.matmul %0, %1, %cst {dimension_numbers = #tpu.dot_dimension_numbers<[1], [0], [0], [1], [0, 0, 1, 1], [], []>} : vector<8x256xbf16>, vector<256x64xbf16>, vector<8x64xf32> -> vector<8x64xf32>
    %c0_3 = arith.constant 0 : index
    %c0_4 = arith.constant 0 : index
    %3 = vector.load %arg2[%c0_3, %c0_4] : memref<1x64xf32, #tpu.memory_space<vmem>>, vector<1x64xf32>
    %4 = vector.broadcast %3 : vector<1x64xf32> to vector<8x64xf32>
    %5 = arith.addf %2, %4 : vector<8x64xf32>
    %6 = vector.extract_strided_slice %5 {offsets = [0, 0], sizes = [8, 32], strides = [1, 1]} : vector<8x64xf32> to vector<8x32xf32>
    %7 = vector.extract_strided_slice %5 {offsets = [0, 32], sizes = [8, 32], strides = [1, 1]} : vector<8x64xf32> to vector<8x32xf32>
    %c0_5 = arith.constant 0 : index
    %c0_6 = arith.constant 0 : index
    %8 = vector.load %arg4[%c0_5, %c0_6] : memref<8x32xf32, #tpu.memory_space<vmem>>, vector<8x32xf32>
    tpu.vector_store %arg4[%c0_5, %c0_6], %6 {strides = array<i32>} : memref<8x32xf32, #tpu.memory_space<vmem>>, vector<8x32xf32>,
    %c0_7 = arith.constant 0 : index
    %c0_8 = arith.constant 0 : index
    %9 = vector.load %arg5[%c0_7, %c0_8] : memref<8x32xf32, #tpu.memory_space<vmem>>, vector<8x32xf32>
    tpu.vector_store %arg5[%c0_7, %c0_8], %7 {strides = array<i32>} : memref<8x32xf32, #tpu.memory_space<vmem>>, vector<8x32xf32>,
    %c0_9 = arith.constant 0 : index
    %c0_10 = arith.constant 0 : index
    %10 = vector.load %arg3[%c0_9, %c0_10] : memref<8x32xf32, #tpu.memory_space<vmem>>, vector<8x32xf32>
    %cst_11 = arith.constant 5.000000e-01 : f32
    %11 = vector.broadcast %cst_11 : f32 to vector<8x32xf32>
    %12 = arith.mulf %11, %7 : vector<8x32xf32>
    %13 = math.exp %12 : vector<8x32xf32>
    %14 = arith.mulf %10, %13 : vector<8x32xf32>
    %15 = arith.addf %6, %14 : vector<8x32xf32>
    %c0_12 = arith.constant 0 : index
    %c0_13 = arith.constant 0 : index
    %16 = vector.load %arg6[%c0_12, %c0_13] : memref<8x32xf32, #tpu.memory_space<vmem>>, vector<8x32xf32>
    tpu.vector_store %arg6[%c0_12, %c0_13], %15 {strides = array<i32>} : memref<8x32xf32, #tpu.memory_space<vmem>>, vector<8x32xf32>,
    return
  }
}

module attributes {stable_mosaic.version = 11 : i64} {
  func.func @_matmul_bias_act_kernel(%arg0: i32, %arg1: memref<8x1152xbf16, #tpu.memory_space<vmem>>, %arg2: memref<1152x256xbf16, #tpu.memory_space<vmem>>, %arg3: memref<1x256xf32, #tpu.memory_space<vmem>>, %arg4: memref<8x256xbf16, #tpu.memory_space<vmem>>) attributes {dimension_semantics = [#tpu.dimension_semantics<parallel>], iteration_bounds = array<i64: 1>, scalar_prefetch = 0 : i64, scratch_operands = 0 : i64, tpu.core_type = #tpu.core_type<tc>, window_params = [{transform_indices = @transform_0, window_bounds = array<i64: 8, 1152>}, {pipeline_mode = #tpu.pipeline_mode<synchronous>, transform_indices = @transform_1, window_bounds = array<i64: 1152, 256>}, {pipeline_mode = #tpu.pipeline_mode<synchronous>, transform_indices = @transform_2, window_bounds = array<i64: 1, 256>}, {transform_indices = @transform_3, window_bounds = array<i64: 8, 256>}]} {
    %c0 = arith.constant 0 : index
    %c0_0 = arith.constant 0 : index
    %0 = vector.load %arg1[%c0, %c0_0] : memref<8x1152xbf16, #tpu.memory_space<vmem>>, vector<8x1152xbf16>
    %c0_1 = arith.constant 0 : index
    %c0_2 = arith.constant 0 : index
    %1 = vector.load %arg2[%c0_1, %c0_2] : memref<1152x256xbf16, #tpu.memory_space<vmem>>, vector<1152x256xbf16>
    %cst = arith.constant dense<0.000000e+00> : vector<8x256xf32>
    %2 = tpu.matmul %0, %1, %cst {dimension_numbers = #tpu.dot_dimension_numbers<[1], [0], [0], [1], [0, 0, 1, 1], [], []>} : vector<8x1152xbf16>, vector<1152x256xbf16>, vector<8x256xf32> -> vector<8x256xf32>
    %c0_3 = arith.constant 0 : index
    %c0_4 = arith.constant 0 : index
    %3 = vector.load %arg3[%c0_3, %c0_4] : memref<1x256xf32, #tpu.memory_space<vmem>>, vector<1x256xf32>
    %4 = vector.broadcast %3 : vector<1x256xf32> to vector<8x256xf32>
    %5 = arith.addf %2, %4 : vector<8x256xf32>
    %cst_5 = arith.constant 0.000000e+00 : f32
    %6 = vector.broadcast %cst_5 : f32 to vector<8x256xf32>
    %7 = arith.maximumf %5, %6 : vector<8x256xf32>
    %8 = arith.truncf %7 : vector<8x256xf32> to vector<8x256xbf16>
    %c0_6 = arith.constant 0 : index
    %c0_7 = arith.constant 0 : index
    %9 = vector.load %arg4[%c0_6, %c0_7] : memref<8x256xbf16, #tpu.memory_space<vmem>>, vector<8x256xbf16>
    tpu.vector_store %arg4[%c0_6, %c0_7], %8 {strides = array<i32>} : memref<8x256xbf16, #tpu.memory_space<vmem>>, vector<8x256xbf16>,
    return
  }
  func.func @transform_0(%arg0: i32) -> (i32, i32) {
    %c0_i32 = arith.constant 0 : i32
    %c0_i32_0 = arith.constant 0 : i32
    return %arg0, %c0_i32 : i32, i32
  }
  func.func @transform_1(%arg0: i32) -> (i32, i32) {
    %c0_i32 = arith.constant 0 : i32
    %c0_i32_0 = arith.constant 0 : i32
    %c0_i32_1 = arith.constant 0 : i32
    return %c0_i32, %c0_i32_0 : i32, i32
  }
  func.func @transform_2(%arg0: i32) -> (i32, i32) {
    %c0_i32 = arith.constant 0 : i32
    %c0_i32_0 = arith.constant 0 : i32
    %c0_i32_1 = arith.constant 0 : i32
    return %c0_i32, %c0_i32_0 : i32, i32
  }
  func.func @transform_3(%arg0: i32) -> (i32, i32) {
    %c0_i32 = arith.constant 0 : i32
    %c0_i32_0 = arith.constant 0 : i32
    return %arg0, %c0_i32 : i32, i32
  }
}

module attributes {stable_mosaic.version = 11 : i64} {
  func.func @_matmul_bias_act_kernel(%arg0: i32, %arg1: memref<8x128xbf16, #tpu.memory_space<vmem>>, %arg2: memref<128x256xbf16, #tpu.memory_space<vmem>>, %arg3: memref<1x256xf32, #tpu.memory_space<vmem>>, %arg4: memref<8x256xbf16, #tpu.memory_space<vmem>>) attributes {dimension_semantics = [#tpu.dimension_semantics<parallel>], iteration_bounds = array<i64: 1>, scalar_prefetch = 0 : i64, scratch_operands = 0 : i64, tpu.core_type = #tpu.core_type<tc>, window_params = [{transform_indices = @transform_0, window_bounds = array<i64: 8, 128>}, {pipeline_mode = #tpu.pipeline_mode<synchronous>, transform_indices = @transform_1, window_bounds = array<i64: 128, 256>}, {pipeline_mode = #tpu.pipeline_mode<synchronous>, transform_indices = @transform_2, window_bounds = array<i64: 1, 256>}, {transform_indices = @transform_3, window_bounds = array<i64: 8, 256>}]} {
    %c0 = arith.constant 0 : index
    %c0_0 = arith.constant 0 : index
    %0 = vector.load %arg1[%c0, %c0_0] : memref<8x128xbf16, #tpu.memory_space<vmem>>, vector<8x128xbf16>
    %c0_1 = arith.constant 0 : index
    %c0_2 = arith.constant 0 : index
    %1 = vector.load %arg2[%c0_1, %c0_2] : memref<128x256xbf16, #tpu.memory_space<vmem>>, vector<128x256xbf16>
    %cst = arith.constant dense<0.000000e+00> : vector<8x256xf32>
    %2 = tpu.matmul %0, %1, %cst {dimension_numbers = #tpu.dot_dimension_numbers<[1], [0], [0], [1], [0, 0, 1, 1], [], []>} : vector<8x128xbf16>, vector<128x256xbf16>, vector<8x256xf32> -> vector<8x256xf32>
    %c0_3 = arith.constant 0 : index
    %c0_4 = arith.constant 0 : index
    %3 = vector.load %arg3[%c0_3, %c0_4] : memref<1x256xf32, #tpu.memory_space<vmem>>, vector<1x256xf32>
    %4 = vector.broadcast %3 : vector<1x256xf32> to vector<8x256xf32>
    %5 = arith.addf %2, %4 : vector<8x256xf32>
    %6 = arith.truncf %5 : vector<8x256xf32> to vector<8x256xbf16>
    %c0_5 = arith.constant 0 : index
    %c0_6 = arith.constant 0 : index
    %7 = vector.load %arg4[%c0_5, %c0_6] : memref<8x256xbf16, #tpu.memory_space<vmem>>, vector<8x256xbf16>
    tpu.vector_store %arg4[%c0_5, %c0_6], %6 {strides = array<i32>} : memref<8x256xbf16, #tpu.memory_space<vmem>>, vector<8x256xbf16>,
    return
  }
  func.func @transform_0(%arg0: i32) -> (i32, i32) {
    %c0_i32 = arith.constant 0 : i32
    %c0_i32_0 = arith.constant 0 : i32
    return %arg0, %c0_i32 : i32, i32
  }
  func.func @transform_1(%arg0: i32) -> (i32, i32) {
    %c0_i32 = arith.constant 0 : i32
    %c0_i32_0 = arith.constant 0 : i32
    %c0_i32_1 = arith.constant 0 : i32
    return %c0_i32, %c0_i32_0 : i32, i32
  }
  func.func @transform_2(%arg0: i32) -> (i32, i32) {
    %c0_i32 = arith.constant 0 : i32
    %c0_i32_0 = arith.constant 0 : i32
    %c0_i32_1 = arith.constant 0 : i32
    return %c0_i32, %c0_i32_0 : i32, i32
  }
  func.func @transform_3(%arg0: i32) -> (i32, i32) {
    %c0_i32 = arith.constant 0 : i32
    %c0_i32_0 = arith.constant 0 : i32
    return %arg0, %c0_i32 : i32, i32
  }
}

module attributes {stable_mosaic.version = 11 : i64} {
  func.func @_matmul_bias_act_kernel(%arg0: i32, %arg1: memref<8x2304xbf16, #tpu.memory_space<vmem>>, %arg2: memref<2304x128xbf16, #tpu.memory_space<vmem>>, %arg3: memref<1x128xf32, #tpu.memory_space<vmem>>, %arg4: memref<8x128xbf16, #tpu.memory_space<vmem>>) attributes {dimension_semantics = [#tpu.dimension_semantics<parallel>], iteration_bounds = array<i64: 1>, scalar_prefetch = 0 : i64, scratch_operands = 0 : i64, tpu.core_type = #tpu.core_type<tc>, window_params = [{transform_indices = @transform_0, window_bounds = array<i64: 8, 2304>}, {pipeline_mode = #tpu.pipeline_mode<synchronous>, transform_indices = @transform_1, window_bounds = array<i64: 2304, 128>}, {pipeline_mode = #tpu.pipeline_mode<synchronous>, transform_indices = @transform_2, window_bounds = array<i64: 1, 128>}, {transform_indices = @transform_3, window_bounds = array<i64: 8, 128>}]} {
    %c0 = arith.constant 0 : index
    %c0_0 = arith.constant 0 : index
    %0 = vector.load %arg1[%c0, %c0_0] : memref<8x2304xbf16, #tpu.memory_space<vmem>>, vector<8x2304xbf16>
    %c0_1 = arith.constant 0 : index
    %c0_2 = arith.constant 0 : index
    %1 = vector.load %arg2[%c0_1, %c0_2] : memref<2304x128xbf16, #tpu.memory_space<vmem>>, vector<2304x128xbf16>
    %cst = arith.constant dense<0.000000e+00> : vector<8x128xf32>
    %2 = tpu.matmul %0, %1, %cst {dimension_numbers = #tpu.dot_dimension_numbers<[1], [0], [0], [1], [0, 0, 1, 1], [], []>} : vector<8x2304xbf16>, vector<2304x128xbf16>, vector<8x128xf32> -> vector<8x128xf32>
    %c0_3 = arith.constant 0 : index
    %c0_4 = arith.constant 0 : index
    %3 = vector.load %arg3[%c0_3, %c0_4] : memref<1x128xf32, #tpu.memory_space<vmem>>, vector<1x128xf32>
    %4 = vector.broadcast %3 : vector<1x128xf32> to vector<8x128xf32>
    %5 = arith.addf %2, %4 : vector<8x128xf32>
    %cst_5 = arith.constant 0.000000e+00 : f32
    %6 = vector.broadcast %cst_5 : f32 to vector<8x128xf32>
    %7 = arith.maximumf %5, %6 : vector<8x128xf32>
    %8 = arith.truncf %7 : vector<8x128xf32> to vector<8x128xbf16>
    %c0_6 = arith.constant 0 : index
    %c0_7 = arith.constant 0 : index
    %9 = vector.load %arg4[%c0_6, %c0_7] : memref<8x128xbf16, #tpu.memory_space<vmem>>, vector<8x128xbf16>
    tpu.vector_store %arg4[%c0_6, %c0_7], %8 {strides = array<i32>} : memref<8x128xbf16, #tpu.memory_space<vmem>>, vector<8x128xbf16>,
    return
  }
  func.func @transform_0(%arg0: i32) -> (i32, i32) {
    %c0_i32 = arith.constant 0 : i32
    %c0_i32_0 = arith.constant 0 : i32
    return %arg0, %c0_i32 : i32, i32
  }
  func.func @transform_1(%arg0: i32) -> (i32, i32) {
    %c0_i32 = arith.constant 0 : i32
    %c0_i32_0 = arith.constant 0 : i32
    %c0_i32_1 = arith.constant 0 : i32
    return %c0_i32, %c0_i32_0 : i32, i32
  }
  func.func @transform_2(%arg0: i32) -> (i32, i32) {
    %c0_i32 = arith.constant 0 : i32
    %c0_i32_0 = arith.constant 0 : i32
    %c0_i32_1 = arith.constant 0 : i32
    return %c0_i32, %c0_i32_0 : i32, i32
  }
  func.func @transform_3(%arg0: i32) -> (i32, i32) {
    %c0_i32 = arith.constant 0 : i32
    %c0_i32_0 = arith.constant 0 : i32
    return %arg0, %c0_i32 : i32, i32
  }
}

module attributes {stable_mosaic.version = 11 : i64} {
  func.func @_matmul_bias_act_kernel(%arg0: i32, %arg1: memref<32x1152xbf16, #tpu.memory_space<vmem>>, %arg2: memref<1152x128xbf16, #tpu.memory_space<vmem>>, %arg3: memref<1x128xf32, #tpu.memory_space<vmem>>, %arg4: memref<32x128xbf16, #tpu.memory_space<vmem>>) attributes {dimension_semantics = [#tpu.dimension_semantics<parallel>], iteration_bounds = array<i64: 1>, scalar_prefetch = 0 : i64, scratch_operands = 0 : i64, tpu.core_type = #tpu.core_type<tc>, window_params = [{transform_indices = @transform_0, window_bounds = array<i64: 32, 1152>}, {pipeline_mode = #tpu.pipeline_mode<synchronous>, transform_indices = @transform_1, window_bounds = array<i64: 1152, 128>}, {pipeline_mode = #tpu.pipeline_mode<synchronous>, transform_indices = @transform_2, window_bounds = array<i64: 1, 128>}, {transform_indices = @transform_3, window_bounds = array<i64: 32, 128>}]} {
    %c0 = arith.constant 0 : index
    %c0_0 = arith.constant 0 : index
    %0 = vector.load %arg1[%c0, %c0_0] : memref<32x1152xbf16, #tpu.memory_space<vmem>>, vector<32x1152xbf16>
    %c0_1 = arith.constant 0 : index
    %c0_2 = arith.constant 0 : index
    %1 = vector.load %arg2[%c0_1, %c0_2] : memref<1152x128xbf16, #tpu.memory_space<vmem>>, vector<1152x128xbf16>
    %cst = arith.constant dense<0.000000e+00> : vector<32x128xf32>
    %2 = tpu.matmul %0, %1, %cst {dimension_numbers = #tpu.dot_dimension_numbers<[1], [0], [0], [1], [0, 0, 1, 1], [], []>} : vector<32x1152xbf16>, vector<1152x128xbf16>, vector<32x128xf32> -> vector<32x128xf32>
    %c0_3 = arith.constant 0 : index
    %c0_4 = arith.constant 0 : index
    %3 = vector.load %arg3[%c0_3, %c0_4] : memref<1x128xf32, #tpu.memory_space<vmem>>, vector<1x128xf32>
    %4 = vector.broadcast %3 : vector<1x128xf32> to vector<32x128xf32>
    %5 = arith.addf %2, %4 : vector<32x128xf32>
    %cst_5 = arith.constant 0.000000e+00 : f32
    %6 = vector.broadcast %cst_5 : f32 to vector<32x128xf32>
    %7 = arith.maximumf %5, %6 : vector<32x128xf32>
    %8 = arith.truncf %7 : vector<32x128xf32> to vector<32x128xbf16>
    %c0_6 = arith.constant 0 : index
    %c0_7 = arith.constant 0 : index
    %9 = vector.load %arg4[%c0_6, %c0_7] : memref<32x128xbf16, #tpu.memory_space<vmem>>, vector<32x128xbf16>
    tpu.vector_store %arg4[%c0_6, %c0_7], %8 {strides = array<i32>} : memref<32x128xbf16, #tpu.memory_space<vmem>>, vector<32x128xbf16>,
    return
  }
  func.func @transform_0(%arg0: i32) -> (i32, i32) {
    %c0_i32 = arith.constant 0 : i32
    %c0_i32_0 = arith.constant 0 : i32
    return %arg0, %c0_i32 : i32, i32
  }
  func.func @transform_1(%arg0: i32) -> (i32, i32) {
    %c0_i32 = arith.constant 0 : i32
    %c0_i32_0 = arith.constant 0 : i32
    %c0_i32_1 = arith.constant 0 : i32
    return %c0_i32, %c0_i32_0 : i32, i32
  }
  func.func @transform_2(%arg0: i32) -> (i32, i32) {
    %c0_i32 = arith.constant 0 : i32
    %c0_i32_0 = arith.constant 0 : i32
    %c0_i32_1 = arith.constant 0 : i32
    return %c0_i32, %c0_i32_0 : i32, i32
  }
  func.func @transform_3(%arg0: i32) -> (i32, i32) {
    %c0_i32 = arith.constant 0 : i32
    %c0_i32_0 = arith.constant 0 : i32
    return %arg0, %c0_i32 : i32, i32
  }
}

module attributes {stable_mosaic.version = 11 : i64} {
  func.func @_matmul_bias_act_kernel(%arg0: i32, %arg1: memref<64x640xbf16, #tpu.memory_space<vmem>>, %arg2: memref<640x128xbf16, #tpu.memory_space<vmem>>, %arg3: memref<1x128xf32, #tpu.memory_space<vmem>>, %arg4: memref<64x128xbf16, #tpu.memory_space<vmem>>) attributes {dimension_semantics = [#tpu.dimension_semantics<parallel>], iteration_bounds = array<i64: 2>, scalar_prefetch = 0 : i64, scratch_operands = 0 : i64, tpu.core_type = #tpu.core_type<tc>, window_params = [{transform_indices = @transform_0, window_bounds = array<i64: 64, 640>}, {pipeline_mode = #tpu.pipeline_mode<synchronous>, transform_indices = @transform_1, window_bounds = array<i64: 640, 128>}, {pipeline_mode = #tpu.pipeline_mode<synchronous>, transform_indices = @transform_2, window_bounds = array<i64: 1, 128>}, {transform_indices = @transform_3, window_bounds = array<i64: 64, 128>}]} {
    %c0 = arith.constant 0 : index
    %c0_0 = arith.constant 0 : index
    %0 = vector.load %arg1[%c0, %c0_0] : memref<64x640xbf16, #tpu.memory_space<vmem>>, vector<64x640xbf16>
    %c0_1 = arith.constant 0 : index
    %c0_2 = arith.constant 0 : index
    %1 = vector.load %arg2[%c0_1, %c0_2] : memref<640x128xbf16, #tpu.memory_space<vmem>>, vector<640x128xbf16>
    %cst = arith.constant dense<0.000000e+00> : vector<64x128xf32>
    %2 = tpu.matmul %0, %1, %cst {dimension_numbers = #tpu.dot_dimension_numbers<[1], [0], [0], [1], [0, 0, 1, 1], [], []>} : vector<64x640xbf16>, vector<640x128xbf16>, vector<64x128xf32> -> vector<64x128xf32>
    %c0_3 = arith.constant 0 : index
    %c0_4 = arith.constant 0 : index
    %3 = vector.load %arg3[%c0_3, %c0_4] : memref<1x128xf32, #tpu.memory_space<vmem>>, vector<1x128xf32>
    %4 = vector.broadcast %3 : vector<1x128xf32> to vector<64x128xf32>
    %5 = arith.addf %2, %4 : vector<64x128xf32>
    %cst_5 = arith.constant 0.000000e+00 : f32
    %6 = vector.broadcast %cst_5 : f32 to vector<64x128xf32>
    %7 = arith.maximumf %5, %6 : vector<64x128xf32>
    %8 = arith.truncf %7 : vector<64x128xf32> to vector<64x128xbf16>
    %c0_6 = arith.constant 0 : index
    %c0_7 = arith.constant 0 : index
    %9 = vector.load %arg4[%c0_6, %c0_7] : memref<64x128xbf16, #tpu.memory_space<vmem>>, vector<64x128xbf16>
    tpu.vector_store %arg4[%c0_6, %c0_7], %8 {strides = array<i32>} : memref<64x128xbf16, #tpu.memory_space<vmem>>, vector<64x128xbf16>,
    return
  }
  func.func @transform_0(%arg0: i32) -> (i32, i32) {
    %c0_i32 = arith.constant 0 : i32
    %c0_i32_0 = arith.constant 0 : i32
    return %arg0, %c0_i32 : i32, i32
  }
  func.func @transform_1(%arg0: i32) -> (i32, i32) {
    %c0_i32 = arith.constant 0 : i32
    %c0_i32_0 = arith.constant 0 : i32
    %c0_i32_1 = arith.constant 0 : i32
    return %c0_i32, %c0_i32_0 : i32, i32
  }
  func.func @transform_2(%arg0: i32) -> (i32, i32) {
    %c0_i32 = arith.constant 0 : i32
    %c0_i32_0 = arith.constant 0 : i32
    %c0_i32_1 = arith.constant 0 : i32
    return %c0_i32, %c0_i32_0 : i32, i32
  }
  func.func @transform_3(%arg0: i32) -> (i32, i32) {
    %c0_i32 = arith.constant 0 : i32
    %c0_i32_0 = arith.constant 0 : i32
    return %arg0, %c0_i32 : i32, i32
  }
}

module attributes {stable_mosaic.version = 11 : i64} {
  func.func @_matmul_bias_act_kernel(%arg0: i32, %arg1: memref<128x384xbf16, #tpu.memory_space<vmem>>, %arg2: memref<384x128xbf16, #tpu.memory_space<vmem>>, %arg3: memref<1x128xf32, #tpu.memory_space<vmem>>, %arg4: memref<128x128xf32, #tpu.memory_space<vmem>>) attributes {dimension_semantics = [#tpu.dimension_semantics<parallel>], iteration_bounds = array<i64: 2>, scalar_prefetch = 0 : i64, scratch_operands = 0 : i64, tpu.core_type = #tpu.core_type<tc>, window_params = [{transform_indices = @transform_0, window_bounds = array<i64: 128, 384>}, {pipeline_mode = #tpu.pipeline_mode<synchronous>, transform_indices = @transform_1, window_bounds = array<i64: 384, 128>}, {pipeline_mode = #tpu.pipeline_mode<synchronous>, transform_indices = @transform_2, window_bounds = array<i64: 1, 128>}, {transform_indices = @transform_3, window_bounds = array<i64: 128, 128>}]} {
    %c0 = arith.constant 0 : index
    %c0_0 = arith.constant 0 : index
    %0 = vector.load %arg1[%c0, %c0_0] : memref<128x384xbf16, #tpu.memory_space<vmem>>, vector<128x384xbf16>
    %c0_1 = arith.constant 0 : index
    %c0_2 = arith.constant 0 : index
    %1 = vector.load %arg2[%c0_1, %c0_2] : memref<384x128xbf16, #tpu.memory_space<vmem>>, vector<384x128xbf16>
    %cst = arith.constant dense<0.000000e+00> : vector<128x128xf32>
    %2 = tpu.matmul %0, %1, %cst {dimension_numbers = #tpu.dot_dimension_numbers<[1], [0], [0], [1], [0, 0, 1, 1], [], []>} : vector<128x384xbf16>, vector<384x128xbf16>, vector<128x128xf32> -> vector<128x128xf32>
    %c0_3 = arith.constant 0 : index
    %c0_4 = arith.constant 0 : index
    %3 = vector.load %arg3[%c0_3, %c0_4] : memref<1x128xf32, #tpu.memory_space<vmem>>, vector<1x128xf32>
    %4 = vector.broadcast %3 : vector<1x128xf32> to vector<128x128xf32>
    %5 = arith.addf %2, %4 : vector<128x128xf32>
    %c0_5 = arith.constant 0 : index
    %c0_6 = arith.constant 0 : index
    %6 = vector.load %arg4[%c0_5, %c0_6] : memref<128x128xf32, #tpu.memory_space<vmem>>, vector<128x128xf32>
    tpu.vector_store %arg4[%c0_5, %c0_6], %5 {strides = array<i32>} : memref<128x128xf32, #tpu.memory_space<vmem>>, vector<128x128xf32>,
    return
  }
  func.func @transform_0(%arg0: i32) -> (i32, i32) {
    %c0_i32 = arith.constant 0 : i32
    %c0_i32_0 = arith.constant 0 : i32
    return %arg0, %c0_i32 : i32, i32
  }
  func.func @transform_1(%arg0: i32) -> (i32, i32) {
    %c0_i32 = arith.constant 0 : i32
    %c0_i32_0 = arith.constant 0 : i32
    %c0_i32_1 = arith.constant 0 : i32
    return %c0_i32, %c0_i32_0 : i32, i32
  }
  func.func @transform_2(%arg0: i32) -> (i32, i32) {
    %c0_i32 = arith.constant 0 : i32
    %c0_i32_0 = arith.constant 0 : i32
    %c0_i32_1 = arith.constant 0 : i32
    return %c0_i32, %c0_i32_0 : i32, i32
  }
  func.func @transform_3(%arg0: i32) -> (i32, i32) {
    %c0_i32 = arith.constant 0 : i32
    %c0_i32_0 = arith.constant 0 : i32
    return %arg0, %c0_i32 : i32, i32
  }
}

</mosaic_0001>

<bundles_post_ra>
// kernel: vae_forward.10
= control target key start
LH: loop header
LB: loop body
LE: loop exit
PB: predicated region body
PF: predicated region fallthrough
CT: control target
= control target key end

     0   :  { %s610_s12 = smov 0   ;;  %s667_s0 = inlined_call_operand.vmem [shape: bf16[128,128], index: 0, kind: input, shape index: {}]   ;;  %s668_s1 = inlined_call_operand.vmem [shape: bf16[128,128], index: 1, kind: input, shape index: {}]   ;;  %s669_s2 = inlined_call_operand.vmem [shape: f32[1,128], index: 2, kind: input, shape index: {}]   ;;  %s670_s3 = inlined_call_operand.vmem [shape: bf16[128,128], index: 3, kind: output, shape index: {}]  }
   0x1 LB: > { %s447_s13 = sadd.s32 4294967295, %s588_s12   ;;  %p451_p0 = scmp.ge.s32.totalorder %s588_s12, 1  ;;  %s588_s12 = sphi %s610_s12, %s13_s12  }
   0x2   : > { %p138_p1 = scmp.lt.s32.totalorder %s588_s12, 3 }
   0x4   : > { %p139_p2 = pnand %p451_p0, %p138_p1 }
   0x5   : > { %s452_s16 = sshll.u32 (!%p139_p2), %s447_s13, 3 }
   0x6   : > { %142 = sbr.rel (%p139_p2) target bundleno = 250 (0xfa), region = 32  ;;  %p163_p3 = scmp.lt.s32.totalorder (!%p139_p2), %s452_s16, 15 }
   0xb   : > { %v570_v0 = vld [vmem:[%s668_s1 + $0x38] sm:$0xff]   ;;  %v571_v1 = vld [vmem:[%s668_s1 + $0x30] sm:$0xff]   ;;  %s672_s16 = smov (!%p163_p3, %s452_s16), 15  ;;  %v572_v2 = vld [vmem:[%s668_s1 + $0x28] sm:$0xff]  }
   0xc   : > { %522 = vmatprep.subr.bf16.mxu0 %v570_v0  ;;  %546 = vmatprep.subr.bf16.mxu1 %v570_v0  ;;  %s453_s21 = sshll.u32 %s672_s16, 2  ;;  %v573_v3 = vld [vmem:[%s668_s1 + $0x20] sm:$0xff]   ;;  %v574_v6 = vld [vmem:[%s668_s1 + $0x18] sm:$0xff]   ;;  %v575_v7 = vld [vmem:[%s668_s1 + $0x10] sm:$0xff]  }
   0xd   : > { %523 = vmatpush3.bf16.msra.mxu0 %v570_v0  ;;  %554 = vmatpush3.bf16.msra.mxu1 %v570_v0  ;;  %s635_s24 = scalar_lea.vmem %s667_s0, %s453_s21  ;;  %v576_v8 = vld [vmem:[%s668_s1 + $0x8] sm:$0xff]   ;;  %v577_v9 = vld [vmem:[%s668_s1] sm:$0xff]   ;;  %s172_s13 = scalar_lea.vmem %s670_s3, %s453_s21 }
   0xe   : > { %524 = vmatprep.subr.bf16.mxu0 %v571_v1  ;;  %547 = vmatprep.subr.bf16.mxu1 %v571_v1  ;;  %v578_v4 = vld [vmem:[%s635_s24] sm:$0xff]   ;;  %v579_v5 = vld [vmem:[%s635_s24 + $0x10] sm:$0xff]   ;;  %v580_v10 = vld [vmem:[%s635_s24 + $0x8] sm:$0xff]  }
   0xf   : > { %538 = vmatprep.mubr.bf16.mxu0 %v578_v4  ;;  %542 = vmatprep.mubr.bf16.mxu1 %v579_v5  ;;  %v581_v11 = vld [vmem:[%s635_s24 + $0x18] sm:$0xff]   ;;  %v456_v12 = vld [vmem:[%s669_s2] ss:$0 sm:$0xff] }
  0x11   : > { %525 = vmatpush3.bf16.msra.mxu0 %v571_v1  ;;  %555 = vmatpush3.bf16.msra.mxu1 %v571_v1 }
  0x12   : > { %526 = vmatprep.subr.bf16.mxu0 %v572_v2  ;;  %548 = vmatprep.subr.bf16.mxu1 %v572_v2 }
  0x15   : > { %527 = vmatpush3.bf16.msra.mxu0 %v572_v2  ;;  %556 = vmatpush3.bf16.msra.mxu1 %v572_v2 }
  0x16   : > { %528 = vmatprep.subr.bf16.mxu0 %v573_v3  ;;  %549 = vmatprep.subr.bf16.mxu1 %v573_v3 }
  0x19   : > { %529 = vmatpush3.bf16.msra.mxu0 %v573_v3  ;;  %557 = vmatpush3.bf16.msra.mxu1 %v573_v3 }
  0x1a   : > { %530 = vmatprep.subr.bf16.mxu0 %v574_v6  ;;  %550 = vmatprep.subr.bf16.mxu1 %v574_v6 }
  0x1d   : > { %531 = vmatpush3.bf16.msra.mxu0 %v574_v6  ;;  %558 = vmatpush3.bf16.msra.mxu1 %v574_v6 }
  0x1e   : > { %532 = vmatprep.subr.bf16.mxu0 %v575_v7  ;;  %551 = vmatprep.subr.bf16.mxu1 %v575_v7 }
  0x21   : > { %533 = vmatpush3.bf16.msra.mxu0 %v575_v7  ;;  %559 = vmatpush3.bf16.msra.mxu1 %v575_v7 }
  0x22   : > { %534 = vmatprep.subr.bf16.mxu0 %v576_v8  ;;  %552 = vmatprep.subr.bf16.mxu1 %v576_v8 }
  0x25   : > { %535 = vmatpush3.bf16.msra.mxu0 %v576_v8  ;;  %560 = vmatpush3.bf16.msra.mxu1 %v576_v8 }
  0x26   : > { %536 = vmatprep.subr.bf16.mxu0 %v577_v9  ;;  %553 = vmatprep.subr.bf16.mxu1 %v577_v9 }
  0x29   : > { %537 = vmatpush3.bf16.msra.mxu0 %v577_v9  ;;  %561 = vmatpush3.bf16.msra.mxu1 %v577_v9 }
  0x2c   : > { %539 = vmatmul.mubr.bf16.vlgmr.msra.gmra.mxu0 %v580_v10  ;;  %543 = vmatmul.mubr.bf16.vlgmr.msra.gmra.mxu1 %v581_v11 }
  0xec   : > { %v540_v13 = vpop.f32.mrf.mxu0  ;;  %v544_v14 = vpop.f32.mrf.mxu1 }
  0xed   : > { %v321_v15 = vadd.f32 %v540_v13, %v456_v12  ;;  %v337_v16 = vadd.f32 %v544_v14, %v456_v12 }
  0xee   : > { %v312_v17 = vpop.f32.mrf.mxu0  ;;  %v328_v18 = vpop.f32.mrf.mxu1 }
  0xef   : > { %v313_v19 = vadd.f32 %v456_v12, %v312_v17  ;;  %v329_v20 = vadd.f32 %v456_v12, %v328_v18  ;;  %v345_v25 = vmax.f32 %v321_v15, 0.0  ;;  %v349_v26 = vmax.f32 %v337_v16, 0.0 }
  0xf0   : > { %v541_v21 = vpop.f32.mrf.mxu0  ;;  %v545_v22 = vpop.f32.mrf.mxu1 }
  0xf1   : > { %v324_v23 = vadd.f32 %v541_v21, %v456_v12  ;;  %v340_v24 = vadd.f32 %v545_v22, %v456_v12  ;;  %v343_v33 = vmax.f32 %v313_v19, 0.0  ;;  %v347_v34 = vmax.f32 %v329_v20, 0.0 }
  0xf2   : > { %v315_v27 = vpop.f32.mrf.mxu0  ;;  %v331_v28 = vpop.f32.mrf.mxu1 }
  0xf3   : > { %v346_v29 = vmax.f32 %v324_v23, 0.0  ;;  %v350_v30 = vmax.f32 %v340_v24, 0.0  ;;  %v316_v31 = vadd.f32 %v456_v12, %v315_v27  ;;  %v332_v32 = vadd.f32 %v456_v12, %v331_v28 }
  0xf5   : > { %v495_v35 = vpack.c.bf16 %v346_v29, %v345_v25  ;;  %v505_v36 = vpack.c.bf16 %v350_v30, %v349_v26  ;;  %v344_v37 = vmax.f32 %v316_v31, 0.0  ;;  %v348_v38 = vmax.f32 %v332_v32, 0.0 }
  0xf7   : > { %507 = vst [vmem:[%s172_s13 + $0x8] sm:$0xff] %v495_v35   ;;  %509 = vst [vmem:[%s172_s13 + $0x18] sm:$0xff] %v505_v36   ;;  %v490_v39 = vpack.c.bf16 %v344_v37, %v343_v33  ;;  %v500_v40 = vpack.c.bf16 %v348_v38, %v347_v34 }
  0xf9   : > { %491 = vst [vmem:[%s172_s13] sm:$0xff] %v490_v39   ;;  %508 = vst [vmem:[%s172_s13 + $0x10] sm:$0xff] %v500_v40  }
  0xfa PF: > { %s13_s12 = sadd.s32 1, %s588_s12  }
  0xfb   : > { %p10_p4 = scmp.ge.s32.totalorder %s13_s12, 4  }
  0xfd   :  { %12 = sbr.rel (!%p10_p4) target bundleno = 1 (0x1), region = 62 }

// kernel: vae_forward.11
= control target key start
LH: loop header
LB: loop body
LE: loop exit
PB: predicated region body
PF: predicated region fallthrough
CT: control target
= control target key end

     0   :  { %s639_s1 = inlined_call_operand.vmem [shape: bf16[384,128], index: 1, kind: input, shape index: {}]   ;;  %s640_s0 = inlined_call_operand.vmem [shape: bf16[32,384], index: 0, kind: input, shape index: {}]   ;;  %s641_s2 = inlined_call_operand.vmem [shape: f32[1,128], index: 2, kind: input, shape index: {}]   ;;  %s642_s3 = inlined_call_operand.vmem [shape: bf16[32,128], index: 3, kind: output, shape index: {}]  }
   0x1   :  { %v488_v0 = vld [vmem:[%s639_s1 + $0x78] sm:$0xff]   ;;  %v490_v2 = vld [vmem:[%s639_s1 + $0x70] sm:$0xff]   ;;  %v493_v5 = vld [vmem:[%s639_s1 + $0x68] sm:$0xff]  }
   0x2   :  { %v489_v1 = vld [vmem:[%s639_s1 + $0x38] sm:$0xff]   ;;  %430 = vmatprep.subr.bf16.mxu0 %v488_v0  ;;  %v492_v4 = vld [vmem:[%s639_s1 + $0x30] sm:$0xff]   ;;  %v495_v7 = vld [vmem:[%s639_s1 + $0x28] sm:$0xff]  }
   0x3   :  { %431 = vmatpush3.bf16.msra.mxu0 %v489_v1  ;;  %v491_v3 = vld [vmem:[%s639_s1 + $0xb8] sm:$0xff]   ;;  %v494_v6 = vld [vmem:[%s639_s1 + $0xb0] sm:$0xff]   ;;  %v496_v8 = vld [vmem:[%s639_s1 + $0x60] sm:$0xff]  }
   0x4   :  { %432 = vmatprep.subr.bf16.mxu0 %v490_v2  ;;  %468 = vmatprep.subr.bf16.mxu1 %v491_v3  ;;  %v497_v9 = vld [vmem:[%s639_s1 + $0xa8] sm:$0xff]   ;;  %v498_v10 = vld [vmem:[%s639_s1 + $0x20] sm:$0xff]   ;;  %v499_v11 = vld [vmem:[%s639_s1 + $0x58] sm:$0xff]  }
   0x5   :  { %469 = vmatpush3.bf16.msra.mxu1 %v491_v3  ;;  %v500_v12 = vld [vmem:[%s639_s1 + $0xa0] sm:$0xff]   ;;  %v501_v13 = vld [vmem:[%s639_s1 + $0x18] sm:$0xff]   ;;  %v502_v15 = vld [vmem:[%s639_s1 + $0x50] sm:$0xff]  }
   0x6   :  { %470 = vmatprep.subr.bf16.mxu1 %v494_v6  ;;  %v503_v14 = vld [vmem:[%s639_s1 + $0x98] sm:$0xff]   ;;  %v504_v16 = vld [vmem:[%s639_s1 + $0x10] sm:$0xff]   ;;  %v505_v18 = vld [vmem:[%s639_s1 + $0x48] sm:$0xff]  }
   0x7   :  { %433 = vmatpush3.bf16.msra.mxu0 %v492_v4  ;;  %v506_v17 = vld [vmem:[%s639_s1 + $0x90] sm:$0xff]   ;;  %v507_v19 = vld [vmem:[%s639_s1 + $0x8] sm:$0xff]   ;;  %v508_v20 = vld [vmem:[%s639_s1 + $0x40] sm:$0xff]  }
   0x8   :  { %434 = vmatprep.subr.bf16.mxu0 %v493_v5  ;;  %v509_v21 = vld [vmem:[%s639_s1 + $0x88] sm:$0xff]   ;;  %v513_v22 = vld [vmem:[%s640_s0 + $0x4] ss:$12 sps:$4 sm:$0xff]   ;;  %v380_v32 = vld [vmem:[%s641_s2] ss:$0 sm:$0xff] }
   0x9   :  { %471 = vmatpush3.bf16.msra.mxu1 %v494_v6  ;;  %v510_v23 = vld [vmem:[%s639_s1] sm:$0xff]   ;;  %286 = vmatprep.mubr.bf16.mxu0 %v513_v22  ;;  %v515_v24 = vld [vmem:[%s640_s0 + $0x8] ss:$12 sps:$4 sm:$0xff]  }
   0xa   :  { %472 = vmatprep.subr.bf16.mxu1 %v497_v9  ;;  %v514_v25 = vld [vmem:[%s639_s1 + $0x80] sm:$0xff]   ;;  %484 = vmatprep.mubr.bf16.mxu1 %v515_v24  ;;  %v517_v27 = vld [vmem:[%s640_s0 + $0x1c] ss:$12 sps:$4 sm:$0xff]  }
   0xb   :  { %435 = vmatpush3.bf16.msra.mxu0 %v495_v7  ;;  %v511_v26 = vld [vmem:[%s640_s0] ss:$12 sps:$4 sm:$0xff]   ;;  %v519_v29 = vld [vmem:[%s640_s0 + $0x18] ss:$12 sps:$4 sm:$0xff]  }
   0xc   :  { %436 = vmatprep.subr.bf16.mxu0 %v496_v8  ;;  %v516_v28 = vld [vmem:[%s640_s0 + $0x20] ss:$12 sps:$4 sm:$0xff]  }
   0xd   :  { %473 = vmatpush3.bf16.msra.mxu1 %v497_v9 }
   0xe   :  { %474 = vmatprep.subr.bf16.mxu1 %v500_v12 }
   0xf   :  { %437 = vmatpush3.bf16.msra.mxu0 %v498_v10 }
  0x10   :  { %438 = vmatprep.subr.bf16.mxu0 %v499_v11 }
  0x11   :  { %475 = vmatpush3.bf16.msra.mxu1 %v500_v12 }
  0x12   :  { %476 = vmatprep.subr.bf16.mxu1 %v503_v14 }
  0x13   :  { %439 = vmatpush3.bf16.msra.mxu0 %v501_v13 }
  0x14   :  { %440 = vmatprep.subr.bf16.mxu0 %v502_v15 }
  0x15   :  { %477 = vmatpush3.bf16.msra.mxu1 %v503_v14 }
  0x16   :  { %478 = vmatprep.subr.bf16.mxu1 %v506_v17 }
  0x17   :  { %441 = vmatpush3.bf16.msra.mxu0 %v504_v16 }
  0x18   :  { %442 = vmatprep.subr.bf16.mxu0 %v505_v18 }
  0x19   :  { %479 = vmatpush3.bf16.msra.mxu1 %v506_v17 }
  0x1a   :  { %480 = vmatprep.subr.bf16.mxu1 %v509_v21 }
  0x1b   :  { %443 = vmatpush3.bf16.msra.mxu0 %v507_v19 }
  0x1c   :  { %444 = vmatprep.subr.bf16.mxu0 %v508_v20 }
  0x1d   :  { %481 = vmatpush3.bf16.msra.mxu1 %v509_v21 }
  0x1e   :  { %482 = vmatprep.subr.bf16.mxu1 %v514_v25 }
  0x1f   :  { %445 = vmatpush3.bf16.msra.mxu0 %v510_v23 }
  0x21   :  { %483 = vmatpush3.bf16.msra.mxu1 %v514_v25 }
  0x22   :  { %287 = vmatmul.mubr.bf16.vlgmr.msra.gmra.mxu0 %v511_v26 }
  0x23   :  { %294 = vmatprep.mubr.bf16.mxu0 %v517_v27 }
  0x24   :  { %485 = vmatmul.mubr.bf16.vlgmr.msra.gmra.mxu1 %v516_v28 }
  0x2a   :  { %295 = vmatmul.mubr.bf16.gmra.mxu0 %v519_v29 }
  0xe2   :  { %v446_v30 = vpop.f32.mrf.mxu0 }
  0xe4   :  { %v447_v31 = vpop.f32.mrf.mxu0  ;;  %v486_v34 = vpop.f32.mrf.mxu1 }
  0xe5   :  { %v448_v33 = vadd.f32 %v447_v31, %v446_v30 }
  0xe6   :  { %v449_v35 = vpop.f32.mrf.mxu0  ;;  %v337_v37 = vpop.f32.mrf.mxu1 }
  0xe7   :  { %v289_v36 = vadd.f32 %v448_v33, %v380_v32 }
  0xe8   :  { %v450_v38 = vpop.f32.mrf.mxu0  ;;  %v487_v40 = vpop.f32.mrf.mxu1 }
  0xe9   :  { %v451_v39 = vadd.f32 %v450_v38, %v449_v35  ;;  %v338_v42 = vadd.f32 %v337_v37, %v289_v36 }
  0xea   :  { %v452_v41 = vpop.f32.mrf.mxu0  ;;  %v340_v44 = vpop.f32.mrf.mxu1 }
  0xeb   :  { %v292_v43 = vadd.f32 %v451_v39, %v380_v32  ;;  %v352_v49 = vmax.f32 %v338_v42, 0.0 }
  0xec   :  { %v453_v45 = vpop.f32.mrf.mxu0 }
  0xed   :  { %v454_v46 = vadd.f32 %v453_v45, %v452_v41  ;;  %v341_v47 = vadd.f32 %v340_v44, %v292_v43 }
  0xee   :  { %v455_v48 = vpop.f32.mrf.mxu0 }
  0xef   :  { %v297_v50 = vadd.f32 %v454_v46, %v380_v32  ;;  %v353_v51 = vmax.f32 %v341_v47, 0.0 }
  0xf0   :  { %v456_v52 = vpop.f32.mrf.mxu0 }
  0xf1   :  { %v422_v53 = vpack.c.bf16 %v353_v51, %v352_v49  ;;  %v457_v54 = vadd.f32 %v456_v52, %v455_v48  ;;  %v346_v55 = vadd.f32 %v486_v34, %v297_v50 }
  0xf3   :  { %423 = vst [vmem:[%s642_s3] sm:$0xff] %v422_v53   ;;  %v300_v56 = vadd.f32 %v457_v54, %v380_v32  ;;  %v354_v58 = vmax.f32 %v346_v55, 0.0 }
  0xf5   :  { %v349_v57 = vadd.f32 %v487_v40, %v300_v56 }
  0xf7   :  { %v355_v59 = vmax.f32 %v349_v57, 0.0 }
  0xf9   :  { %v427_v60 = vpack.c.bf16 %v355_v59, %v354_v58 }
  0xfb   :  { %429 = vst [vmem:[%s642_s3 + $0x8] sm:$0xff] %v427_v60  }

// kernel: vae_forward.14
= control target key start
LH: loop header
LB: loop body
LE: loop exit
PB: predicated region body
PF: predicated region fallthrough
CT: control target
= control target key end

     0   :  { %vm204_vm0 = vcmask 261120   ;;  %s401_s1 = inlined_call_operand.vmem [shape: bf16[256,64], index: 1, kind: input, shape index: {}]   ;;  %s402_s0 = inlined_call_operand.vmem [shape: bf16[8,256], index: 0, kind: input, shape index: {}]   ;;  %s403_s2 = inlined_call_operand.vmem [shape: f32[1,64], index: 2, kind: input, shape index: {}]   ;;  %s404_s4 = inlined_call_operand.vmem [shape: f32[8,32], index: 4, kind: output, shape index: {0}]   ;;  %s405_s3 = inlined_call_operand.vmem [shape: f32[8,32], index: 3, kind: input, shape index: {}]   ;;  %s406_s5 = inlined_call_operand.vmem [shape: f32[8,32], index: 5, kind: output, shape index: {1}]   ;;  %s407_s6 = inlined_call_operand.vmem [shape: f32[8,32], index: 6, kind: output, shape index: {2}]  }
   0x1   :  { %v276_v0 = vld [vmem:[%s401_s1 + $0x78] sm:$0xff]   ;;  %v278_v2 = vld [vmem:[%s401_s1 + $0x70] sm:$0xff]   ;;  %v280_v4 = vld [vmem:[%s401_s1 + $0x68] sm:$0xff]  }
   0x2   :  { %v277_v1 = vld [vmem:[%s401_s1 + $0x38] sm:$0xff]   ;;  %253 = vmatprep.subr.bf16.mxu0 %v276_v0  ;;  %v279_v3 = vld [vmem:[%s401_s1 + $0x30] sm:$0xff]   ;;  %v281_v5 = vld [vmem:[%s401_s1 + $0x28] sm:$0xff]  }
   0x3   :  { %254 = vmatpush3.bf16.msra.mxu0 %v277_v1  ;;  %v282_v6 = vld [vmem:[%s401_s1 + $0x60] sm:$0xff]   ;;  %v284_v8 = vld [vmem:[%s401_s1 + $0x58] sm:$0xff]   ;;  %v286_v10 = vld [vmem:[%s401_s1 + $0x50] sm:$0xff]  }
   0x4   :  { %255 = vmatprep.subr.bf16.mxu0 %v278_v2  ;;  %v283_v7 = vld [vmem:[%s401_s1 + $0x20] sm:$0xff]   ;;  %v285_v9 = vld [vmem:[%s401_s1 + $0x18] sm:$0xff]   ;;  %v287_v13 = vld [vmem:[%s401_s1 + $0x10] sm:$0xff]  }
   0x5   :  { %v21_v11 = vld [vmem:[%s402_s0] sm:$0xff]  ;;  %v288_v14 = vld [vmem:[%s401_s1 + $0x48] sm:$0xff]  }
   0x6   :  { %v236_v12 = vcombine.high %v21_v11, %v21_v11  ;;  %v289_v15 = vld [vmem:[%s401_s1 + $0x8] sm:$0xff]   ;;  %v290_v16 = vld [vmem:[%s401_s1 + $0x40] sm:$0xff]   ;;  %v235_v18 = vcombine.low %v21_v11, %v21_v11 }
   0x7   :  { %256 = vmatpush3.bf16.msra.mxu0 %v279_v3  ;;  %v291_v17 = vld [vmem:[%s401_s1] sm:$0xff]   ;;  %s296_s1 = smov 96  }
   0x8   :  { %257 = vmatprep.subr.bf16.mxu0 %v280_v4  ;;  %196 = vmatprep.mubr.bf16.mxu0 %v236_v12  ;;  %v234_v20 = vld [vmem:[%s403_s2] ss:$0 sm:$0xff] }
   0x9   :  { %v211_v29 = vld [vmem:[%s405_s3] sm:$0xff] }
   0xb   :  { %258 = vmatpush3.bf16.msra.mxu0 %v281_v5 }
   0xc   :  { %259 = vmatprep.subr.bf16.mxu0 %v282_v6 }
   0xf   :  { %260 = vmatpush3.bf16.msra.mxu0 %v283_v7 }
  0x10   :  { %261 = vmatprep.subr.bf16.mxu0 %v284_v8 }
  0x13   :  { %262 = vmatpush3.bf16.msra.mxu0 %v285_v9 }
  0x14   :  { %263 = vmatprep.subr.bf16.mxu0 %v286_v10 }
  0x17   :  { %264 = vmatpush3.bf16.msra.mxu0 %v287_v13 }
  0x18   :  { %265 = vmatprep.subr.bf16.mxu0 %v288_v14 }
  0x1b   :  { %266 = vmatpush3.bf16.msra.mxu0 %v289_v15 }
  0x1c   :  { %267 = vmatprep.subr.bf16.mxu0 %v290_v16 }
  0x1f   :  { %268 = vmatpush3.bf16.msra.mxu0 %v291_v17 }
  0x22   :  { %197 = vmatmul.mubr.bf16.vlgmr.msra.gmra.mxu0 %v235_v18 }
  0xe2   :  { %v269_v19 = vpop.f32.mrf.mxu0 }
  0xe4   :  { %v270_v21 = vpop.f32.mrf.mxu0 }
  0xe5   :  { %v271_v22 = vadd.f32 %v270_v21, %v269_v19 }
  0xe6   :  { %v272_v23 = vpop.f32.mrf.mxu0 }
  0xe7   :  { %v199_v24 = vadd.f32 %v271_v22, %v234_v20 }
  0xe8   :  { %v273_v25 = vpop.f32.mrf.mxu0 }
  0xe9   :  { %v212_v26 = vmul.f32 0.5, %v199_v24  ;;  %205 = vst.msk [vmem:[%s404_s4] sm:$0xff] %vm204_vm0, %v199_v24 }
  0xeb   :  { %v213_v27 = vmul.f32 1.442695, %v212_v26 }
  0xed   :  { %294 = vpow2.f32 %v213_v27 }
  0xfa   :  { %v295_v28 = vpop.eup %294 }
  0xfb   :  { %216 = vrot.lane.b32.xlu0 %v295_v28, %s296_s1 }
  0xff   :  { %207 = vrot.lane.b32.xlu0 %v199_v24, %s296_s1 }
 0x16d   :  { %v217_v30 = vpop.permute.xlu0 %216 }
 0x16e   :  { %v219_v31 = vmul.f32 %v217_v30, %v211_v29 }
 0x170   :  { %v220_v32 = vadd.f32 %v219_v31, %v199_v24 }
 0x171   :  { %v208_v33 = vpop.permute.xlu0 %207 }
 0x172   :  { %221 = vst.msk [vmem:[%s407_s6] sm:$0xff] %vm204_vm0, %v220_v32  ;;  %210 = vst.msk [vmem:[%s406_s5] sm:$0xff] %vm204_vm0, %v208_v33 }

// kernel: vae_forward.12
= control target key start
LH: loop header
LB: loop body
LE: loop exit
PB: predicated region body
PF: predicated region fallthrough
CT: control target
= control target key end

     0   :  { %v656_v35 = vmov 0.0   ;;  %vm657_vm0 = vmmov 0   ;;  %s813_s1 = inlined_call_operand.vmem [shape: bf16[640,128], index: 1, kind: input, shape index: {}]   ;;  %s814_s0 = inlined_call_operand.vmem [shape: bf16[8,640], index: 0, kind: input, shape index: {}]   ;;  %s815_s2 = inlined_call_operand.vmem [shape: f32[1,128], index: 2, kind: input, shape index: {}]   ;;  %s816_s3 = inlined_call_operand.vmem [shape: bf16[8,128], index: 3, kind: output, shape index: {}]  }
   0x1   :  { %v611_v0 = vld [vmem:[%s813_s1 + $0x78] sm:$0xff]   ;;  %v615_v4 = vld [vmem:[%s813_s1 + $0x70] sm:$0xff]   ;;  %v619_v8 = vld [vmem:[%s813_s1 + $0x68] sm:$0xff]  }
   0x2   :  { %v612_v1 = vld [vmem:[%s813_s1 + $0x38] sm:$0xff]   ;;  %536 = vmatprep.subr.bf16.mxu0 %v611_v0  ;;  %v616_v5 = vld [vmem:[%s813_s1 + $0x30] sm:$0xff]   ;;  %v620_v9 = vld [vmem:[%s813_s1 + $0x28] sm:$0xff]  }
   0x3   :  { %v613_v2 = vld [vmem:[%s813_s1 + $0xf8] sm:$0xff]   ;;  %537 = vmatpush3.bf16.msra.mxu0 %v612_v1  ;;  %v617_v6 = vld [vmem:[%s813_s1 + $0xf0] sm:$0xff]   ;;  %v621_v10 = vld [vmem:[%s813_s1 + $0xe8] sm:$0xff]  }
   0x4   :  { %v614_v3 = vld [vmem:[%s813_s1 + $0xb8] sm:$0xff]   ;;  %558 = vmatprep.subr.bf16.mxu1 %v613_v2  ;;  %538 = vmatprep.subr.bf16.mxu0 %v615_v4  ;;  %v618_v7 = vld [vmem:[%s813_s1 + $0xb0] sm:$0xff]   ;;  %v622_v11 = vld [vmem:[%s813_s1 + $0xa8] sm:$0xff]  }
   0x5   :  { %559 = vmatpush3.bf16.msra.mxu1 %v614_v3  ;;  %v623_v12 = vld [vmem:[%s813_s1 + $0x60] sm:$0xff]   ;;  %v627_v16 = vld [vmem:[%s813_s1 + $0x58] sm:$0xff]   ;;  %v631_v20 = vld [vmem:[%s813_s1 + $0x50] sm:$0xff]  }
   0x6   :  { %560 = vmatprep.subr.bf16.mxu1 %v617_v6  ;;  %v624_v13 = vld [vmem:[%s813_s1 + $0x20] sm:$0xff]   ;;  %v628_v17 = vld [vmem:[%s813_s1 + $0x18] sm:$0xff]   ;;  %v632_v21 = vld [vmem:[%s813_s1 + $0x10] sm:$0xff]  }
   0x7   :  { %539 = vmatpush3.bf16.msra.mxu0 %v616_v5  ;;  %v625_v14 = vld [vmem:[%s813_s1 + $0xe0] sm:$0xff]   ;;  %v629_v18 = vld [vmem:[%s813_s1 + $0xd8] sm:$0xff]   ;;  %v633_v22 = vld [vmem:[%s813_s1 + $0xd0] sm:$0xff]  }
   0x8   :  { %540 = vmatprep.subr.bf16.mxu0 %v619_v8  ;;  %v626_v15 = vld [vmem:[%s813_s1 + $0xa0] sm:$0xff]   ;;  %v630_v19 = vld [vmem:[%s813_s1 + $0x98] sm:$0xff]   ;;  %v634_v23 = vld [vmem:[%s813_s1 + $0x90] sm:$0xff]  }
   0x9   :  { %561 = vmatpush3.bf16.msra.mxu1 %v618_v7  ;;  %v635_v24 = vld [vmem:[%s813_s1 + $0x48] sm:$0xff]   ;;  %v639_v28 = vld [vmem:[%s813_s1 + $0x40] sm:$0xff]   ;;  %v648_v39 = vld [vmem:[%s813_s1 + $0x138] sm:$0xff]  }
   0xa   :  { %562 = vmatprep.subr.bf16.mxu1 %v621_v10  ;;  %v636_v25 = vld [vmem:[%s813_s1 + $0x8] sm:$0xff]   ;;  %v640_v29 = vld [vmem:[%s813_s1] sm:$0xff]   ;;  %v649_v40 = vld [vmem:[%s813_s1 + $0x130] sm:$0xff]  }
   0xb   :  { %541 = vmatpush3.bf16.msra.mxu0 %v620_v9  ;;  %v637_v26 = vld [vmem:[%s813_s1 + $0xc8] sm:$0xff]   ;;  %v641_v30 = vld [vmem:[%s813_s1 + $0xc0] sm:$0xff]   ;;  %v652_v43 = vld [vmem:[%s813_s1 + $0x118] sm:$0xff]  }
   0xc   :  { %542 = vmatprep.subr.bf16.mxu0 %v623_v12  ;;  %v638_v27 = vld [vmem:[%s813_s1 + $0x88] sm:$0xff]   ;;  %v15_v31 = vld [vmem:[%s814_s0] sm:$0xff]  ;;  %v653_v44 = vld [vmem:[%s813_s1 + $0x110] sm:$0xff]  }
   0xd   :  { %563 = vmatpush3.bf16.msra.mxu1 %v622_v11  ;;  %v491_v32 = vcombine.low %v15_v31, %v15_v31  ;;  %v492_v33 = vcombine.high %v15_v31, %v15_v31  ;;  %v645_v34 = vld [vmem:[%s813_s1 + $0x80] sm:$0xff]   ;;  %v16_v36 = vld [vmem:[%s814_s0 + $0x8] sm:$0xff]  ;;  %v644_v47 = vld [vmem:[%s814_s0 + $0x10] ss:$0 sps:$4 sm:$0xff]  }
   0xe   :  { %564 = vmatprep.subr.bf16.mxu1 %v625_v14  ;;  %v493_v37 = vcombine.low %v16_v36, %v16_v36  ;;  %v494_v38 = vcombine.high %v16_v36, %v16_v36  ;;  %v650_v41 = vld [vmem:[%s813_s1 + $0x128] sm:$0xff]   ;;  %v651_v42 = vld [vmem:[%s813_s1 + $0x120] sm:$0xff]  }
   0xf   :  { %543 = vmatpush3.bf16.msra.mxu0 %v624_v13  ;;  %395 = vmatprep.mubr.bf16.mxu0 %v492_v33  ;;  %v654_v45 = vld [vmem:[%s813_s1 + $0x108] sm:$0xff]   ;;  %v655_v46 = vld [vmem:[%s813_s1 + $0x100] sm:$0xff]  }
  0x10   :  { %544 = vmatprep.subr.bf16.mxu0 %v627_v16  ;;  %435 = vmatprep.mubr.bf16.mxu1 %v494_v38  ;;  %v490_v57 = vld [vmem:[%s815_s2] ss:$0 sm:$0xff] }
  0x11   :  { %565 = vmatpush3.bf16.msra.mxu1 %v626_v15 }
  0x12   :  { %566 = vmatprep.subr.bf16.mxu1 %v629_v18 }
  0x13   :  { %545 = vmatpush3.bf16.msra.mxu0 %v628_v17 }
  0x14   :  { %546 = vmatprep.subr.bf16.mxu0 %v631_v20 }
  0x15   :  { %567 = vmatpush3.bf16.msra.mxu1 %v630_v19 }
  0x16   :  { %568 = vmatprep.subr.bf16.mxu1 %v633_v22 }
  0x17   :  { %547 = vmatpush3.bf16.msra.mxu0 %v632_v21 }
  0x18   :  { %548 = vmatprep.subr.bf16.mxu0 %v635_v24 }
  0x19   :  { %569 = vmatpush3.bf16.msra.mxu1 %v634_v23 }
  0x1a   :  { %570 = vmatprep.subr.bf16.mxu1 %v637_v26 }
  0x1b   :  { %549 = vmatpush3.bf16.msra.mxu0 %v636_v25 }
  0x1c   :  { %550 = vmatprep.subr.bf16.mxu0 %v639_v28 }
  0x1d   :  { %571 = vmatpush3.bf16.msra.mxu1 %v638_v27 }
  0x1e   :  { %572 = vmatprep.subr.bf16.mxu1 %v641_v30 }
  0x1f   :  { %551 = vmatpush3.bf16.msra.mxu0 %v640_v29 }
  0x20   :  { %589 = vmatprep.subr.bf16.mxu0 %v656_v35 }
  0x21   :  { %573 = vmatpush3.bf16.msra.mxu1 %v645_v34 }
  0x22   :  { %396 = vmatmul.mubr.bf16.vlgmr.msra.gmra.mxu0 %v491_v32 }
  0x23   :  { %590 = vmatpush3.bf16.msra.mxu0 %v648_v39  ;;  %605 = vmatprep.mubr.msk.bf16.mxu0 %vm657_vm0, %v656_v35 }
  0x24   :  { %436 = vmatmul.mubr.bf16.vlgmr.msra.gmra.mxu1 %v493_v37  ;;  %591 = vmatprep.subr.bf16.mxu0 %v656_v35 }
  0x27   :  { %592 = vmatpush3.bf16.msra.mxu0 %v649_v40 }
  0x28   :  { %593 = vmatprep.subr.bf16.mxu0 %v656_v35 }
  0x2b   :  { %594 = vmatpush3.bf16.msra.mxu0 %v650_v41 }
  0x2c   :  { %595 = vmatprep.subr.bf16.mxu0 %v656_v35 }
  0x2f   :  { %596 = vmatpush3.bf16.msra.mxu0 %v651_v42 }
  0x30   :  { %597 = vmatprep.subr.bf16.mxu0 %v656_v35 }
  0x33   :  { %598 = vmatpush3.bf16.msra.mxu0 %v652_v43 }
  0x34   :  { %599 = vmatprep.subr.bf16.mxu0 %v656_v35 }
  0x37   :  { %600 = vmatpush3.bf16.msra.mxu0 %v653_v44 }
  0x38   :  { %601 = vmatprep.subr.bf16.mxu0 %v656_v35 }
  0x3b   :  { %602 = vmatpush3.bf16.msra.mxu0 %v654_v45 }
  0x3c   :  { %603 = vmatprep.subr.bf16.mxu0 %v656_v35 }
  0x3f   :  { %604 = vmatpush3.bf16.msra.mxu0 %v655_v46 }
  0x42   :  { %606 = vmatmul.mubr.bf16.vlgmr.msra.gmra.mxu0 %v644_v47 }
  0xe2   :  { %v552_v48 = vpop.f32.mrf.mxu0 }
  0xe4   :  { %v553_v49 = vpop.f32.mrf.mxu0  ;;  %v574_v50 = vpop.f32.mrf.mxu1 }
  0xe5   :  { %v554_v56 = vadd.f32 %v553_v49, %v552_v48 }
  0xe6   :  { %v555_v51 = vpop.f32.mrf.mxu0  ;;  %v575_v52 = vpop.f32.mrf.mxu1 }
  0xe7   :  { %v398_v58 = vadd.f32 %v554_v56, %v490_v57  ;;  %v576_v59 = vadd.f32 %v575_v52, %v574_v50 }
  0xe8   :  { %v556_v53 = vpop.f32.mrf.mxu0  ;;  %v577_v54 = vpop.f32.mrf.mxu1 }
  0xe9   :  { %v438_v60 = vadd.f32 %v576_v59, %v398_v58 }
  0xea   :  { %v578_v55 = vpop.f32.mrf.mxu1 }
 0x102   :  { %v477_v61 = vpop.f32.mrf.mxu0 }
 0x103   :  { %v478_v62 = vadd.f32 %v477_v61, %v438_v60 }
 0x104   :  { %v607_v63 = vpop.f32.mrf.mxu0 }
 0x105   :  { %v483_v0 = vmax.f32 %v478_v62, 0.0 }
 0x106   :  { %v480_v1 = vpop.f32.mrf.mxu0 }
 0x107   :  { %v484_v2 = vpack.c.bf16 %v483_v0, %v483_v0 }
 0x108   :  { %v608_v3 = vpop.f32.mrf.mxu0 }
 0x109   :  { %485 = vst [vmem:[%s816_s3] sm:$0xf] %v484_v2 }

// kernel: vae_forward.15
= control target key start
LH: loop header
LB: loop body
LE: loop exit
PB: predicated region body
PF: predicated region fallthrough
CT: control target
= control target key end

     0   :  { %v221_v1 = vmov 0   ;;  %v34_v18 = vlaneseq  ;;  %s299_s1 = inlined_call_operand.vmem [shape: bf16[128,256], index: 1, kind: input, shape index: {}]   ;;  %s300_s0 = inlined_call_operand.vmem [shape: bf16[8,128], index: 0, kind: input, shape index: {}]   ;;  %s301_s2 = inlined_call_operand.vmem [shape: f32[1,256], index: 2, kind: input, shape index: {}]   ;;  %s302_s3 = inlined_call_operand.vmem [shape: bf16[8,256], index: 3, kind: output, shape index: {}]  }
   0x1   :  { %v197_v0 = vld [vmem:[%s299_s1 + $0x74] ss:$8 sps:$4 sm:$0xff]   ;;  %156 = vmatprep.mubr.bf16.mxu0 %v221_v1  ;;  %v199_v2 = vld [vmem:[%s299_s1 + $0x70] ss:$8 sps:$4 sm:$0xff]   ;;  %v200_v3 = vld [vmem:[%s299_s1 + $0x64] ss:$8 sps:$4 sm:$0xff]  }
   0x2   :  { %124 = vmatprep.subr.bf16.mxu0 %v197_v0  ;;  %v202_v4 = vld [vmem:[%s299_s1 + $0x60] ss:$8 sps:$4 sm:$0xff]   ;;  %v203_v5 = vld [vmem:[%s299_s1 + $0x54] ss:$8 sps:$4 sm:$0xff]   ;;  %v205_v6 = vld [vmem:[%s299_s1 + $0x50] ss:$8 sps:$4 sm:$0xff]  }
   0x3   :  { %125 = vmatpush1.bf16.msra.mxu0 %v199_v2  ;;  %v206_v7 = vld [vmem:[%s299_s1 + $0x44] ss:$8 sps:$4 sm:$0xff]   ;;  %v208_v8 = vld [vmem:[%s299_s1 + $0x40] ss:$8 sps:$4 sm:$0xff]   ;;  %v209_v9 = vld [vmem:[%s299_s1 + $0x34] ss:$8 sps:$4 sm:$0xff]  }
   0x4   :  { %126 = vmatprep.subr.bf16.mxu0 %v200_v3  ;;  %v211_v10 = vld [vmem:[%s299_s1 + $0x30] ss:$8 sps:$4 sm:$0xff]   ;;  %v212_v11 = vld [vmem:[%s299_s1 + $0x24] ss:$8 sps:$4 sm:$0xff]   ;;  %v214_v12 = vld [vmem:[%s299_s1 + $0x20] ss:$8 sps:$4 sm:$0xff]  }
   0x5   :  { %v215_v13 = vld [vmem:[%s299_s1 + $0x14] ss:$8 sps:$4 sm:$0xff]   ;;  %v217_v14 = vld [vmem:[%s299_s1 + $0x10] ss:$8 sps:$4 sm:$0xff]   ;;  %v218_v15 = vld [vmem:[%s299_s1 + $0x4] ss:$8 sps:$4 sm:$0xff]  }
   0x6   :  { %v220_v16 = vld [vmem:[%s299_s1] ss:$8 sps:$4 sm:$0xff]   ;;  %v35_v19 = vshrl.u32 %v34_v18, 7 }
   0x7   :  { %127 = vmatpush1.bf16.msra.mxu0 %v202_v4  ;;  %v15_v17 = vld [vmem:[%s300_s0] sm:$0xf] }
   0x8   :  { %128 = vmatprep.subr.bf16.mxu0 %v203_v5  ;;  %v36_v20 = vsub.s32 0, %v35_v19  ;;  %v40_v21 = vsub.s32 1, %v35_v19  ;;  %v32_v22 = vld [vmem:[%s301_s2] sm:$0x3] }
   0xa   :  { %v37_v23 = vrot.slane %v32_v22, %v36_v20  ;;  %v41_v24 = vrot.slane %v32_v22, %v40_v21 }
   0xb   :  { %129 = vmatpush1.bf16.msra.mxu0 %v205_v6 }
   0xc   :  { %130 = vmatprep.subr.bf16.mxu0 %v206_v7 }
   0xf   :  { %131 = vmatpush1.bf16.msra.mxu0 %v208_v8 }
  0x10   :  { %132 = vmatprep.subr.bf16.mxu0 %v209_v9 }
  0x13   :  { %133 = vmatpush1.bf16.msra.mxu0 %v211_v10 }
  0x14   :  { %134 = vmatprep.subr.bf16.mxu0 %v212_v11 }
  0x17   :  { %135 = vmatpush1.bf16.msra.mxu0 %v214_v12 }
  0x18   :  { %136 = vmatprep.subr.bf16.mxu0 %v215_v13 }
  0x1b   :  { %137 = vmatpush1.bf16.msra.mxu0 %v217_v14 }
  0x1c   :  { %138 = vmatprep.subr.bf16.mxu0 %v218_v15 }
  0x1f   :  { %139 = vmatpush1.bf16.msra.mxu0 %v220_v16 }
  0x22   :  { %157 = vmatmul.mubr.bf16.vlgmr.msra.gmra.mxu0 %v15_v17 }
  0xe2   :  { %v158_v25 = vpop.f32.mrf.mxu0 }
  0xe3   :  { %v159_v27 = vadd.f32 %v158_v25, %v37_v23 }
  0xe4   :  { %v160_v26 = vpop.f32.mrf.mxu0 }
  0xe5   :  { %v161_v28 = vadd.f32 %v160_v26, %v41_v24 }
  0xe6   :  { %v162_v29 = vpop.f32.mrf.mxu0 }
  0xe7   :  { %v195_v30 = vpack.c.bf16 %v161_v28, %v159_v27 }
  0xe8   :  { %v163_v31 = vpop.f32.mrf.mxu0 }
  0xe9   :  { %173 = vst [vmem:[%s302_s3] sm:$0xff] %v195_v30 }

// kernel: vae_forward.13
= control target key start
LH: loop header
LB: loop body
LE: loop exit
PB: predicated region body
PF: predicated region fallthrough
CT: control target
= control target key end

     0   :  { %s2015_s1 = inlined_call_operand.vmem [shape: bf16[1152,256], index: 1, kind: input, shape index: {}]   ;;  %s2016_s0 = inlined_call_operand.vmem [shape: bf16[8,1152], index: 0, kind: input, shape index: {}]   ;;  %s2017_s2 = inlined_call_operand.vmem [shape: f32[1,256], index: 2, kind: input, shape index: {}]   ;;  %s2018_s3 = inlined_call_operand.vmem [shape: bf16[8,256], index: 3, kind: output, shape index: {}]  }
   0x1   :  { %v1304_v0 = vld [vmem:[%s2015_s1 + $0x74] ss:$8 sps:$4 sm:$0xff]   ;;  %v1306_v1 = vld [vmem:[%s2015_s1 + $0x70] ss:$8 sps:$4 sm:$0xff]   ;;  %v1310_v4 = vld [vmem:[%s2015_s1 + $0x64] ss:$8 sps:$4 sm:$0xff]  }
   0x2   :  { %928 = vmatprep.subr.bf16.mxu0 %v1304_v0  ;;  %v1307_v2 = vld [vmem:[%s2015_s1 + $0x174] ss:$8 sps:$4 sm:$0xff]   ;;  %v1309_v3 = vld [vmem:[%s2015_s1 + $0x170] ss:$8 sps:$4 sm:$0xff]   ;;  %v1312_v5 = vld [vmem:[%s2015_s1 + $0x60] ss:$8 sps:$4 sm:$0xff]  }
   0x3   :  { %929 = vmatpush1.bf16.msra.mxu0 %v1306_v1  ;;  %969 = vmatprep.subr.bf16.mxu1 %v1307_v2  ;;  %v1313_v6 = vld [vmem:[%s2015_s1 + $0x164] ss:$8 sps:$4 sm:$0xff]   ;;  %v1315_v7 = vld [vmem:[%s2015_s1 + $0x160] ss:$8 sps:$4 sm:$0xff]   ;;  %v1316_v8 = vld [vmem:[%s2015_s1 + $0x54] ss:$8 sps:$4 sm:$0xff]  }
   0x4   :  { %970 = vmatpush1.bf16.msra.mxu1 %v1309_v3  ;;  %930 = vmatprep.subr.bf16.mxu0 %v1310_v4  ;;  %v1318_v9 = vld [vmem:[%s2015_s1 + $0x50] ss:$8 sps:$4 sm:$0xff]   ;;  %v1319_v10 = vld [vmem:[%s2015_s1 + $0x154] ss:$8 sps:$4 sm:$0xff]   ;;  %v1322_v11 = vld [vmem:[%s2015_s1 + $0x44] ss:$8 sps:$4 sm:$0xff]  }
   0x5   :  { %971 = vmatprep.subr.bf16.mxu1 %v1313_v6  ;;  %v1321_v12 = vld [vmem:[%s2015_s1 + $0x150] ss:$8 sps:$4 sm:$0xff]   ;;  %v1325_v13 = vld [vmem:[%s2015_s1 + $0x144] ss:$8 sps:$4 sm:$0xff]   ;;  %v1324_v14 = vld [vmem:[%s2015_s1 + $0x40] ss:$8 sps:$4 sm:$0xff]  }
   0x6   :  { %v1328_v15 = vld [vmem:[%s2015_s1 + $0x34] ss:$8 sps:$4 sm:$0xff]   ;;  %v1327_v16 = vld [vmem:[%s2015_s1 + $0x140] ss:$8 sps:$4 sm:$0xff]   ;;  %v1330_v18 = vld [vmem:[%s2015_s1 + $0x30] ss:$8 sps:$4 sm:$0xff]  }
   0x7   :  { %931 = vmatpush1.bf16.msra.mxu0 %v1312_v5  ;;  %v1331_v17 = vld [vmem:[%s2015_s1 + $0x134] ss:$8 sps:$4 sm:$0xff]   ;;  %v1334_v19 = vld [vmem:[%s2015_s1 + $0x24] ss:$8 sps:$4 sm:$0xff]   ;;  %v1333_v20 = vld [vmem:[%s2015_s1 + $0x130] ss:$8 sps:$4 sm:$0xff]  }
   0x8   :  { %932 = vmatprep.subr.bf16.mxu0 %v1316_v8  ;;  %972 = vmatpush1.bf16.msra.mxu1 %v1315_v7  ;;  %v1337_v21 = vld [vmem:[%s2015_s1 + $0x124] ss:$8 sps:$4 sm:$0xff]   ;;  %v1336_v22 = vld [vmem:[%s2015_s1 + $0x20] ss:$8 sps:$4 sm:$0xff]   ;;  %v1340_v23 = vld [vmem:[%s2015_s1 + $0x14] ss:$8 sps:$4 sm:$0xff]  }
   0x9   :  { %973 = vmatprep.subr.bf16.mxu1 %v1319_v10  ;;  %v1339_v24 = vld [vmem:[%s2015_s1 + $0x120] ss:$8 sps:$4 sm:$0xff]   ;;  %v1343_v25 = vld [vmem:[%s2015_s1 + $0x114] ss:$8 sps:$4 sm:$0xff]   ;;  %v1342_v26 = vld [vmem:[%s2015_s1 + $0x10] ss:$8 sps:$4 sm:$0xff]  }
   0xa   :  { %v1346_v27 = vld [vmem:[%s2015_s1 + $0x4] ss:$8 sps:$4 sm:$0xff]   ;;  %v1345_v28 = vld [vmem:[%s2015_s1 + $0x110] ss:$8 sps:$4 sm:$0xff]   ;;  %v1348_v30 = vld [vmem:[%s2015_s1] ss:$8 sps:$4 sm:$0xff]  }
   0xb   :  { %933 = vmatpush1.bf16.msra.mxu0 %v1318_v9  ;;  %v1349_v29 = vld [vmem:[%s2015_s1 + $0x104] ss:$8 sps:$4 sm:$0xff]   ;;  %v1352_v31 = vld [vmem:[%s2015_s1 + $0xf4] ss:$8 sps:$4 sm:$0xff]   ;;  %v1351_v32 = vld [vmem:[%s2015_s1 + $0x100] ss:$8 sps:$4 sm:$0xff]  }
   0xc   :  { %934 = vmatprep.subr.bf16.mxu0 %v1322_v11  ;;  %974 = vmatpush1.bf16.msra.mxu1 %v1321_v12  ;;  %v1355_v33 = vld [vmem:[%s2015_s1 + $0x1f4] ss:$8 sps:$4 sm:$0xff]   ;;  %v1354_v34 = vld [vmem:[%s2015_s1 + $0xf0] ss:$8 sps:$4 sm:$0xff]   ;;  %v1358_v35 = vld [vmem:[%s2015_s1 + $0xe4] ss:$8 sps:$4 sm:$0xff]  }
   0xd   :  { %975 = vmatprep.subr.bf16.mxu1 %v1325_v13  ;;  %v1357_v36 = vld [vmem:[%s2015_s1 + $0x1f0] ss:$8 sps:$4 sm:$0xff]   ;;  %v1361_v37 = vld [vmem:[%s2015_s1 + $0x1e4] ss:$8 sps:$4 sm:$0xff]   ;;  %v1360_v38 = vld [vmem:[%s2015_s1 + $0xe0] ss:$8 sps:$4 sm:$0xff]  }
   0xe   :  { %v1364_v39 = vld [vmem:[%s2015_s1 + $0xd4] ss:$8 sps:$4 sm:$0xff]   ;;  %v1363_v40 = vld [vmem:[%s2015_s1 + $0x1e0] ss:$8 sps:$4 sm:$0xff]   ;;  %v1366_v42 = vld [vmem:[%s2015_s1 + $0xd0] ss:$8 sps:$4 sm:$0xff]  }
   0xf   :  { %935 = vmatpush1.bf16.msra.mxu0 %v1324_v14  ;;  %v1367_v41 = vld [vmem:[%s2015_s1 + $0x1d4] ss:$8 sps:$4 sm:$0xff]   ;;  %v1370_v43 = vld [vmem:[%s2015_s1 + $0xc4] ss:$8 sps:$4 sm:$0xff]   ;;  %v1369_v44 = vld [vmem:[%s2015_s1 + $0x1d0] ss:$8 sps:$4 sm:$0xff]  }
  0x10   :  { %936 = vmatprep.subr.bf16.mxu0 %v1328_v15  ;;  %976 = vmatpush1.bf16.msra.mxu1 %v1327_v16  ;;  %v1373_v45 = vld [vmem:[%s2015_s1 + $0x1c4] ss:$8 sps:$4 sm:$0xff]   ;;  %v1372_v47 = vld [vmem:[%s2015_s1 + $0xc0] ss:$8 sps:$4 sm:$0xff]   ;;  %v1376_v49 = vld [vmem:[%s2015_s1 + $0xb4] ss:$8 sps:$4 sm:$0xff]  }
  0x11   :  { %977 = vmatprep.subr.bf16.mxu1 %v1331_v17  ;;  %v15_v46 = vld [vmem:[%s2016_s0] sm:$0xff]  ;;  %v16_v50 = vld [vmem:[%s2016_s0 + $0x8] sm:$0xff]  ;;  %v1379_v53 = vld [vmem:[%s2015_s1 + $0x1b4] ss:$8 sps:$4 sm:$0xff]  }
  0x12   :  { %v1149_v48 = vcombine.high %v15_v46, %v15_v46  ;;  %v1375_v51 = vld [vmem:[%s2015_s1 + $0x1c0] ss:$8 sps:$4 sm:$0xff]   ;;  %v1151_v52 = vcombine.high %v16_v50, %v16_v50  ;;  %v1378_v54 = vld [vmem:[%s2015_s1 + $0xb0] ss:$8 sps:$4 sm:$0xff]   ;;  %v1382_v55 = vld [vmem:[%s2015_s1 + $0xa4] ss:$8 sps:$4 sm:$0xff]   ;;  %v1148_v5 = vcombine.low %v15_v46, %v15_v46  ;;  %v1150_v8 = vcombine.low %v16_v50, %v16_v50 }
  0x13   :  { %937 = vmatpush1.bf16.msra.mxu0 %v1330_v18  ;;  %v1381_v56 = vld [vmem:[%s2015_s1 + $0x1b0] ss:$8 sps:$4 sm:$0xff]   ;;  %v1385_v57 = vld [vmem:[%s2015_s1 + $0x1a4] ss:$8 sps:$4 sm:$0xff]   ;;  %v1384_v58 = vld [vmem:[%s2015_s1 + $0xa0] ss:$8 sps:$4 sm:$0xff]  }
  0x14   :  { %938 = vmatprep.subr.bf16.mxu0 %v1334_v19  ;;  %978 = vmatpush1.bf16.msra.mxu1 %v1333_v20  ;;  %v1388_v59 = vld [vmem:[%s2015_s1 + $0x94] ss:$8 sps:$4 sm:$0xff]   ;;  %v1387_v60 = vld [vmem:[%s2015_s1 + $0x1a0] ss:$8 sps:$4 sm:$0xff]   ;;  %v1390_v62 = vld [vmem:[%s2015_s1 + $0x90] ss:$8 sps:$4 sm:$0xff]  }
  0x15   :  { %979 = vmatprep.subr.bf16.mxu1 %v1337_v21  ;;  %960 = vmatprep.mubr.bf16.mxu0 %v1149_v48  ;;  %v1391_v61 = vld [vmem:[%s2015_s1 + $0x194] ss:$8 sps:$4 sm:$0xff]   ;;  %v1394_v63 = vld [vmem:[%s2015_s1 + $0x84] ss:$8 sps:$4 sm:$0xff]   ;;  %v1393_v0 = vld [vmem:[%s2015_s1 + $0x190] ss:$8 sps:$4 sm:$0xff]  }
  0x16   :  { %1001 = vmatprep.mubr.bf16.mxu1 %v1151_v52  ;;  %v1397_v1 = vld [vmem:[%s2015_s1 + $0x184] ss:$8 sps:$4 sm:$0xff]   ;;  %v1396_v2 = vld [vmem:[%s2015_s1 + $0x80] ss:$8 sps:$4 sm:$0xff]   ;;  %v1404_v3 = vld [vmem:[%s2015_s1 + $0x274] ss:$8 sps:$4 sm:$0xff]  }
  0x17   :  { %939 = vmatpush1.bf16.msra.mxu0 %v1336_v22  ;;  %v1401_v4 = vld [vmem:[%s2015_s1 + $0x180] ss:$8 sps:$4 sm:$0xff]   ;;  %v1409_v6 = vld [vmem:[%s2015_s1 + $0x374] ss:$8 sps:$4 sm:$0xff]   ;;  %v1402_v7 = vld [vmem:[%s2015_s1 + $0x270] ss:$8 sps:$4 sm:$0xff]  }
  0x18   :  { %940 = vmatprep.subr.bf16.mxu0 %v1340_v23  ;;  %980 = vmatpush1.bf16.msra.mxu1 %v1339_v24  ;;  %v1412_v9 = vld [vmem:[%s2015_s1 + $0x264] ss:$8 sps:$4 sm:$0xff]   ;;  %v1407_v10 = vld [vmem:[%s2015_s1 + $0x370] ss:$8 sps:$4 sm:$0xff]   ;;  %v1410_v12 = vld [vmem:[%s2015_s1 + $0x260] ss:$8 sps:$4 sm:$0xff]  }
  0x19   :  { %981 = vmatprep.subr.bf16.mxu1 %v1343_v25  ;;  %v1415_v11 = vld [vmem:[%s2015_s1 + $0x364] ss:$8 sps:$4 sm:$0xff]   ;;  %v1418_v13 = vld [vmem:[%s2015_s1 + $0x254] ss:$8 sps:$4 sm:$0xff]   ;;  %v1413_v14 = vld [vmem:[%s2015_s1 + $0x360] ss:$8 sps:$4 sm:$0xff]  }
  0x1a   :  { %v1421_v15 = vld [vmem:[%s2015_s1 + $0x354] ss:$8 sps:$4 sm:$0xff]   ;;  %v1416_v16 = vld [vmem:[%s2015_s1 + $0x250] ss:$8 sps:$4 sm:$0xff]   ;;  %v1424_v17 = vld [vmem:[%s2015_s1 + $0x244] ss:$8 sps:$4 sm:$0xff]  }
  0x1b   :  { %941 = vmatpush1.bf16.msra.mxu0 %v1342_v26  ;;  %v1419_v18 = vld [vmem:[%s2015_s1 + $0x350] ss:$8 sps:$4 sm:$0xff]   ;;  %v1427_v19 = vld [vmem:[%s2015_s1 + $0x344] ss:$8 sps:$4 sm:$0xff]   ;;  %v1422_v20 = vld [vmem:[%s2015_s1 + $0x240] ss:$8 sps:$4 sm:$0xff]  }
  0x1c   :  { %942 = vmatprep.subr.bf16.mxu0 %v1346_v27  ;;  %982 = vmatpush1.bf16.msra.mxu1 %v1345_v28  ;;  %v1430_v21 = vld [vmem:[%s2015_s1 + $0x234] ss:$8 sps:$4 sm:$0xff]   ;;  %v1425_v22 = vld [vmem:[%s2015_s1 + $0x340] ss:$8 sps:$4 sm:$0xff]   ;;  %v1428_v24 = vld [vmem:[%s2015_s1 + $0x230] ss:$8 sps:$4 sm:$0xff]  }
  0x1d   :  { %983 = vmatprep.subr.bf16.mxu1 %v1349_v29  ;;  %v1433_v23 = vld [vmem:[%s2015_s1 + $0x334] ss:$8 sps:$4 sm:$0xff]   ;;  %v1436_v25 = vld [vmem:[%s2015_s1 + $0x224] ss:$8 sps:$4 sm:$0xff]   ;;  %v1431_v26 = vld [vmem:[%s2015_s1 + $0x330] ss:$8 sps:$4 sm:$0xff]  }
  0x1e   :  { %v1439_v27 = vld [vmem:[%s2015_s1 + $0x324] ss:$8 sps:$4 sm:$0xff]   ;;  %v1434_v28 = vld [vmem:[%s2015_s1 + $0x220] ss:$8 sps:$4 sm:$0xff]   ;;  %v1442_v29 = vld [vmem:[%s2015_s1 + $0x214] ss:$8 sps:$4 sm:$0xff]  }
  0x1f   :  { %943 = vmatpush1.bf16.msra.mxu0 %v1348_v30  ;;  %v1437_v30 = vld [vmem:[%s2015_s1 + $0x320] ss:$8 sps:$4 sm:$0xff]   ;;  %v1455_v46 = vld [vmem:[%s2015_s1 + $0x3f0] ss:$8 sps:$4 sm:$0xff]  }
  0x20   :  { %944 = vmatprep.subr.bf16.mxu0 %v1352_v31  ;;  %984 = vmatpush1.bf16.msra.mxu1 %v1351_v32  ;;  %v1445_v31 = vld [vmem:[%s2015_s1 + $0x314] ss:$8 sps:$4 sm:$0xff]   ;;  %v1458_v48 = vld [vmem:[%s2015_s1 + $0x2e0] ss:$8 sps:$4 sm:$0xff]   ;;  %v1464_v52 = vld [vmem:[%s2015_s1 + $0x2d0] ss:$8 sps:$4 sm:$0xff]  }
  0x21   :  { %985 = vmatprep.subr.bf16.mxu1 %v1355_v33  ;;  %v1829_v32 = vld [vmem:[%s2016_s0 + $0x10] sm:$0xff]  ;;  %v1461_v50 = vld [vmem:[%s2015_s1 + $0x3e0] ss:$8 sps:$4 sm:$0xff]  }
  0x22   :  { %v1440_v33 = vld [vmem:[%s2015_s1 + $0x210] ss:$8 sps:$4 sm:$0xff]  }
  0x23   :  { %945 = vmatpush2.bf16.msra.mxu0 %v1354_v34  ;;  %v1153_v34 = vcombine.high %v1829_v32, %v1829_v32 }
  0x24   :  { %946 = vmatprep.subr.bf16.mxu0 %v1358_v35  ;;  %986 = vmatpush2.bf16.msra.mxu1 %v1357_v36  ;;  %v1839_v35 = vld [vmem:[%s2016_s0 + $0x18] sm:$0xff]  ;;  %v1448_v36 = vld [vmem:[%s2015_s1 + $0x204] ss:$8 sps:$4 sm:$0xff]  }
  0x25   :  { %987 = vmatprep.subr.bf16.mxu1 %v1361_v37  ;;  %v1155_v37 = vcombine.high %v1839_v35, %v1839_v35 }
  0x27   :  { %947 = vmatpush2.bf16.msra.mxu0 %v1360_v38  ;;  %v1443_v38 = vld [vmem:[%s2015_s1 + $0x310] ss:$8 sps:$4 sm:$0xff]  }
  0x28   :  { %948 = vmatprep.subr.bf16.mxu0 %v1364_v39  ;;  %988 = vmatpush2.bf16.msra.mxu1 %v1363_v40  ;;  %v1451_v39 = vld [vmem:[%s2015_s1 + $0x304] ss:$8 sps:$4 sm:$0xff]   ;;  %v1446_v40 = vld [vmem:[%s2015_s1 + $0x200] ss:$8 sps:$4 sm:$0xff]  }
  0x29   :  { %989 = vmatprep.subr.bf16.mxu1 %v1367_v41  ;;  %v1454_v41 = vld [vmem:[%s2015_s1 + $0x2f4] ss:$8 sps:$4 sm:$0xff]  }
  0x2b   :  { %949 = vmatpush2.bf16.msra.mxu0 %v1366_v42  ;;  %v1449_v42 = vld [vmem:[%s2015_s1 + $0x300] ss:$8 sps:$4 sm:$0xff]  }
  0x2c   :  { %950 = vmatprep.subr.bf16.mxu0 %v1370_v43  ;;  %990 = vmatpush2.bf16.msra.mxu1 %v1369_v44  ;;  %v1457_v43 = vld [vmem:[%s2015_s1 + $0x3f4] ss:$8 sps:$4 sm:$0xff]   ;;  %v1452_v44 = vld [vmem:[%s2015_s1 + $0x2f0] ss:$8 sps:$4 sm:$0xff]  }
  0x2d   :  { %991 = vmatprep.subr.bf16.mxu1 %v1373_v45  ;;  %v1460_v45 = vld [vmem:[%s2015_s1 + $0x2e4] ss:$8 sps:$4 sm:$0xff]  }
  0x2f   :  { %951 = vmatpush2.bf16.msra.mxu0 %v1372_v47  ;;  %v1463_v47 = vld [vmem:[%s2015_s1 + $0x3e4] ss:$8 sps:$4 sm:$0xff]  }
  0x30   :  { %952 = vmatprep.subr.bf16.mxu0 %v1376_v49  ;;  %992 = vmatpush2.bf16.msra.mxu1 %v1375_v51  ;;  %v1466_v49 = vld [vmem:[%s2015_s1 + $0x2d4] ss:$8 sps:$4 sm:$0xff]  }
  0x31   :  { %993 = vmatprep.subr.bf16.mxu1 %v1379_v53  ;;  %v1469_v51 = vld [vmem:[%s2015_s1 + $0x3d4] ss:$8 sps:$4 sm:$0xff]   ;;  %v1472_v53 = vld [vmem:[%s2015_s1 + $0x2c4] ss:$8 sps:$4 sm:$0xff]  }
  0x33   :  { %953 = vmatpush2.bf16.msra.mxu0 %v1378_v54  ;;  %v1467_v54 = vld [vmem:[%s2015_s1 + $0x3d0] ss:$8 sps:$4 sm:$0xff]  }
  0x34   :  { %954 = vmatprep.subr.bf16.mxu0 %v1382_v55  ;;  %994 = vmatpush2.bf16.msra.mxu1 %v1381_v56  ;;  %v1475_v55 = vld [vmem:[%s2015_s1 + $0x3c4] ss:$8 sps:$4 sm:$0xff]   ;;  %v1470_v56 = vld [vmem:[%s2015_s1 + $0x2c0] ss:$8 sps:$4 sm:$0xff]  }
  0x35   :  { %995 = vmatprep.subr.bf16.mxu1 %v1385_v57  ;;  %v1478_v57 = vld [vmem:[%s2015_s1 + $0x2b4] ss:$8 sps:$4 sm:$0xff]  }
  0x37   :  { %955 = vmatpush2.bf16.msra.mxu0 %v1384_v58  ;;  %v1473_v58 = vld [vmem:[%s2015_s1 + $0x3c0] ss:$8 sps:$4 sm:$0xff]  }
  0x38   :  { %956 = vmatprep.subr.bf16.mxu0 %v1388_v59  ;;  %996 = vmatpush2.bf16.msra.mxu1 %v1387_v60  ;;  %v1481_v59 = vld [vmem:[%s2015_s1 + $0x3b4] ss:$8 sps:$4 sm:$0xff]   ;;  %v1476_v60 = vld [vmem:[%s2015_s1 + $0x2b0] ss:$8 sps:$4 sm:$0xff]  }
  0x39   :  { %997 = vmatprep.subr.bf16.mxu1 %v1391_v61  ;;  %v1484_v61 = vld [vmem:[%s2015_s1 + $0x2a4] ss:$8 sps:$4 sm:$0xff]  }
  0x3b   :  { %957 = vmatpush2.bf16.msra.mxu0 %v1390_v62  ;;  %v1479_v62 = vld [vmem:[%s2015_s1 + $0x3b0] ss:$8 sps:$4 sm:$0xff]  }
  0x3c   :  { %958 = vmatprep.subr.bf16.mxu0 %v1394_v63  ;;  %998 = vmatpush2.bf16.msra.mxu1 %v1393_v0  ;;  %v1487_v63 = vld [vmem:[%s2015_s1 + $0x3a4] ss:$8 sps:$4 sm:$0xff]   ;;  %v1482_v0 = vld [vmem:[%s2015_s1 + $0x2a0] ss:$8 sps:$4 sm:$0xff]  }
  0x3d   :  { %999 = vmatprep.subr.bf16.mxu1 %v1397_v1  ;;  %v1490_v1 = vld [vmem:[%s2015_s1 + $0x294] ss:$8 sps:$4 sm:$0xff]  }
  0x3f   :  { %959 = vmatpush2.bf16.msra.mxu0 %v1396_v2  ;;  %v1485_v2 = vld [vmem:[%s2015_s1 + $0x3a0] ss:$8 sps:$4 sm:$0xff]  }
  0x40   :  { %1010 = vmatprep.subr.bf16.mxu0 %v1404_v3  ;;  %1000 = vmatpush2.bf16.msra.mxu1 %v1401_v4  ;;  %v1493_v3 = vld [vmem:[%s2015_s1 + $0x394] ss:$8 sps:$4 sm:$0xff]   ;;  %v1488_v4 = vld [vmem:[%s2015_s1 + $0x290] ss:$8 sps:$4 sm:$0xff]  }
  0x41   :  { %1051 = vmatprep.subr.bf16.mxu1 %v1409_v6  ;;  %v1491_v6 = vld [vmem:[%s2015_s1 + $0x390] ss:$8 sps:$4 sm:$0xff]  }
  0x42   :  { %961 = vmatmul.mubr.bf16.vlgmr.msra.gmra.mxu0 %v1148_v5  ;;  %v1496_v5 = vld [vmem:[%s2015_s1 + $0x284] ss:$8 sps:$4 sm:$0xff]  }
  0x43   :  { %1011 = vmatpush1.bf16.msra.mxu0 %v1402_v7  ;;  %1002 = vmatmul.mubr.bf16.vlgmr.msra.gmra.mxu1 %v1150_v8  ;;  %v1499_v7 = vld [vmem:[%s2015_s1 + $0x384] ss:$8 sps:$4 sm:$0xff]   ;;  %v1494_v8 = vld [vmem:[%s2015_s1 + $0x280] ss:$8 sps:$4 sm:$0xff]  }
  0x44   :  { %1012 = vmatprep.subr.bf16.mxu0 %v1412_v9  ;;  %1052 = vmatpush1.bf16.msra.mxu1 %v1407_v10  ;;  %v1504_v9 = vld [vmem:[%s2015_s1 + $0x474] ss:$8 sps:$4 sm:$0xff]   ;;  %v1497_v10 = vld [vmem:[%s2015_s1 + $0x380] ss:$8 sps:$4 sm:$0xff]  }
  0x45   :  { %1053 = vmatprep.subr.bf16.mxu1 %v1415_v11  ;;  %1042 = vmatprep.mubr.bf16.mxu0 %v1153_v34  ;;  %v1152_v11 = vcombine.low %v1829_v32, %v1829_v32 }
  0x46   :  { %1083 = vmatprep.mubr.bf16.mxu1 %v1155_v37 }
  0x47   :  { %1013 = vmatpush1.bf16.msra.mxu0 %v1410_v12  ;;  %v1502_v12 = vld [vmem:[%s2015_s1 + $0x470] ss:$8 sps:$4 sm:$0xff]  }
  0x48   :  { %1014 = vmatprep.subr.bf16.mxu0 %v1418_v13  ;;  %1054 = vmatpush1.bf16.msra.mxu1 %v1413_v14  ;;  %v1154_v13 = vcombine.low %v1839_v35, %v1839_v35  ;;  %v1509_v14 = vld [vmem:[%s2015_s1 + $0x464] ss:$8 sps:$4 sm:$0xff]  }
  0x49   :  { %1055 = vmatprep.subr.bf16.mxu1 %v1421_v15  ;;  %v1507_v15 = vld [vmem:[%s2015_s1 + $0x460] ss:$8 sps:$4 sm:$0xff]  }
  0x4b   :  { %1015 = vmatpush1.bf16.msra.mxu0 %v1416_v16  ;;  %v1529_v16 = vmov 0  }
  0x4c   :  { %1016 = vmatprep.subr.bf16.mxu0 %v1424_v17  ;;  %1056 = vmatpush1.bf16.msra.mxu1 %v1419_v18  ;;  %v1512_v17 = vld [vmem:[%s2015_s1 + $0x454] ss:$8 sps:$4 sm:$0xff]   ;;  %v1510_v18 = vld [vmem:[%s2015_s1 + $0x450] ss:$8 sps:$4 sm:$0xff]  }
  0x4d   :  { %1057 = vmatprep.subr.bf16.mxu1 %v1427_v19  ;;  %v1515_v19 = vld [vmem:[%s2015_s1 + $0x444] ss:$8 sps:$4 sm:$0xff]  }
  0x4f   :  { %1017 = vmatpush1.bf16.msra.mxu0 %v1422_v20  ;;  %v1513_v20 = vld [vmem:[%s2015_s1 + $0x440] ss:$8 sps:$4 sm:$0xff]  }
  0x50   :  { %1018 = vmatprep.subr.bf16.mxu0 %v1430_v21  ;;  %1058 = vmatpush1.bf16.msra.mxu1 %v1425_v22  ;;  %v1518_v21 = vld [vmem:[%s2015_s1 + $0x434] ss:$8 sps:$4 sm:$0xff]   ;;  %v1516_v22 = vld [vmem:[%s2015_s1 + $0x430] ss:$8 sps:$4 sm:$0xff]  }
  0x51   :  { %1059 = vmatprep.subr.bf16.mxu1 %v1433_v23  ;;  %v1521_v23 = vld [vmem:[%s2015_s1 + $0x424] ss:$8 sps:$4 sm:$0xff]  }
  0x53   :  { %1019 = vmatpush1.bf16.msra.mxu0 %v1428_v24  ;;  %v1519_v24 = vld [vmem:[%s2015_s1 + $0x420] ss:$8 sps:$4 sm:$0xff]  }
  0x54   :  { %1020 = vmatprep.subr.bf16.mxu0 %v1436_v25  ;;  %1060 = vmatpush1.bf16.msra.mxu1 %v1431_v26  ;;  %v1524_v25 = vld [vmem:[%s2015_s1 + $0x414] ss:$8 sps:$4 sm:$0xff]   ;;  %v1522_v26 = vld [vmem:[%s2015_s1 + $0x410] ss:$8 sps:$4 sm:$0xff]  }
  0x55   :  { %1061 = vmatprep.subr.bf16.mxu1 %v1439_v27  ;;  %v1527_v27 = vld [vmem:[%s2015_s1 + $0x404] ss:$8 sps:$4 sm:$0xff]  }
  0x57   :  { %1021 = vmatpush1.bf16.msra.mxu0 %v1434_v28  ;;  %v1525_v28 = vld [vmem:[%s2015_s1 + $0x400] ss:$8 sps:$4 sm:$0xff]  }
  0x58   :  { %1022 = vmatprep.subr.bf16.mxu0 %v1442_v29  ;;  %1062 = vmatpush1.bf16.msra.mxu1 %v1437_v30  ;;  %v1528_v29 = vld [vmem:[%s2016_s0 + $0x20] ss:$0 sps:$4 sm:$0xff]   ;;  %v166_v30 = vlaneseq }
  0x59   :  { %1063 = vmatprep.subr.bf16.mxu1 %v1445_v31 }
  0x5a   :  { %v167_v31 = vshrl.u32 %v166_v30, 7 }
  0x5b   :  { %1023 = vmatpush1.bf16.msra.mxu0 %v1440_v33  ;;  %v164_v33 = vld [vmem:[%s2017_s2] sm:$0x3] }
  0x5c   :  { %1024 = vmatprep.subr.bf16.mxu0 %v1448_v36  ;;  %1064 = vmatpush1.bf16.msra.mxu1 %v1443_v38  ;;  %v168_v32 = vsub.s32 0, %v167_v31  ;;  %v172_v34 = vsub.s32 1, %v167_v31 }
  0x5d   :  { %1065 = vmatprep.subr.bf16.mxu1 %v1451_v39 }
  0x5e   :  { %v169_v35 = vrot.slane %v164_v33, %v168_v32  ;;  %v173_v36 = vrot.slane %v164_v33, %v172_v34 }
  0x5f   :  { %1025 = vmatpush1.bf16.msra.mxu0 %v1446_v40 }
  0x60   :  { %1026 = vmatprep.subr.bf16.mxu0 %v1454_v41  ;;  %1066 = vmatpush1.bf16.msra.mxu1 %v1449_v42 }
  0x61   :  { %1067 = vmatprep.subr.bf16.mxu1 %v1457_v43 }
  0x63   :  { %1027 = vmatpush2.bf16.msra.mxu0 %v1452_v44 }
  0x64   :  { %1028 = vmatprep.subr.bf16.mxu0 %v1460_v45  ;;  %1068 = vmatpush2.bf16.msra.mxu1 %v1455_v46 }
  0x65   :  { %1069 = vmatprep.subr.bf16.mxu1 %v1463_v47 }
  0x67   :  { %1029 = vmatpush2.bf16.msra.mxu0 %v1458_v48 }
  0x68   :  { %1030 = vmatprep.subr.bf16.mxu0 %v1466_v49  ;;  %1070 = vmatpush2.bf16.msra.mxu1 %v1461_v50 }
  0x69   :  { %1071 = vmatprep.subr.bf16.mxu1 %v1469_v51 }
  0x6b   :  { %1031 = vmatpush2.bf16.msra.mxu0 %v1464_v52 }
  0x6c   :  { %1032 = vmatprep.subr.bf16.mxu0 %v1472_v53  ;;  %1072 = vmatpush2.bf16.msra.mxu1 %v1467_v54 }
  0x6d   :  { %1073 = vmatprep.subr.bf16.mxu1 %v1475_v55 }
  0x6f   :  { %1033 = vmatpush2.bf16.msra.mxu0 %v1470_v56 }
  0x70   :  { %1034 = vmatprep.subr.bf16.mxu0 %v1478_v57  ;;  %1074 = vmatpush2.bf16.msra.mxu1 %v1473_v58 }
  0x71   :  { %1075 = vmatprep.subr.bf16.mxu1 %v1481_v59 }
  0x73   :  { %1035 = vmatpush2.bf16.msra.mxu0 %v1476_v60 }
  0x74   :  { %1036 = vmatprep.subr.bf16.mxu0 %v1484_v61  ;;  %1076 = vmatpush2.bf16.msra.mxu1 %v1479_v62 }
  0x75   :  { %1077 = vmatprep.subr.bf16.mxu1 %v1487_v63 }
  0x77   :  { %1037 = vmatpush2.bf16.msra.mxu0 %v1482_v0 }
  0x78   :  { %1038 = vmatprep.subr.bf16.mxu0 %v1490_v1  ;;  %1078 = vmatpush2.bf16.msra.mxu1 %v1485_v2 }
  0x79   :  { %1079 = vmatprep.subr.bf16.mxu1 %v1493_v3 }
  0x7b   :  { %1039 = vmatpush2.bf16.msra.mxu0 %v1488_v4 }
  0x7c   :  { %1040 = vmatprep.subr.bf16.mxu0 %v1496_v5  ;;  %1080 = vmatpush2.bf16.msra.mxu1 %v1491_v6 }
  0x7d   :  { %1081 = vmatprep.subr.bf16.mxu1 %v1499_v7 }
  0x7f   :  { %1041 = vmatpush2.bf16.msra.mxu0 %v1494_v8 }
  0x80   :  { %1092 = vmatprep.subr.bf16.mxu0 %v1504_v9  ;;  %1082 = vmatpush2.bf16.msra.mxu1 %v1497_v10 }
  0x82   :  { %1043 = vmatmul.mubr.bf16.vlgmr.msra.gmra.mxu0 %v1152_v11 }
  0x83   :  { %1093 = vmatpush1.bf16.msra.mxu0 %v1502_v12  ;;  %1124 = vmatprep.mubr.bf16.mxu0 %v1529_v16 }
  0x84   :  { %1084 = vmatmul.mubr.bf16.vlgmr.msra.gmra.mxu1 %v1154_v13  ;;  %1094 = vmatprep.subr.bf16.mxu0 %v1509_v14 }
  0x87   :  { %1095 = vmatpush1.bf16.msra.mxu0 %v1507_v15 }
  0x88   :  { %1096 = vmatprep.subr.bf16.mxu0 %v1512_v17 }
  0x8b   :  { %1097 = vmatpush1.bf16.msra.mxu0 %v1510_v18 }
  0x8c   :  { %1098 = vmatprep.subr.bf16.mxu0 %v1515_v19 }
  0x8f   :  { %1099 = vmatpush1.bf16.msra.mxu0 %v1513_v20 }
  0x90   :  { %1100 = vmatprep.subr.bf16.mxu0 %v1518_v21 }
  0x93   :  { %1101 = vmatpush1.bf16.msra.mxu0 %v1516_v22 }
  0x94   :  { %1102 = vmatprep.subr.bf16.mxu0 %v1521_v23 }
  0x97   :  { %1103 = vmatpush1.bf16.msra.mxu0 %v1519_v24 }
  0x98   :  { %1104 = vmatprep.subr.bf16.mxu0 %v1524_v25 }
  0x9b   :  { %1105 = vmatpush1.bf16.msra.mxu0 %v1522_v26 }
  0x9c   :  { %1106 = vmatprep.subr.bf16.mxu0 %v1527_v27 }
  0x9f   :  { %1107 = vmatpush1.bf16.msra.mxu0 %v1525_v28 }
  0xa2   :  { %1125 = vmatmul.mubr.bf16.vlgmr.msra.gmra.mxu0 %v1528_v29 }
 0x102   :  { %v962_v37 = vpop.f32.mrf.mxu0 }
 0x103   :  { %v963_v38 = vadd.f32 %v962_v37, %v169_v35  ;;  %v1003_v40 = vpop.f32.mrf.mxu1 }
 0x104   :  { %v964_v39 = vpop.f32.mrf.mxu0 }
 0x105   :  { %v965_v41 = vadd.f32 %v964_v39, %v173_v36  ;;  %v1004_v42 = vadd.f32 %v1003_v40, %v963_v38  ;;  %v1005_v44 = vpop.f32.mrf.mxu1 }
 0x106   :  { %v966_v43 = vpop.f32.mrf.mxu0 }
 0x107   :  { %v1006_v45 = vadd.f32 %v1005_v44, %v965_v41  ;;  %v1007_v47 = vpop.f32.mrf.mxu1 }
 0x108   :  { %v967_v46 = vpop.f32.mrf.mxu0 }
 0x109   :  { %v1008_v48 = vpop.f32.mrf.mxu1 }
 0x142   :  { %v1044_v49 = vpop.f32.mrf.mxu0 }
 0x143   :  { %v1045_v57 = vadd.f32 %v1044_v49, %v1004_v42 }
 0x144   :  { %v1046_v50 = vpop.f32.mrf.mxu0  ;;  %v1085_v51 = vpop.f32.mrf.mxu1 }
 0x145   :  { %v1047_v58 = vadd.f32 %v1046_v50, %v1006_v45  ;;  %v1086_v59 = vadd.f32 %v1085_v51, %v1045_v57 }
 0x146   :  { %v1048_v52 = vpop.f32.mrf.mxu0  ;;  %v1087_v53 = vpop.f32.mrf.mxu1 }
 0x147   :  { %v1088_v61 = vadd.f32 %v1087_v53, %v1047_v58 }
 0x148   :  { %v1049_v54 = vpop.f32.mrf.mxu0  ;;  %v1089_v55 = vpop.f32.mrf.mxu1 }
 0x14a   :  { %v1090_v56 = vpop.f32.mrf.mxu1 }
 0x162   :  { %v1126_v60 = vpop.f32.mrf.mxu0 }
 0x163   :  { %v1127_v62 = vadd.f32 %v1126_v60, %v1086_v59 }
 0x164   :  { %v1128_v63 = vpop.f32.mrf.mxu0 }
 0x165   :  { %v1129_v0 = vadd.f32 %v1128_v63, %v1088_v61  ;;  %v1133_v2 = vmax.f32 %v1127_v62, 0.0 }
 0x166   :  { %v1130_v1 = vpop.f32.mrf.mxu0 }
 0x167   :  { %v1134_v3 = vmax.f32 %v1129_v0, 0.0 }
 0x168   :  { %v1131_v4 = vpop.f32.mrf.mxu0 }
 0x169   :  { %v1302_v5 = vpack.c.bf16 %v1134_v3, %v1133_v2 }
 0x16b   :  { %1143 = vst [vmem:[%s2018_s3] sm:$0xff] %v1302_v5 }

// kernel: vae_forward.16
= control target key start
LH: loop header
LB: loop body
LE: loop exit
PB: predicated region body
PF: predicated region fallthrough
CT: control target
= control target key end

     0   :  { %s2621_s1 = inlined_call_operand.vmem [shape: bf16[2304,128], index: 1, kind: input, shape index: {}]   ;;  %s2622_s0 = inlined_call_operand.vmem [shape: bf16[8,2304], index: 0, kind: input, shape index: {}]   ;;  %s2623_s2 = inlined_call_operand.vmem [shape: f32[1,128], index: 2, kind: input, shape index: {}]   ;;  %s2624_s3 = inlined_call_operand.vmem [shape: bf16[8,128], index: 3, kind: output, shape index: {}]  }
   0x1   :  { %v1974_v0 = vld [vmem:[%s2621_s1 + $0x78] sm:$0xff]   ;;  %v1978_v4 = vld [vmem:[%s2621_s1 + $0x70] sm:$0xff]   ;;  %v1982_v8 = vld [vmem:[%s2621_s1 + $0x68] sm:$0xff]  }
   0x2   :  { %v1975_v1 = vld [vmem:[%s2621_s1 + $0x38] sm:$0xff]   ;;  %1776 = vmatprep.subr.bf16.mxu0 %v1974_v0  ;;  %v1979_v5 = vld [vmem:[%s2621_s1 + $0x30] sm:$0xff]   ;;  %v1983_v9 = vld [vmem:[%s2621_s1 + $0x28] sm:$0xff]  }
   0x3   :  { %v1976_v2 = vld [vmem:[%s2621_s1 + $0xf8] sm:$0xff]   ;;  %1777 = vmatpush3.bf16.msra.mxu0 %v1975_v1  ;;  %v1980_v6 = vld [vmem:[%s2621_s1 + $0xf0] sm:$0xff]   ;;  %v1984_v10 = vld [vmem:[%s2621_s1 + $0xe8] sm:$0xff]  }
   0x4   :  { %v1977_v3 = vld [vmem:[%s2621_s1 + $0xb8] sm:$0xff]   ;;  %1798 = vmatprep.subr.bf16.mxu1 %v1976_v2  ;;  %1778 = vmatprep.subr.bf16.mxu0 %v1978_v4  ;;  %v1981_v7 = vld [vmem:[%s2621_s1 + $0xb0] sm:$0xff]   ;;  %v1985_v11 = vld [vmem:[%s2621_s1 + $0xa8] sm:$0xff]  }
   0x5   :  { %1799 = vmatpush3.bf16.msra.mxu1 %v1977_v3  ;;  %v1986_v12 = vld [vmem:[%s2621_s1 + $0x60] sm:$0xff]   ;;  %v1990_v16 = vld [vmem:[%s2621_s1 + $0x58] sm:$0xff]   ;;  %v1994_v20 = vld [vmem:[%s2621_s1 + $0x50] sm:$0xff]  }
   0x6   :  { %1800 = vmatprep.subr.bf16.mxu1 %v1980_v6  ;;  %v1987_v13 = vld [vmem:[%s2621_s1 + $0x20] sm:$0xff]   ;;  %v1991_v17 = vld [vmem:[%s2621_s1 + $0x18] sm:$0xff]   ;;  %v1995_v21 = vld [vmem:[%s2621_s1 + $0x10] sm:$0xff]  }
   0x7   :  { %1779 = vmatpush3.bf16.msra.mxu0 %v1979_v5  ;;  %v1988_v14 = vld [vmem:[%s2621_s1 + $0xe0] sm:$0xff]   ;;  %v1992_v18 = vld [vmem:[%s2621_s1 + $0xd8] sm:$0xff]   ;;  %v1996_v22 = vld [vmem:[%s2621_s1 + $0xd0] sm:$0xff]  }
   0x8   :  { %1780 = vmatprep.subr.bf16.mxu0 %v1982_v8  ;;  %v1989_v15 = vld [vmem:[%s2621_s1 + $0xa0] sm:$0xff]   ;;  %v1993_v19 = vld [vmem:[%s2621_s1 + $0x98] sm:$0xff]   ;;  %v1997_v23 = vld [vmem:[%s2621_s1 + $0x90] sm:$0xff]  }
   0x9   :  { %1801 = vmatpush3.bf16.msra.mxu1 %v1981_v7  ;;  %v1998_v24 = vld [vmem:[%s2621_s1 + $0x48] sm:$0xff]   ;;  %v2002_v28 = vld [vmem:[%s2621_s1 + $0x40] sm:$0xff]   ;;  %v2008_v35 = vld [vmem:[%s2621_s1 + $0x178] sm:$0xff]  }
   0xa   :  { %1802 = vmatprep.subr.bf16.mxu1 %v1984_v10  ;;  %v1999_v25 = vld [vmem:[%s2621_s1 + $0x8] sm:$0xff]   ;;  %v2003_v29 = vld [vmem:[%s2621_s1] sm:$0xff]   ;;  %v2011_v39 = vld [vmem:[%s2621_s1 + $0x138] sm:$0xff]  }
   0xb   :  { %1781 = vmatpush3.bf16.msra.mxu0 %v1983_v9  ;;  %v2000_v26 = vld [vmem:[%s2621_s1 + $0xc8] sm:$0xff]   ;;  %v2004_v30 = vld [vmem:[%s2621_s1 + $0xc0] sm:$0xff]   ;;  %v2012_v40 = vld [vmem:[%s2621_s1 + $0x1f8] sm:$0xff]  }
   0xc   :  { %1782 = vmatprep.subr.bf16.mxu0 %v1986_v12  ;;  %v2001_v27 = vld [vmem:[%s2621_s1 + $0x88] sm:$0xff]   ;;  %v15_v31 = vld [vmem:[%s2622_s0] sm:$0xff]  ;;  %v2013_v41 = vld [vmem:[%s2621_s1 + $0x1b8] sm:$0xff]  }
   0xd   :  { %1803 = vmatpush3.bf16.msra.mxu1 %v1985_v11  ;;  %v1614_v32 = vcombine.low %v15_v31, %v15_v31  ;;  %v1615_v33 = vcombine.high %v15_v31, %v15_v31  ;;  %v2007_v34 = vld [vmem:[%s2621_s1 + $0x80] sm:$0xff]   ;;  %v16_v36 = vld [vmem:[%s2622_s0 + $0x8] sm:$0xff]  ;;  %v2014_v42 = vld [vmem:[%s2621_s1 + $0x170] sm:$0xff]  }
   0xe   :  { %1804 = vmatprep.subr.bf16.mxu1 %v1988_v14  ;;  %v1616_v37 = vcombine.low %v16_v36, %v16_v36  ;;  %v1617_v38 = vcombine.high %v16_v36, %v16_v36  ;;  %v2015_v43 = vld [vmem:[%s2621_s1 + $0x130] sm:$0xff]   ;;  %v2018_v46 = vld [vmem:[%s2621_s1 + $0x168] sm:$0xff]   ;;  %v2022_v50 = vld [vmem:[%s2621_s1 + $0x160] sm:$0xff]  }
   0xf   :  { %1783 = vmatpush3.bf16.msra.mxu0 %v1987_v13  ;;  %1278 = vmatprep.mubr.bf16.mxu0 %v1615_v33  ;;  %v2016_v44 = vld [vmem:[%s2621_s1 + $0x1f0] sm:$0xff]   ;;  %v2019_v47 = vld [vmem:[%s2621_s1 + $0x128] sm:$0xff]   ;;  %v2023_v51 = vld [vmem:[%s2621_s1 + $0x120] sm:$0xff]  }
  0x10   :  { %1784 = vmatprep.subr.bf16.mxu0 %v1990_v16  ;;  %1318 = vmatprep.mubr.bf16.mxu1 %v1617_v38  ;;  %v2017_v45 = vld [vmem:[%s2621_s1 + $0x1b0] sm:$0xff]   ;;  %v2020_v48 = vld [vmem:[%s2621_s1 + $0x1e8] sm:$0xff]   ;;  %v2024_v52 = vld [vmem:[%s2621_s1 + $0x1e0] sm:$0xff]  }
  0x11   :  { %1805 = vmatpush3.bf16.msra.mxu1 %v1989_v15  ;;  %v2021_v49 = vld [vmem:[%s2621_s1 + $0x1a8] sm:$0xff]   ;;  %v2025_v53 = vld [vmem:[%s2621_s1 + $0x1a0] sm:$0xff]   ;;  %v2026_v54 = vld [vmem:[%s2621_s1 + $0x158] sm:$0xff]  }
  0x12   :  { %1806 = vmatprep.subr.bf16.mxu1 %v1992_v18  ;;  %v2027_v55 = vld [vmem:[%s2621_s1 + $0x118] sm:$0xff]   ;;  %v2030_v58 = vld [vmem:[%s2621_s1 + $0x150] sm:$0xff]   ;;  %v2034_v62 = vld [vmem:[%s2621_s1 + $0x148] sm:$0xff]  }
  0x13   :  { %1785 = vmatpush3.bf16.msra.mxu0 %v1991_v17  ;;  %v2028_v56 = vld [vmem:[%s2621_s1 + $0x1d8] sm:$0xff]   ;;  %v2031_v59 = vld [vmem:[%s2621_s1 + $0x110] sm:$0xff]   ;;  %v2035_v63 = vld [vmem:[%s2621_s1 + $0x108] sm:$0xff]  }
  0x14   :  { %1786 = vmatprep.subr.bf16.mxu0 %v1994_v20  ;;  %v2029_v57 = vld [vmem:[%s2621_s1 + $0x198] sm:$0xff]   ;;  %v2032_v60 = vld [vmem:[%s2621_s1 + $0x1d0] sm:$0xff]   ;;  %v2036_v0 = vld [vmem:[%s2621_s1 + $0x1c8] sm:$0xff]  }
  0x15   :  { %1807 = vmatpush3.bf16.msra.mxu1 %v1993_v19  ;;  %v2033_v61 = vld [vmem:[%s2621_s1 + $0x190] sm:$0xff]   ;;  %v2037_v1 = vld [vmem:[%s2621_s1 + $0x188] sm:$0xff]   ;;  %v2038_v2 = vld [vmem:[%s2621_s1 + $0x140] sm:$0xff]  }
  0x16   :  { %1808 = vmatprep.subr.bf16.mxu1 %v1996_v22  ;;  %v2039_v3 = vld [vmem:[%s2621_s1 + $0x100] sm:$0xff]   ;;  %v17_v5 = vld [vmem:[%s2622_s0 + $0x10] sm:$0xff]  ;;  %v2044_v9 = vld [vmem:[%s2621_s1 + $0x278] sm:$0xff]  }
  0x17   :  { %1787 = vmatpush3.bf16.msra.mxu0 %v1995_v21  ;;  %v2040_v4 = vld [vmem:[%s2621_s1 + $0x1c0] sm:$0xff]   ;;  %v1618_v6 = vcombine.low %v17_v5, %v17_v5  ;;  %v1619_v7 = vcombine.high %v17_v5, %v17_v5  ;;  %v18_v10 = vld [vmem:[%s2622_s0 + $0x18] sm:$0xff]  ;;  %v2050_v16 = vld [vmem:[%s2621_s1 + $0x270] sm:$0xff]  }
  0x18   :  { %1788 = vmatprep.subr.bf16.mxu0 %v1998_v24  ;;  %v2043_v8 = vld [vmem:[%s2621_s1 + $0x180] sm:$0xff]   ;;  %v1620_v11 = vcombine.low %v18_v10, %v18_v10  ;;  %v1621_v12 = vcombine.high %v18_v10, %v18_v10  ;;  %v2047_v13 = vld [vmem:[%s2621_s1 + $0x238] sm:$0xff]   ;;  %v2051_v17 = vld [vmem:[%s2621_s1 + $0x230] sm:$0xff]  }
  0x19   :  { %1809 = vmatpush3.bf16.msra.mxu1 %v1997_v23  ;;  %v2048_v14 = vld [vmem:[%s2621_s1 + $0x2f8] sm:$0xff]   ;;  %v2052_v18 = vld [vmem:[%s2621_s1 + $0x2f0] sm:$0xff]   ;;  %v2054_v20 = vld [vmem:[%s2621_s1 + $0x268] sm:$0xff]  }
  0x1a   :  { %1810 = vmatprep.subr.bf16.mxu1 %v2000_v26  ;;  %v2049_v15 = vld [vmem:[%s2621_s1 + $0x2b8] sm:$0xff]   ;;  %v2053_v19 = vld [vmem:[%s2621_s1 + $0x2b0] sm:$0xff]   ;;  %v2055_v21 = vld [vmem:[%s2621_s1 + $0x228] sm:$0xff]  }
  0x1b   :  { %1789 = vmatpush3.bf16.msra.mxu0 %v1999_v25  ;;  %v2056_v22 = vld [vmem:[%s2621_s1 + $0x2e8] sm:$0xff]   ;;  %v2058_v24 = vld [vmem:[%s2621_s1 + $0x260] sm:$0xff]   ;;  %v2065_v31 = vld [vmem:[%s2621_s1 + $0x298] sm:$0xff]  }
  0x1c   :  { %1790 = vmatprep.subr.bf16.mxu0 %v2002_v28  ;;  %v2057_v23 = vld [vmem:[%s2621_s1 + $0x2a8] sm:$0xff]   ;;  %v2059_v25 = vld [vmem:[%s2621_s1 + $0x220] sm:$0xff]   ;;  %v2062_v28 = vld [vmem:[%s2621_s1 + $0x258] sm:$0xff]  }
  0x1d   :  { %1811 = vmatpush3.bf16.msra.mxu1 %v2001_v27  ;;  %v2060_v26 = vld [vmem:[%s2621_s1 + $0x2e0] sm:$0xff]   ;;  %v2067_v33 = vld [vmem:[%s2621_s1 + $0x210] sm:$0xff]   ;;  %v2070_v36 = vld [vmem:[%s2621_s1 + $0x248] sm:$0xff]  }
  0x1e   :  { %1812 = vmatprep.subr.bf16.mxu1 %v2004_v30  ;;  %v2061_v27 = vld [vmem:[%s2621_s1 + $0x2a0] sm:$0xff]   ;;  %v2064_v30 = vld [vmem:[%s2621_s1 + $0x2d8] sm:$0xff]   ;;  %v2072_v38 = vld [vmem:[%s2621_s1 + $0x2c8] sm:$0xff]  }
  0x1f   :  { %1791 = vmatpush3.bf16.msra.mxu0 %v2003_v29  ;;  %v2063_v29 = vld [vmem:[%s2621_s1 + $0x218] sm:$0xff]   ;;  %v2106_v10 = vld [vmem:[%s2621_s1 + $0x348] sm:$0xff]  }
  0x20   :  { %1820 = vmatprep.subr.bf16.mxu0 %v2008_v35  ;;  %v2069_v35 = vld [vmem:[%s2621_s1 + $0x290] sm:$0xff]   ;;  %v2101_v5 = vld [vmem:[%s2621_s1 + $0x398] sm:$0xff]  }
  0x21   :  { %1813 = vmatpush3.bf16.msra.mxu1 %v2007_v34  ;;  %v2068_v34 = vld [vmem:[%s2621_s1 + $0x2d0] sm:$0xff]  }
  0x22   :  { %1279 = vmatmul.mubr.bf16.vlgmr.msra.gmra.mxu0 %v1614_v32  ;;  %1842 = vmatprep.subr.bf16.mxu1 %v2012_v40  ;;  %v2066_v32 = vld [vmem:[%s2621_s1 + $0x250] sm:$0xff]   ;;  %v2074_v40 = vld [vmem:[%s2621_s1 + $0x240] sm:$0xff]  }
  0x23   :  { %1821 = vmatpush3.bf16.msra.mxu0 %v2011_v39  ;;  %1358 = vmatprep.mubr.bf16.mxu0 %v1619_v7  ;;  %v2073_v39 = vld [vmem:[%s2621_s1 + $0x288] sm:$0xff]   ;;  %v2103_v7 = vld [vmem:[%s2621_s1 + $0x310] sm:$0xff]  }
  0x24   :  { %1319 = vmatmul.mubr.bf16.vlgmr.msra.gmra.mxu1 %v1616_v37  ;;  %1822 = vmatprep.subr.bf16.mxu0 %v2014_v42  ;;  %v2071_v37 = vld [vmem:[%s2621_s1 + $0x208] sm:$0xff]   ;;  %v2076_v42 = vld [vmem:[%s2621_s1 + $0x2c0] sm:$0xff]  }
  0x25   :  { %1843 = vmatpush3.bf16.msra.mxu1 %v2013_v41  ;;  %1398 = vmatprep.mubr.bf16.mxu1 %v1621_v12  ;;  %v2075_v41 = vld [vmem:[%s2621_s1 + $0x200] sm:$0xff]   ;;  %v2108_v12 = vld [vmem:[%s2621_s1 + $0x3c8] sm:$0xff]  }
  0x26   :  { %1844 = vmatprep.subr.bf16.mxu1 %v2016_v44 }
  0x27   :  { %1823 = vmatpush3.bf16.msra.mxu0 %v2015_v43  ;;  %v19_v43 = vld [vmem:[%s2622_s0 + $0x20] sm:$0xff] }
  0x28   :  { %1824 = vmatprep.subr.bf16.mxu0 %v2018_v46  ;;  %v1622_v44 = vcombine.low %v19_v43, %v19_v43  ;;  %v2079_v46 = vld [vmem:[%s2621_s1 + $0x280] sm:$0xff]  }
  0x29   :  { %1845 = vmatpush3.bf16.msra.mxu1 %v2017_v45  ;;  %v1623_v45 = vcombine.high %v19_v43, %v19_v43 }
  0x2a   :  { %1846 = vmatprep.subr.bf16.mxu1 %v2020_v48  ;;  %v20_v48 = vld [vmem:[%s2622_s0 + $0x28] sm:$0xff] }
  0x2b   :  { %1825 = vmatpush3.bf16.msra.mxu0 %v2019_v47  ;;  %v2080_v47 = vld [vmem:[%s2621_s1 + $0x378] sm:$0xff]  }
  0x2c   :  { %1826 = vmatprep.subr.bf16.mxu0 %v2022_v50  ;;  %v1625_v50 = vcombine.high %v20_v48, %v20_v48 }
  0x2d   :  { %1847 = vmatpush3.bf16.msra.mxu1 %v2021_v49  ;;  %v1624_v49 = vcombine.low %v20_v48, %v20_v48 }
  0x2e   :  { %1848 = vmatprep.subr.bf16.mxu1 %v2024_v52  ;;  %v2084_v52 = vld [vmem:[%s2621_s1 + $0x3f8] sm:$0xff]  }
  0x2f   :  { %1827 = vmatpush3.bf16.msra.mxu0 %v2023_v51  ;;  %v2083_v51 = vld [vmem:[%s2621_s1 + $0x338] sm:$0xff]  }
  0x30   :  { %1828 = vmatprep.subr.bf16.mxu0 %v2026_v54  ;;  %v2086_v54 = vld [vmem:[%s2621_s1 + $0x370] sm:$0xff]  }
  0x31   :  { %1849 = vmatpush3.bf16.msra.mxu1 %v2025_v53  ;;  %v2085_v53 = vld [vmem:[%s2621_s1 + $0x3b8] sm:$0xff]  }
  0x32   :  { %1850 = vmatprep.subr.bf16.mxu1 %v2028_v56  ;;  %v2088_v56 = vld [vmem:[%s2621_s1 + $0x3f0] sm:$0xff]  }
  0x33   :  { %1829 = vmatpush3.bf16.msra.mxu0 %v2027_v55  ;;  %v2087_v55 = vld [vmem:[%s2621_s1 + $0x330] sm:$0xff]  }
  0x34   :  { %1830 = vmatprep.subr.bf16.mxu0 %v2030_v58  ;;  %v2090_v58 = vld [vmem:[%s2621_s1 + $0x368] sm:$0xff]  }
  0x35   :  { %1851 = vmatpush3.bf16.msra.mxu1 %v2029_v57  ;;  %v2089_v57 = vld [vmem:[%s2621_s1 + $0x3b0] sm:$0xff]  }
  0x36   :  { %1852 = vmatprep.subr.bf16.mxu1 %v2032_v60  ;;  %v2092_v60 = vld [vmem:[%s2621_s1 + $0x3e8] sm:$0xff]  }
  0x37   :  { %1831 = vmatpush3.bf16.msra.mxu0 %v2031_v59  ;;  %v2091_v59 = vld [vmem:[%s2621_s1 + $0x328] sm:$0xff]  }
  0x38   :  { %1832 = vmatprep.subr.bf16.mxu0 %v2034_v62  ;;  %v2094_v62 = vld [vmem:[%s2621_s1 + $0x360] sm:$0xff]  }
  0x39   :  { %1853 = vmatpush3.bf16.msra.mxu1 %v2033_v61  ;;  %v2093_v61 = vld [vmem:[%s2621_s1 + $0x3a8] sm:$0xff]  }
  0x3a   :  { %1854 = vmatprep.subr.bf16.mxu1 %v2036_v0  ;;  %v2096_v0 = vld [vmem:[%s2621_s1 + $0x3e0] sm:$0xff]  }
  0x3b   :  { %1833 = vmatpush3.bf16.msra.mxu0 %v2035_v63  ;;  %v2095_v63 = vld [vmem:[%s2621_s1 + $0x320] sm:$0xff]  }
  0x3c   :  { %1834 = vmatprep.subr.bf16.mxu0 %v2038_v2  ;;  %v2098_v2 = vld [vmem:[%s2621_s1 + $0x358] sm:$0xff]  }
  0x3d   :  { %1855 = vmatpush3.bf16.msra.mxu1 %v2037_v1  ;;  %v2097_v1 = vld [vmem:[%s2621_s1 + $0x3a0] sm:$0xff]  }
  0x3e   :  { %1856 = vmatprep.subr.bf16.mxu1 %v2040_v4  ;;  %v2100_v4 = vld [vmem:[%s2621_s1 + $0x3d8] sm:$0xff]  }
  0x3f   :  { %1835 = vmatpush3.bf16.msra.mxu0 %v2039_v3  ;;  %v2099_v3 = vld [vmem:[%s2621_s1 + $0x318] sm:$0xff]  }
  0x40   :  { %1864 = vmatprep.subr.bf16.mxu0 %v2044_v9  ;;  %v2105_v9 = vld [vmem:[%s2621_s1 + $0x390] sm:$0xff]  }
  0x41   :  { %1857 = vmatpush3.bf16.msra.mxu1 %v2043_v8  ;;  %v2104_v8 = vld [vmem:[%s2621_s1 + $0x3d0] sm:$0xff]  }
  0x42   :  { %1359 = vmatmul.mubr.bf16.vlgmr.msra.gmra.mxu0 %v1618_v6  ;;  %1886 = vmatprep.subr.bf16.mxu1 %v2048_v14  ;;  %v2102_v6 = vld [vmem:[%s2621_s1 + $0x350] sm:$0xff]   ;;  %v2110_v14 = vld [vmem:[%s2621_s1 + $0x340] sm:$0xff]  }
  0x43   :  { %1865 = vmatpush3.bf16.msra.mxu0 %v2047_v13  ;;  %1438 = vmatprep.mubr.bf16.mxu0 %v1623_v45  ;;  %v2109_v13 = vld [vmem:[%s2621_s1 + $0x388] sm:$0xff]  }
  0x44   :  { %1399 = vmatmul.mubr.bf16.vlgmr.msra.gmra.mxu1 %v1620_v11  ;;  %1866 = vmatprep.subr.bf16.mxu0 %v2050_v16  ;;  %v2107_v11 = vld [vmem:[%s2621_s1 + $0x308] sm:$0xff]   ;;  %v2112_v16 = vld [vmem:[%s2621_s1 + $0x3c0] sm:$0xff]  }
  0x45   :  { %1887 = vmatpush3.bf16.msra.mxu1 %v2049_v15  ;;  %1478 = vmatprep.mubr.bf16.mxu1 %v1625_v50  ;;  %v2111_v15 = vld [vmem:[%s2621_s1 + $0x300] sm:$0xff]  }
  0x46   :  { %1888 = vmatprep.subr.bf16.mxu1 %v2052_v18 }
  0x47   :  { %1867 = vmatpush3.bf16.msra.mxu0 %v2051_v17  ;;  %v21_v17 = vld [vmem:[%s2622_s0 + $0x30] sm:$0xff] }
  0x48   :  { %1868 = vmatprep.subr.bf16.mxu0 %v2054_v20  ;;  %v1626_v18 = vcombine.low %v21_v17, %v21_v17  ;;  %v2115_v20 = vld [vmem:[%s2621_s1 + $0x380] sm:$0xff]  }
  0x49   :  { %1889 = vmatpush3.bf16.msra.mxu1 %v2053_v19  ;;  %v1627_v19 = vcombine.high %v21_v17, %v21_v17 }
  0x4a   :  { %1890 = vmatprep.subr.bf16.mxu1 %v2056_v22  ;;  %v22_v22 = vld [vmem:[%s2622_s0 + $0x38] sm:$0xff] }
  0x4b   :  { %1869 = vmatpush3.bf16.msra.mxu0 %v2055_v21  ;;  %v2116_v21 = vld [vmem:[%s2621_s1 + $0x478] sm:$0xff]  }
  0x4c   :  { %1870 = vmatprep.subr.bf16.mxu0 %v2058_v24  ;;  %v1629_v24 = vcombine.high %v22_v22, %v22_v22 }
  0x4d   :  { %1891 = vmatpush3.bf16.msra.mxu1 %v2057_v23  ;;  %v1628_v23 = vcombine.low %v22_v22, %v22_v22 }
  0x4e   :  { %1892 = vmatprep.subr.bf16.mxu1 %v2060_v26  ;;  %v2120_v26 = vld [vmem:[%s2621_s1 + $0x470] sm:$0xff]  }
  0x4f   :  { %1871 = vmatpush3.bf16.msra.mxu0 %v2059_v25  ;;  %v2119_v25 = vld [vmem:[%s2621_s1 + $0x438] sm:$0xff]  }
  0x50   :  { %1872 = vmatprep.subr.bf16.mxu0 %v2062_v28  ;;  %v2122_v28 = vld [vmem:[%s2621_s1 + $0x468] sm:$0xff]  }
  0x51   :  { %1893 = vmatpush3.bf16.msra.mxu1 %v2061_v27  ;;  %v2121_v27 = vld [vmem:[%s2621_s1 + $0x430] sm:$0xff]  }
  0x52   :  { %1894 = vmatprep.subr.bf16.mxu1 %v2064_v30  ;;  %v2124_v30 = vld [vmem:[%s2621_s1 + $0x460] sm:$0xff]  }
  0x53   :  { %1873 = vmatpush3.bf16.msra.mxu0 %v2063_v29  ;;  %v2123_v29 = vld [vmem:[%s2621_s1 + $0x428] sm:$0xff]  }
  0x54   :  { %1874 = vmatprep.subr.bf16.mxu0 %v2066_v32  ;;  %v2126_v32 = vld [vmem:[%s2621_s1 + $0x458] sm:$0xff]  }
  0x55   :  { %1895 = vmatpush3.bf16.msra.mxu1 %v2065_v31  ;;  %v2125_v31 = vld [vmem:[%s2621_s1 + $0x420] sm:$0xff]  }
  0x56   :  { %1896 = vmatprep.subr.bf16.mxu1 %v2068_v34  ;;  %v23_v34 = vld [vmem:[%s2622_s0 + $0x40] sm:$0xff] }
  0x57   :  { %1875 = vmatpush3.bf16.msra.mxu0 %v2067_v33  ;;  %v2127_v33 = vld [vmem:[%s2621_s1 + $0x418] sm:$0xff]  }
  0x58   :  { %1876 = vmatprep.subr.bf16.mxu0 %v2070_v36  ;;  %v1631_v36 = vcombine.high %v23_v34, %v23_v34 }
  0x59   :  { %1897 = vmatpush3.bf16.msra.mxu1 %v2069_v35  ;;  %v2128_v35 = vld [vmem:[%s2621_s1 + $0x450] sm:$0xff]  }
  0x5a   :  { %1898 = vmatprep.subr.bf16.mxu1 %v2072_v38  ;;  %v2130_v38 = vld [vmem:[%s2621_s1 + $0x448] sm:$0xff]  }
  0x5b   :  { %1877 = vmatpush3.bf16.msra.mxu0 %v2071_v37  ;;  %v2129_v37 = vld [vmem:[%s2621_s1 + $0x410] sm:$0xff]  }
  0x5c   :  { %1878 = vmatprep.subr.bf16.mxu0 %v2074_v40  ;;  %v2132_v40 = vld [vmem:[%s2621_s1 + $0x440] sm:$0xff]  }
  0x5d   :  { %1899 = vmatpush3.bf16.msra.mxu1 %v2073_v39  ;;  %v2131_v39 = vld [vmem:[%s2621_s1 + $0x408] sm:$0xff]  }
  0x5e   :  { %1900 = vmatprep.subr.bf16.mxu1 %v2076_v42  ;;  %v1630_v42 = vcombine.low %v23_v34, %v23_v34 }
  0x5f   :  { %1879 = vmatpush3.bf16.msra.mxu0 %v2075_v41  ;;  %v2133_v41 = vld [vmem:[%s2621_s1 + $0x400] sm:$0xff]  }
  0x60   :  { %1908 = vmatprep.subr.bf16.mxu0 %v2080_v47 }
  0x61   :  { %1901 = vmatpush3.bf16.msra.mxu1 %v2079_v46 }
  0x62   :  { %1439 = vmatmul.mubr.bf16.vlgmr.msra.gmra.mxu0 %v1622_v44  ;;  %1930 = vmatprep.subr.bf16.mxu1 %v2084_v52  ;;  %v1613_v44 = vld [vmem:[%s2623_s2] ss:$0 sm:$0xff] }
  0x63   :  { %1909 = vmatpush3.bf16.msra.mxu0 %v2083_v51  ;;  %1518 = vmatprep.mubr.bf16.mxu0 %v1627_v19 }
  0x64   :  { %1479 = vmatmul.mubr.bf16.vlgmr.msra.gmra.mxu1 %v1624_v49  ;;  %1910 = vmatprep.subr.bf16.mxu0 %v2086_v54 }
  0x65   :  { %1931 = vmatpush3.bf16.msra.mxu1 %v2085_v53  ;;  %1558 = vmatprep.mubr.bf16.mxu1 %v1629_v24 }
  0x66   :  { %1932 = vmatprep.subr.bf16.mxu1 %v2088_v56 }
  0x67   :  { %1911 = vmatpush3.bf16.msra.mxu0 %v2087_v55 }
  0x68   :  { %1912 = vmatprep.subr.bf16.mxu0 %v2090_v58 }
  0x69   :  { %1933 = vmatpush3.bf16.msra.mxu1 %v2089_v57 }
  0x6a   :  { %1934 = vmatprep.subr.bf16.mxu1 %v2092_v60 }
  0x6b   :  { %1913 = vmatpush3.bf16.msra.mxu0 %v2091_v59 }
  0x6c   :  { %1914 = vmatprep.subr.bf16.mxu0 %v2094_v62 }
  0x6d   :  { %1935 = vmatpush3.bf16.msra.mxu1 %v2093_v61 }
  0x6e   :  { %1936 = vmatprep.subr.bf16.mxu1 %v2096_v0 }
  0x6f   :  { %1915 = vmatpush3.bf16.msra.mxu0 %v2095_v63 }
  0x70   :  { %1916 = vmatprep.subr.bf16.mxu0 %v2098_v2 }
  0x71   :  { %1937 = vmatpush3.bf16.msra.mxu1 %v2097_v1 }
  0x72   :  { %1938 = vmatprep.subr.bf16.mxu1 %v2100_v4 }
  0x73   :  { %1917 = vmatpush3.bf16.msra.mxu0 %v2099_v3 }
  0x74   :  { %1918 = vmatprep.subr.bf16.mxu0 %v2102_v6 }
  0x75   :  { %1939 = vmatpush3.bf16.msra.mxu1 %v2101_v5 }
  0x76   :  { %1940 = vmatprep.subr.bf16.mxu1 %v2104_v8 }
  0x77   :  { %1919 = vmatpush3.bf16.msra.mxu0 %v2103_v7 }
  0x78   :  { %1920 = vmatprep.subr.bf16.mxu0 %v2106_v10 }
  0x79   :  { %1941 = vmatpush3.bf16.msra.mxu1 %v2105_v9 }
  0x7a   :  { %1942 = vmatprep.subr.bf16.mxu1 %v2108_v12 }
  0x7b   :  { %1921 = vmatpush3.bf16.msra.mxu0 %v2107_v11 }
  0x7c   :  { %1922 = vmatprep.subr.bf16.mxu0 %v2110_v14 }
  0x7d   :  { %1943 = vmatpush3.bf16.msra.mxu1 %v2109_v13 }
  0x7e   :  { %1944 = vmatprep.subr.bf16.mxu1 %v2112_v16 }
  0x7f   :  { %1923 = vmatpush3.bf16.msra.mxu0 %v2111_v15 }
  0x80   :  { %1952 = vmatprep.subr.bf16.mxu0 %v2116_v21 }
  0x81   :  { %1945 = vmatpush3.bf16.msra.mxu1 %v2115_v20 }
  0x82   :  { %1519 = vmatmul.mubr.bf16.vlgmr.msra.gmra.mxu0 %v1626_v18 }
  0x83   :  { %1953 = vmatpush3.bf16.msra.mxu0 %v2119_v25  ;;  %1598 = vmatprep.mubr.bf16.mxu0 %v1631_v36 }
  0x84   :  { %1559 = vmatmul.mubr.bf16.vlgmr.msra.gmra.mxu1 %v1628_v23  ;;  %1954 = vmatprep.subr.bf16.mxu0 %v2120_v26 }
  0x87   :  { %1955 = vmatpush3.bf16.msra.mxu0 %v2121_v27 }
  0x88   :  { %1956 = vmatprep.subr.bf16.mxu0 %v2122_v28 }
  0x8b   :  { %1957 = vmatpush3.bf16.msra.mxu0 %v2123_v29 }
  0x8c   :  { %1958 = vmatprep.subr.bf16.mxu0 %v2124_v30 }
  0x8f   :  { %1959 = vmatpush3.bf16.msra.mxu0 %v2125_v31 }
  0x90   :  { %1960 = vmatprep.subr.bf16.mxu0 %v2126_v32 }
  0x93   :  { %1961 = vmatpush3.bf16.msra.mxu0 %v2127_v33 }
  0x94   :  { %1962 = vmatprep.subr.bf16.mxu0 %v2128_v35 }
  0x97   :  { %1963 = vmatpush3.bf16.msra.mxu0 %v2129_v37 }
  0x98   :  { %1964 = vmatprep.subr.bf16.mxu0 %v2130_v38 }
  0x9b   :  { %1965 = vmatpush3.bf16.msra.mxu0 %v2131_v39 }
  0x9c   :  { %1966 = vmatprep.subr.bf16.mxu0 %v2132_v40 }
  0x9f   :  { %1967 = vmatpush3.bf16.msra.mxu0 %v2133_v41 }
  0xa2   :  { %1599 = vmatmul.mubr.bf16.vlgmr.msra.gmra.mxu0 %v1630_v42 }
  0xe2   :  { %v1792_v43 = vpop.f32.mrf.mxu0 }
  0xe4   :  { %v1793_v45 = vpop.f32.mrf.mxu0  ;;  %v1814_v46 = vpop.f32.mrf.mxu1 }
  0xe5   :  { %v1794_v47 = vadd.f32 %v1793_v45, %v1792_v43 }
  0xe6   :  { %v1795_v48 = vpop.f32.mrf.mxu0  ;;  %v1815_v49 = vpop.f32.mrf.mxu1 }
  0xe7   :  { %v1281_v50 = vadd.f32 %v1794_v47, %v1613_v44  ;;  %v1816_v51 = vadd.f32 %v1815_v49, %v1814_v46 }
  0xe8   :  { %v1796_v52 = vpop.f32.mrf.mxu0  ;;  %v1817_v53 = vpop.f32.mrf.mxu1 }
  0xe9   :  { %v1321_v54 = vadd.f32 %v1816_v51, %v1281_v50 }
  0xea   :  { %v1818_v55 = vpop.f32.mrf.mxu1 }
 0x102   :  { %v1836_v56 = vpop.f32.mrf.mxu0 }
 0x104   :  { %v1837_v57 = vpop.f32.mrf.mxu0  ;;  %v1858_v59 = vpop.f32.mrf.mxu1 }
 0x105   :  { %v1838_v58 = vadd.f32 %v1837_v57, %v1836_v56 }
 0x106   :  { %v1839_v60 = vpop.f32.mrf.mxu0  ;;  %v1859_v62 = vpop.f32.mrf.mxu1 }
 0x107   :  { %v1361_v61 = vadd.f32 %v1838_v58, %v1321_v54  ;;  %v1860_v63 = vadd.f32 %v1859_v62, %v1858_v59 }
 0x108   :  { %v1840_v0 = vpop.f32.mrf.mxu0  ;;  %v1861_v1 = vpop.f32.mrf.mxu1 }
 0x109   :  { %v1401_v2 = vadd.f32 %v1860_v63, %v1361_v61 }
 0x10a   :  { %v1862_v3 = vpop.f32.mrf.mxu1 }
 0x122   :  { %v1880_v4 = vpop.f32.mrf.mxu0 }
 0x124   :  { %v1881_v5 = vpop.f32.mrf.mxu0  ;;  %v1902_v6 = vpop.f32.mrf.mxu1 }
 0x125   :  { %v1882_v20 = vadd.f32 %v1881_v5, %v1880_v4 }
 0x126   :  { %v1883_v7 = vpop.f32.mrf.mxu0  ;;  %v1903_v8 = vpop.f32.mrf.mxu1 }
 0x127   :  { %v1441_v21 = vadd.f32 %v1882_v20, %v1401_v2  ;;  %v1904_v22 = vadd.f32 %v1903_v8, %v1902_v6 }
 0x128   :  { %v1884_v9 = vpop.f32.mrf.mxu0  ;;  %v1905_v10 = vpop.f32.mrf.mxu1 }
 0x129   :  { %v1481_v24 = vadd.f32 %v1904_v22, %v1441_v21 }
 0x12a   :  { %v1906_v11 = vpop.f32.mrf.mxu1 }
 0x142   :  { %v1924_v12 = vpop.f32.mrf.mxu0 }
 0x144   :  { %v1925_v13 = vpop.f32.mrf.mxu0  ;;  %v1946_v14 = vpop.f32.mrf.mxu1 }
 0x145   :  { %v1926_v23 = vadd.f32 %v1925_v13, %v1924_v12 }
 0x146   :  { %v1927_v15 = vpop.f32.mrf.mxu0  ;;  %v1947_v16 = vpop.f32.mrf.mxu1 }
 0x147   :  { %v1521_v25 = vadd.f32 %v1926_v23, %v1481_v24  ;;  %v1948_v26 = vadd.f32 %v1947_v16, %v1946_v14 }
 0x148   :  { %v1928_v17 = vpop.f32.mrf.mxu0  ;;  %v1949_v18 = vpop.f32.mrf.mxu1 }
 0x149   :  { %v1561_v29 = vadd.f32 %v1948_v26, %v1521_v25 }
 0x14a   :  { %v1950_v19 = vpop.f32.mrf.mxu1 }
 0x162   :  { %v1968_v27 = vpop.f32.mrf.mxu0 }
 0x164   :  { %v1969_v28 = vpop.f32.mrf.mxu0 }
 0x165   :  { %v1970_v30 = vadd.f32 %v1969_v28, %v1968_v27 }
 0x166   :  { %v1971_v31 = vpop.f32.mrf.mxu0 }
 0x167   :  { %v1601_v32 = vadd.f32 %v1970_v30, %v1561_v29 }
 0x168   :  { %v1972_v33 = vpop.f32.mrf.mxu0 }
 0x169   :  { %v1606_v34 = vmax.f32 %v1601_v32, 0.0 }
 0x16b   :  { %v1607_v35 = vpack.c.bf16 %v1606_v34, %v1606_v34 }
 0x16d   :  { %1608 = vst [vmem:[%s2624_s3] sm:$0xf] %v1607_v35 }

// kernel: vae_forward.17
= control target key start
LH: loop header
LB: loop body
LE: loop exit
PB: predicated region body
PF: predicated region fallthrough
CT: control target
= control target key end

     0   :  { %s1632_s1 = inlined_call_operand.vmem [shape: bf16[1152,128], index: 1, kind: input, shape index: {}]   ;;  %s1633_s0 = inlined_call_operand.vmem [shape: bf16[32,1152], index: 0, kind: input, shape index: {}]   ;;  %s1634_s2 = inlined_call_operand.vmem [shape: f32[1,128], index: 2, kind: input, shape index: {}]   ;;  %s1635_s3 = inlined_call_operand.vmem [shape: bf16[32,128], index: 3, kind: output, shape index: {}]  }
   0x1   :  { %v1235_v0 = vld [vmem:[%s1632_s1 + $0x78] sm:$0xff]   ;;  %v1239_v4 = vld [vmem:[%s1632_s1 + $0x70] sm:$0xff]   ;;  %v1243_v8 = vld [vmem:[%s1632_s1 + $0x68] sm:$0xff]  }
   0x2   :  { %v1236_v1 = vld [vmem:[%s1632_s1 + $0x38] sm:$0xff]   ;;  %1093 = vmatprep.subr.bf16.mxu0 %v1235_v0  ;;  %v1240_v5 = vld [vmem:[%s1632_s1 + $0x30] sm:$0xff]   ;;  %v1244_v9 = vld [vmem:[%s1632_s1 + $0x28] sm:$0xff]  }
   0x3   :  { %v1237_v2 = vld [vmem:[%s1632_s1 + $0xf8] sm:$0xff]   ;;  %1094 = vmatpush3.bf16.msra.mxu0 %v1236_v1  ;;  %v1241_v6 = vld [vmem:[%s1632_s1 + $0xf0] sm:$0xff]   ;;  %v1245_v10 = vld [vmem:[%s1632_s1 + $0xe8] sm:$0xff]  }
   0x4   :  { %v1238_v3 = vld [vmem:[%s1632_s1 + $0xb8] sm:$0xff]   ;;  %1121 = vmatprep.subr.bf16.mxu1 %v1237_v2  ;;  %1095 = vmatprep.subr.bf16.mxu0 %v1239_v4  ;;  %v1242_v7 = vld [vmem:[%s1632_s1 + $0xb0] sm:$0xff]   ;;  %v1246_v11 = vld [vmem:[%s1632_s1 + $0xa8] sm:$0xff]  }
   0x5   :  { %1122 = vmatpush3.bf16.msra.mxu1 %v1238_v3  ;;  %v1247_v12 = vld [vmem:[%s1632_s1 + $0x60] sm:$0xff]   ;;  %v1251_v16 = vld [vmem:[%s1632_s1 + $0x58] sm:$0xff]   ;;  %v1255_v20 = vld [vmem:[%s1632_s1 + $0x50] sm:$0xff]  }
   0x6   :  { %1123 = vmatprep.subr.bf16.mxu1 %v1241_v6  ;;  %v1248_v13 = vld [vmem:[%s1632_s1 + $0x20] sm:$0xff]   ;;  %v1252_v17 = vld [vmem:[%s1632_s1 + $0x18] sm:$0xff]   ;;  %v1256_v21 = vld [vmem:[%s1632_s1 + $0x10] sm:$0xff]  }
   0x7   :  { %1096 = vmatpush3.bf16.msra.mxu0 %v1240_v5  ;;  %v1249_v14 = vld [vmem:[%s1632_s1 + $0xe0] sm:$0xff]   ;;  %v1253_v18 = vld [vmem:[%s1632_s1 + $0xd8] sm:$0xff]   ;;  %v1257_v22 = vld [vmem:[%s1632_s1 + $0xd0] sm:$0xff]  }
   0x8   :  { %1097 = vmatprep.subr.bf16.mxu0 %v1243_v8  ;;  %v1250_v15 = vld [vmem:[%s1632_s1 + $0xa0] sm:$0xff]   ;;  %v1254_v19 = vld [vmem:[%s1632_s1 + $0x98] sm:$0xff]   ;;  %v1258_v23 = vld [vmem:[%s1632_s1 + $0x90] sm:$0xff]  }
   0x9   :  { %1124 = vmatpush3.bf16.msra.mxu1 %v1242_v7  ;;  %v1259_v24 = vld [vmem:[%s1632_s1 + $0x48] sm:$0xff]   ;;  %v1263_v28 = vld [vmem:[%s1632_s1 + $0x40] sm:$0xff]   ;;  %v1270_v34 = vld [vmem:[%s1632_s1 + $0x178] sm:$0xff]  }
   0xa   :  { %1125 = vmatprep.subr.bf16.mxu1 %v1245_v10  ;;  %v1260_v25 = vld [vmem:[%s1632_s1 + $0x8] sm:$0xff]   ;;  %v1264_v29 = vld [vmem:[%s1632_s1] sm:$0xff]   ;;  %v1274_v37 = vld [vmem:[%s1632_s1 + $0x138] sm:$0xff]  }
   0xb   :  { %1098 = vmatpush3.bf16.msra.mxu0 %v1244_v9  ;;  %v1261_v26 = vld [vmem:[%s1632_s1 + $0xc8] sm:$0xff]   ;;  %v1265_v30 = vld [vmem:[%s1632_s1 + $0xc0] sm:$0xff]   ;;  %v1275_v38 = vld [vmem:[%s1632_s1 + $0x1f8] sm:$0xff]  }
   0xc   :  { %1099 = vmatprep.subr.bf16.mxu0 %v1247_v12  ;;  %v1262_v27 = vld [vmem:[%s1632_s1 + $0x88] sm:$0xff]   ;;  %v1266_v31 = vld [vmem:[%s1633_s0] ss:$36 sps:$4 sm:$0xff]   ;;  %v1276_v39 = vld [vmem:[%s1632_s1 + $0x1b8] sm:$0xff]  }
   0xd   :  { %1126 = vmatpush3.bf16.msra.mxu1 %v1246_v11  ;;  %v1268_v32 = vld [vmem:[%s1633_s0 + $0x4] ss:$36 sps:$4 sm:$0xff]   ;;  %v1273_v36 = vld [vmem:[%s1633_s0 + $0xc] ss:$36 sps:$4 sm:$0xff]   ;;  %v1289_v52 = vld [vmem:[%s1632_s1 + $0x158] sm:$0xff]  }
   0xe   :  { %1127 = vmatprep.subr.bf16.mxu1 %v1249_v14  ;;  %v1269_v33 = vld [vmem:[%s1632_s1 + $0x80] sm:$0xff]   ;;  %742 = vmatprep.mubr.bf16.mxu0 %v1268_v32  ;;  %v1271_v35 = vld [vmem:[%s1633_s0 + $0x8] ss:$36 sps:$4 sm:$0xff]   ;;  %v1277_v40 = vld [vmem:[%s1632_s1 + $0x170] sm:$0xff]  }
   0xf   :  { %1100 = vmatpush3.bf16.msra.mxu0 %v1248_v13  ;;  %791 = vmatprep.mubr.bf16.mxu1 %v1273_v36  ;;  %v1278_v41 = vld [vmem:[%s1632_s1 + $0x130] sm:$0xff]   ;;  %v1281_v44 = vld [vmem:[%s1632_s1 + $0x168] sm:$0xff]   ;;  %v1285_v48 = vld [vmem:[%s1632_s1 + $0x160] sm:$0xff]  }
  0x10   :  { %1101 = vmatprep.subr.bf16.mxu0 %v1251_v16  ;;  %v1279_v42 = vld [vmem:[%s1632_s1 + $0x1f0] sm:$0xff]   ;;  %v1282_v45 = vld [vmem:[%s1632_s1 + $0x128] sm:$0xff]   ;;  %v1286_v49 = vld [vmem:[%s1632_s1 + $0x120] sm:$0xff]  }
  0x11   :  { %1128 = vmatpush3.bf16.msra.mxu1 %v1250_v15  ;;  %v1280_v43 = vld [vmem:[%s1632_s1 + $0x1b0] sm:$0xff]   ;;  %v1283_v46 = vld [vmem:[%s1632_s1 + $0x1e8] sm:$0xff]   ;;  %v1287_v50 = vld [vmem:[%s1632_s1 + $0x1e0] sm:$0xff]  }
  0x12   :  { %1129 = vmatprep.subr.bf16.mxu1 %v1253_v18  ;;  %v1284_v47 = vld [vmem:[%s1632_s1 + $0x1a8] sm:$0xff]   ;;  %v1288_v51 = vld [vmem:[%s1632_s1 + $0x1a0] sm:$0xff]   ;;  %v1290_v53 = vld [vmem:[%s1632_s1 + $0x118] sm:$0xff]  }
  0x13   :  { %1102 = vmatpush3.bf16.msra.mxu0 %v1252_v17  ;;  %v1291_v54 = vld [vmem:[%s1633_s0 + $0x4c] ss:$36 sps:$4 sm:$0xff]   ;;  %v1293_v55 = vld [vmem:[%s1632_s1 + $0x1d8] sm:$0xff]   ;;  %v1307_v4 = vld [vmem:[%s1632_s1 + $0x140] sm:$0xff]  }
  0x14   :  { %1103 = vmatprep.subr.bf16.mxu0 %v1255_v20  ;;  %v1294_v56 = vld [vmem:[%s1633_s0 + $0x48] ss:$36 sps:$4 sm:$0xff]   ;;  %v1295_v57 = vld [vmem:[%s1632_s1 + $0x198] sm:$0xff]   ;;  %v1298_v59 = vld [vmem:[%s1632_s1 + $0x150] sm:$0xff]  }
  0x15   :  { %1130 = vmatpush3.bf16.msra.mxu1 %v1254_v19  ;;  %v1296_v58 = vld [vmem:[%s1633_s0 + $0x54] ss:$36 sps:$4 sm:$0xff]   ;;  %v1303_v0 = vld [vmem:[%s1632_s1 + $0x148] sm:$0xff]   ;;  %v1308_v5 = vld [vmem:[%s1632_s1 + $0x100] sm:$0xff]  }
  0x16   :  { %1131 = vmatprep.subr.bf16.mxu1 %v1257_v22  ;;  %v1299_v60 = vld [vmem:[%s1633_s0 + $0x50] ss:$36 sps:$4 sm:$0xff]   ;;  %v1304_v1 = vld [vmem:[%s1632_s1 + $0x108] sm:$0xff]   ;;  %v1309_v6 = vld [vmem:[%s1632_s1 + $0x1c0] sm:$0xff]  }
  0x17   :  { %1104 = vmatpush3.bf16.msra.mxu0 %v1256_v21  ;;  %v1300_v61 = vld [vmem:[%s1632_s1 + $0x110] sm:$0xff]   ;;  %v1305_v2 = vld [vmem:[%s1632_s1 + $0x1c8] sm:$0xff]   ;;  %v1313_v9 = vld [vmem:[%s1632_s1 + $0x180] sm:$0xff]  }
  0x18   :  { %1105 = vmatprep.subr.bf16.mxu0 %v1259_v24  ;;  %v1301_v62 = vld [vmem:[%s1632_s1 + $0x1d0] sm:$0xff]   ;;  %v1306_v3 = vld [vmem:[%s1632_s1 + $0x188] sm:$0xff]   ;;  %v1314_v10 = vld [vmem:[%s1632_s1 + $0x238] sm:$0xff]  }
  0x19   :  { %1132 = vmatpush3.bf16.msra.mxu1 %v1258_v23  ;;  %v1302_v63 = vld [vmem:[%s1632_s1 + $0x190] sm:$0xff]   ;;  %v1315_v11 = vld [vmem:[%s1633_s0 + $0x18] ss:$36 sps:$4 sm:$0xff]   ;;  %v1322_v16 = vld [vmem:[%s1632_s1 + $0x228] sm:$0xff]  }
  0x1a   :  { %1133 = vmatprep.subr.bf16.mxu1 %v1261_v26  ;;  %v1310_v7 = vld [vmem:[%s1633_s0 + $0x10] ss:$36 sps:$4 sm:$0xff]   ;;  %v1317_v12 = vld [vmem:[%s1633_s0 + $0x1c] ss:$36 sps:$4 sm:$0xff]   ;;  %v1323_v17 = vld [vmem:[%s1633_s0 + $0x64] ss:$36 sps:$4 sm:$0xff]  }
  0x1b   :  { %1106 = vmatpush3.bf16.msra.mxu0 %v1260_v25  ;;  %v1312_v8 = vld [vmem:[%s1633_s0 + $0x14] ss:$36 sps:$4 sm:$0xff]   ;;  %v1319_v14 = vld [vmem:[%s1633_s0 + $0x5c] ss:$36 sps:$4 sm:$0xff]   ;;  %v1329_v23 = vld [vmem:[%s1632_s1 + $0x208] sm:$0xff]  }
  0x1c   :  { %1107 = vmatprep.subr.bf16.mxu0 %v1263_v28  ;;  %v1318_v13 = vld [vmem:[%s1632_s1 + $0x230] sm:$0xff]   ;;  %v1321_v15 = vld [vmem:[%s1633_s0 + $0x58] ss:$36 sps:$4 sm:$0xff]   ;;  %v1325_v18 = vld [vmem:[%s1633_s0 + $0x60] ss:$36 sps:$4 sm:$0xff]  }
  0x1d   :  { %1134 = vmatpush3.bf16.msra.mxu1 %v1262_v27  ;;  %v1326_v19 = vld [vmem:[%s1632_s1 + $0x220] sm:$0xff]   ;;  %v1327_v20 = vld [vmem:[%s1632_s1 + $0x218] sm:$0xff]   ;;  %v1328_v22 = vld [vmem:[%s1632_s1 + $0x210] sm:$0xff]  }
  0x1e   :  { %1135 = vmatprep.subr.bf16.mxu1 %v1265_v30  ;;  %v1331_v21 = vld [vmem:[%s1633_s0 + $0x20] ss:$36 sps:$4 sm:$0xff]   ;;  %v1332_v25 = vld [vmem:[%s1633_s0 + $0x68] ss:$36 sps:$4 sm:$0xff]  }
  0x1f   :  { %1108 = vmatpush3.bf16.msra.mxu0 %v1264_v29  ;;  %v1330_v24 = vld [vmem:[%s1632_s1 + $0x200] sm:$0xff]  }
  0x20   :  { %1149 = vmatprep.subr.bf16.mxu0 %v1270_v34 }
  0x21   :  { %1136 = vmatpush3.bf16.msra.mxu1 %v1269_v33 }
  0x22   :  { %743 = vmatmul.mubr.bf16.vlgmr.msra.gmra.mxu0 %v1266_v31  ;;  %1177 = vmatprep.subr.bf16.mxu1 %v1275_v38 }
  0x23   :  { %1150 = vmatpush3.bf16.msra.mxu0 %v1274_v37  ;;  %750 = vmatprep.mubr.bf16.mxu0 %v1291_v54 }
  0x24   :  { %792 = vmatmul.mubr.bf16.vlgmr.msra.gmra.mxu1 %v1271_v35  ;;  %1151 = vmatprep.subr.bf16.mxu0 %v1277_v40 }
  0x25   :  { %1178 = vmatpush3.bf16.msra.mxu1 %v1276_v39  ;;  %799 = vmatprep.mubr.bf16.mxu1 %v1296_v58 }
  0x26   :  { %1179 = vmatprep.subr.bf16.mxu1 %v1279_v42 }
  0x27   :  { %1152 = vmatpush3.bf16.msra.mxu0 %v1278_v41 }
  0x28   :  { %1153 = vmatprep.subr.bf16.mxu0 %v1281_v44 }
  0x29   :  { %1180 = vmatpush3.bf16.msra.mxu1 %v1280_v43 }
  0x2a   :  { %1181 = vmatprep.subr.bf16.mxu1 %v1283_v46  ;;  %751 = vmatmul.mubr.bf16.gmra.mxu0 %v1294_v56 }
  0x2b   :  { %1154 = vmatpush3.bf16.msra.mxu0 %v1282_v45  ;;  %840 = vmatprep.mubr.bf16.mxu0 %v1312_v8 }
  0x2c   :  { %1155 = vmatprep.subr.bf16.mxu0 %v1285_v48  ;;  %800 = vmatmul.mubr.bf16.gmra.mxu1 %v1299_v60 }
  0x2d   :  { %1182 = vmatpush3.bf16.msra.mxu1 %v1284_v47  ;;  %889 = vmatprep.mubr.bf16.mxu1 %v1317_v12 }
  0x2e   :  { %1183 = vmatprep.subr.bf16.mxu1 %v1287_v50 }
  0x2f   :  { %1156 = vmatpush3.bf16.msra.mxu0 %v1286_v49 }
  0x30   :  { %1157 = vmatprep.subr.bf16.mxu0 %v1289_v52 }
  0x31   :  { %1184 = vmatpush3.bf16.msra.mxu1 %v1288_v51 }
  0x32   :  { %1185 = vmatprep.subr.bf16.mxu1 %v1293_v55 }
  0x33   :  { %1158 = vmatpush3.bf16.msra.mxu0 %v1290_v53 }
  0x34   :  { %1159 = vmatprep.subr.bf16.mxu0 %v1298_v59 }
  0x35   :  { %1186 = vmatpush3.bf16.msra.mxu1 %v1295_v57  ;;  %v983_v57 = vld [vmem:[%s1634_s2] ss:$0 sm:$0xff] }
  0x36   :  { %1187 = vmatprep.subr.bf16.mxu1 %v1301_v62 }
  0x37   :  { %1160 = vmatpush3.bf16.msra.mxu0 %v1300_v61 }
  0x38   :  { %1161 = vmatprep.subr.bf16.mxu0 %v1303_v0 }
  0x39   :  { %1188 = vmatpush3.bf16.msra.mxu1 %v1302_v63 }
  0x3a   :  { %1189 = vmatprep.subr.bf16.mxu1 %v1305_v2 }
  0x3b   :  { %1162 = vmatpush3.bf16.msra.mxu0 %v1304_v1 }
  0x3c   :  { %1163 = vmatprep.subr.bf16.mxu0 %v1307_v4 }
  0x3d   :  { %1190 = vmatpush3.bf16.msra.mxu1 %v1306_v3 }
  0x3e   :  { %1191 = vmatprep.subr.bf16.mxu1 %v1309_v6 }
  0x3f   :  { %1164 = vmatpush3.bf16.msra.mxu0 %v1308_v5 }
  0x40   :  { %1215 = vmatprep.subr.bf16.mxu0 %v1314_v10 }
  0x41   :  { %1192 = vmatpush3.bf16.msra.mxu1 %v1313_v9 }
  0x42   :  { %841 = vmatmul.mubr.bf16.vlgmr.msra.gmra.mxu0 %v1310_v7 }
  0x43   :  { %1216 = vmatpush3.bf16.msra.mxu0 %v1314_v10  ;;  %848 = vmatprep.mubr.bf16.mxu0 %v1319_v14 }
  0x44   :  { %890 = vmatmul.mubr.bf16.vlgmr.msra.gmra.mxu1 %v1315_v11  ;;  %1217 = vmatprep.subr.bf16.mxu0 %v1318_v13 }
  0x45   :  { %897 = vmatprep.mubr.bf16.mxu1 %v1323_v17 }
  0x47   :  { %1218 = vmatpush3.bf16.msra.mxu0 %v1318_v13 }
  0x48   :  { %1219 = vmatprep.subr.bf16.mxu0 %v1322_v16 }
  0x4a   :  { %849 = vmatmul.mubr.bf16.gmra.mxu0 %v1321_v15 }
  0x4b   :  { %1220 = vmatpush3.bf16.msra.mxu0 %v1322_v16  ;;  %1231 = vmatprep.mubr.bf16.mxu0 %v1331_v21 }
  0x4c   :  { %898 = vmatmul.mubr.bf16.gmra.mxu1 %v1325_v18  ;;  %1221 = vmatprep.subr.bf16.mxu0 %v1326_v19 }
  0x4f   :  { %1222 = vmatpush3.bf16.msra.mxu0 %v1326_v19 }
  0x50   :  { %1223 = vmatprep.subr.bf16.mxu0 %v1327_v20 }
  0x53   :  { %1224 = vmatpush3.bf16.msra.mxu0 %v1327_v20 }
  0x54   :  { %1225 = vmatprep.subr.bf16.mxu0 %v1328_v22 }
  0x57   :  { %1226 = vmatpush3.bf16.msra.mxu0 %v1328_v22 }
  0x58   :  { %1227 = vmatprep.subr.bf16.mxu0 %v1329_v23 }
  0x5b   :  { %1228 = vmatpush3.bf16.msra.mxu0 %v1329_v23 }
  0x5c   :  { %1229 = vmatprep.subr.bf16.mxu0 %v1330_v24 }
  0x5f   :  { %1230 = vmatpush3.bf16.msra.mxu0 %v1330_v24 }
  0x62   :  { %1232 = vmatmul.mubr.bf16.vlgmr.msra.gmra.mxu0 %v1332_v25 }
  0xe2   :  { %v1109_v26 = vpop.f32.mrf.mxu0 }
  0xe4   :  { %v1137_v27 = vpop.f32.mrf.mxu1  ;;  %v1110_v28 = vpop.f32.mrf.mxu0 }
  0xe5   :  { %v1111_v54 = vadd.f32 %v1110_v28, %v1109_v26 }
  0xe6   :  { %v1138_v29 = vpop.f32.mrf.mxu1  ;;  %v1112_v30 = vpop.f32.mrf.mxu0 }
  0xe7   :  { %v745_v62 = vadd.f32 %v1111_v54, %v983_v57  ;;  %v1139_v63 = vadd.f32 %v1138_v29, %v1137_v27 }
  0xe8   :  { %v1140_v31 = vpop.f32.mrf.mxu1  ;;  %v1113_v32 = vpop.f32.mrf.mxu0 }
  0xe9   :  { %v1114_v59 = vadd.f32 %v1113_v32, %v1112_v30  ;;  %v794_v10 = vadd.f32 %v1139_v63, %v745_v62 }
  0xea   :  { %v1115_v33 = vpop.f32.mrf.mxu0  ;;  %v1141_v34 = vpop.f32.mrf.mxu1 }
  0xeb   :  { %v748_v5 = vadd.f32 %v1114_v59, %v983_v57  ;;  %v1142_v6 = vadd.f32 %v1141_v34, %v1140_v31 }
  0xec   :  { %v1143_v35 = vpop.f32.mrf.mxu1  ;;  %v1116_v36 = vpop.f32.mrf.mxu0 }
  0xed   :  { %v1117_v53 = vadd.f32 %v1116_v36, %v1115_v33  ;;  %v797_v16 = vadd.f32 %v1142_v6, %v748_v5 }
  0xee   :  { %v1144_v37 = vpop.f32.mrf.mxu1  ;;  %v1118_v38 = vpop.f32.mrf.mxu0 }
  0xef   :  { %v753_v60 = vadd.f32 %v1117_v53, %v983_v57  ;;  %v1145_v61 = vadd.f32 %v1144_v37, %v1143_v35 }
  0xf0   :  { %v1146_v39 = vpop.f32.mrf.mxu1  ;;  %v1119_v40 = vpop.f32.mrf.mxu0 }
  0xf1   :  { %v1120_v58 = vadd.f32 %v1119_v40, %v1118_v38  ;;  %v802_v7 = vadd.f32 %v1145_v61, %v753_v60 }
  0xf2   :  { %v1147_v42 = vpop.f32.mrf.mxu1 }
  0xf3   :  { %v756_v2 = vadd.f32 %v1120_v58, %v983_v57  ;;  %v1148_v3 = vadd.f32 %v1147_v42, %v1146_v39 }
  0xf5   :  { %v805_v12 = vadd.f32 %v1148_v3, %v756_v2 }
 0x102   :  { %v1165_v41 = vpop.f32.mrf.mxu0 }
 0x104   :  { %v1166_v43 = vpop.f32.mrf.mxu0  ;;  %v1193_v44 = vpop.f32.mrf.mxu1 }
 0x105   :  { %v1167_v8 = vadd.f32 %v1166_v43, %v1165_v41 }
 0x106   :  { %v1168_v45 = vpop.f32.mrf.mxu0  ;;  %v1194_v46 = vpop.f32.mrf.mxu1 }
 0x107   :  { %v843_v17 = vadd.f32 %v1167_v8, %v794_v10  ;;  %v1195_v18 = vadd.f32 %v1194_v46, %v1193_v44 }
 0x108   :  { %v1169_v47 = vpop.f32.mrf.mxu0  ;;  %v1196_v48 = vpop.f32.mrf.mxu1 }
 0x109   :  { %v1170_v13 = vadd.f32 %v1169_v47, %v1168_v45  ;;  %v892_v27 = vadd.f32 %v1195_v18, %v843_v17 }
 0x10a   :  { %v1171_v49 = vpop.f32.mrf.mxu0  ;;  %v1197_v50 = vpop.f32.mrf.mxu1 }
 0x10b   :  { %v846_v22 = vadd.f32 %v1170_v13, %v797_v16  ;;  %v1198_v23 = vadd.f32 %v1197_v50, %v1196_v48 }
 0x10c   :  { %v1172_v51 = vpop.f32.mrf.mxu0  ;;  %v1199_v52 = vpop.f32.mrf.mxu1 }
 0x10d   :  { %v1173_v4 = vadd.f32 %v1172_v51, %v1171_v49  ;;  %v895_v32 = vadd.f32 %v1198_v23, %v846_v22 }
 0x10e   :  { %v1174_v55 = vpop.f32.mrf.mxu0  ;;  %v1200_v56 = vpop.f32.mrf.mxu1 }
 0x10f   :  { %v851_v14 = vadd.f32 %v1173_v4, %v802_v7  ;;  %v1201_v15 = vadd.f32 %v1200_v56, %v1199_v52 }
 0x110   :  { %v1175_v0 = vpop.f32.mrf.mxu0  ;;  %v1202_v1 = vpop.f32.mrf.mxu1 }
 0x111   :  { %v1176_v9 = vadd.f32 %v1175_v0, %v1174_v55  ;;  %v900_v24 = vadd.f32 %v1201_v15, %v851_v14 }
 0x112   :  { %v1203_v11 = vpop.f32.mrf.mxu1 }
 0x113   :  { %v854_v19 = vadd.f32 %v1176_v9, %v805_v12  ;;  %v1204_v20 = vadd.f32 %v1203_v11, %v1202_v1 }
 0x115   :  { %v903_v28 = vadd.f32 %v1204_v20, %v854_v19 }
 0x122   :  { %v1233_v21 = vpop.f32.mrf.mxu0 }
 0x123   :  { %v949_v26 = vadd.f32 %v1233_v21, %v900_v24 }
 0x124   :  { %v940_v25 = vpop.f32.mrf.mxu0 }
 0x125   :  { %v941_v30 = vadd.f32 %v940_v25, %v892_v27  ;;  %v957_v34 = vmax.f32 %v949_v26, 0.0 }
 0x126   :  { %v1234_v29 = vpop.f32.mrf.mxu0 }
 0x127   :  { %v952_v31 = vadd.f32 %v1234_v29, %v903_v28  ;;  %v955_v37 = vmax.f32 %v941_v30, 0.0 }
 0x128   :  { %v943_v33 = vpop.f32.mrf.mxu0 }
 0x129   :  { %v958_v35 = vmax.f32 %v952_v31, 0.0  ;;  %v944_v36 = vadd.f32 %v943_v33, %v895_v32 }
 0x12b   :  { %v1090_v38 = vpack.c.bf16 %v958_v35, %v957_v34  ;;  %v956_v39 = vmax.f32 %v944_v36, 0.0 }
 0x12d   :  { %1092 = vst [vmem:[%s1635_s3 + $0x8] sm:$0xff] %v1090_v38   ;;  %v1085_v40 = vpack.c.bf16 %v956_v39, %v955_v37 }
 0x12f   :  { %1086 = vst [vmem:[%s1635_s3] sm:$0xff] %v1085_v40  }

// kernel: vae_forward.18
= control target key start
LH: loop header
LB: loop body
LE: loop exit
PB: predicated region body
PF: predicated region fallthrough
CT: control target
= control target key end

     0   :  { %s1280_s12 = smov 0   ;;  %s1448_s0 = inlined_call_operand.vmem [shape: bf16[128,640], index: 0, kind: input, shape index: {}]   ;;  %s1449_s1 = inlined_call_operand.vmem [shape: bf16[640,128], index: 1, kind: input, shape index: {}]   ;;  %s1450_s2 = inlined_call_operand.vmem [shape: f32[1,128], index: 2, kind: input, shape index: {}]   ;;  %s1451_s3 = inlined_call_operand.vmem [shape: bf16[128,128], index: 3, kind: output, shape index: {}]  }
   0x1 LB: > { %s932_s13 = sadd.s32 4294967295, %s1258_s12   ;;  %p936_p0 = scmp.ge.s32.totalorder %s1258_s12, 1  ;;  %s1258_s12 = sphi %s1280_s12, %s13_s12  }
   0x2   : > { %p139_p1 = scmp.lt.s32.totalorder %s1258_s12, 3 }
   0x4   : > { %p140_p2 = pnand %p936_p0, %p139_p1 }
   0x5   : > { %s937_s19 = sshll.u32 (!%p140_p2), %s932_s13, 3 }
   0x6   : > { %143 = sbr.rel (%p140_p2) target bundleno = 285 (0x11d), region = 32  ;;  %p165_p3 = scmp.lt.s32.totalorder (!%p140_p2), %s937_s19, 15 }
   0xb   : > { %v1184_v0 = vld [vmem:[%s1449_s1 + $0x78] sm:$0xff]   ;;  %v1188_v4 = vld [vmem:[%s1449_s1 + $0x70] sm:$0xff]   ;;  %v1192_v8 = vld [vmem:[%s1449_s1 + $0x68] sm:$0xff]   ;;  %s1453_s19 = smov (!%p165_p3, %s937_s19), 15 }
   0xc   : > { %v1185_v1 = vld [vmem:[%s1449_s1 + $0xf8] sm:$0xff]   ;;  %1043 = vmatprep.subr.bf16.mxu0 %v1184_v0  ;;  %v1189_v5 = vld [vmem:[%s1449_s1 + $0xf0] sm:$0xff]   ;;  %v1193_v9 = vld [vmem:[%s1449_s1 + $0xe8] sm:$0xff]   ;;  %s1175_s16 = smul.u32 20, %s1453_s19  ;;  %s940_s26 = sshll.u32 %s1453_s19, 2 }
   0xd   : > { %v1186_v2 = vld [vmem:[%s1449_s1 + $0x38] sm:$0xff]   ;;  %1083 = vmatprep.subr.bf16.mxu1 %v1185_v1  ;;  %v1190_v6 = vld [vmem:[%s1449_s1 + $0x30] sm:$0xff]   ;;  %v1194_v10 = vld [vmem:[%s1449_s1 + $0x28] sm:$0xff]   ;;  %s175_s28 = scalar_lea.vmem %s1451_s3, %s940_s26 }
   0xe   : > { %v1187_v3 = vld [vmem:[%s1449_s1 + $0xb8] sm:$0xff]   ;;  %1044 = vmatpush3.bf16.msra.mxu0 %v1186_v2  ;;  %v1191_v7 = vld [vmem:[%s1449_s1 + $0xb0] sm:$0xff]   ;;  %v1195_v11 = vld [vmem:[%s1449_s1 + $0xa8] sm:$0xff]   ;;  %s1386_s13 = scalar_lea.vmem %s1448_s0, %s1175_s16 }
   0xf   : > { %1084 = vmatpush3.bf16.msra.mxu1 %v1187_v3  ;;  %1045 = vmatprep.subr.bf16.mxu0 %v1188_v4  ;;  %v1196_v12 = vld [vmem:[%s1449_s1 + $0x60] sm:$0xff]   ;;  %v1200_v16 = vld [vmem:[%s1449_s1 + $0x58] sm:$0xff]   ;;  %v1204_v20 = vld [vmem:[%s1449_s1 + $0x50] sm:$0xff]  }
  0x10   : > { %1085 = vmatprep.subr.bf16.mxu1 %v1189_v5  ;;  %v1197_v13 = vld [vmem:[%s1449_s1 + $0xe0] sm:$0xff]   ;;  %v1201_v17 = vld [vmem:[%s1449_s1 + $0xd8] sm:$0xff]   ;;  %v1205_v21 = vld [vmem:[%s1449_s1 + $0xd0] sm:$0xff]  }
  0x11   : > { %v1198_v14 = vld [vmem:[%s1449_s1 + $0x20] sm:$0xff]   ;;  %v1202_v18 = vld [vmem:[%s1449_s1 + $0x18] sm:$0xff]   ;;  %v1206_v22 = vld [vmem:[%s1449_s1 + $0x10] sm:$0xff]  }
  0x12   : > { %1046 = vmatpush3.bf16.msra.mxu0 %v1190_v6  ;;  %v1199_v15 = vld [vmem:[%s1449_s1 + $0xa0] sm:$0xff]   ;;  %v1203_v19 = vld [vmem:[%s1449_s1 + $0x98] sm:$0xff]   ;;  %v1207_v23 = vld [vmem:[%s1449_s1 + $0x90] sm:$0xff]  }
  0x13   : > { %1086 = vmatpush3.bf16.msra.mxu1 %v1191_v7  ;;  %1047 = vmatprep.subr.bf16.mxu0 %v1192_v8  ;;  %v1208_v24 = vld [vmem:[%s1449_s1 + $0x48] sm:$0xff]   ;;  %v1212_v28 = vld [vmem:[%s1449_s1 + $0x40] sm:$0xff]   ;;  %v1222_v36 = vld [vmem:[%s1449_s1 + $0x138] sm:$0xff]  }
  0x14   : > { %1087 = vmatprep.subr.bf16.mxu1 %v1193_v9  ;;  %v1209_v25 = vld [vmem:[%s1449_s1 + $0xc8] sm:$0xff]   ;;  %v1213_v29 = vld [vmem:[%s1449_s1 + $0xc0] sm:$0xff]   ;;  %v1223_v37 = vld [vmem:[%s1449_s1 + $0x130] sm:$0xff]  }
  0x15   : > { %v1210_v26 = vld [vmem:[%s1449_s1 + $0x8] sm:$0xff]   ;;  %v1214_v30 = vld [vmem:[%s1449_s1] sm:$0xff]   ;;  %v1234_v45 = vld [vmem:[%s1386_s13 + $0x5c] ss:$20 sps:$4 sm:$0xff]  }
  0x16   : > { %1048 = vmatpush3.bf16.msra.mxu0 %v1194_v10  ;;  %v1211_v27 = vld [vmem:[%s1449_s1 + $0x88] sm:$0xff]   ;;  %v1215_v31 = vld [vmem:[%s1449_s1 + $0x80] sm:$0xff]   ;;  %v1238_v46 = vld [vmem:[%s1449_s1 + $0x118] sm:$0xff]  }
  0x17   : > { %1088 = vmatpush3.bf16.msra.mxu1 %v1195_v11  ;;  %1049 = vmatprep.subr.bf16.mxu0 %v1196_v12  ;;  %v1216_v32 = vld [vmem:[%s1386_s13] ss:$20 sps:$4 sm:$0xff]   ;;  %v1218_v33 = vld [vmem:[%s1386_s13 + $0x4] ss:$20 sps:$4 sm:$0xff]   ;;  %v1219_v34 = vld [vmem:[%s1386_s13 + $0x8] ss:$20 sps:$4 sm:$0xff]  }
  0x18   : > { %1089 = vmatprep.subr.bf16.mxu1 %v1197_v13  ;;  %v1221_v35 = vld [vmem:[%s1386_s13 + $0xc] ss:$20 sps:$4 sm:$0xff]   ;;  %665 = vmatprep.mubr.bf16.mxu0 %v1218_v33  ;;  %v1226_v39 = vld [vmem:[%s1386_s13 + $0x34] ss:$20 sps:$4 sm:$0xff]   ;;  %v1229_v42 = vld [vmem:[%s1386_s13 + $0x30] ss:$20 sps:$4 sm:$0xff]  }
  0x19   : > { %730 = vmatprep.mubr.bf16.mxu1 %v1221_v35  ;;  %v1224_v38 = vld [vmem:[%s1386_s13 + $0x2c] ss:$20 sps:$4 sm:$0xff]   ;;  %v1228_v40 = vld [vmem:[%s1386_s13 + $0x28] ss:$20 sps:$4 sm:$0xff]   ;;  %v1236_v47 = vld [vmem:[%s1386_s13 + $0x50] ss:$20 sps:$4 sm:$0xff]  }
  0x1a   : > { %1050 = vmatpush3.bf16.msra.mxu0 %v1198_v14  ;;  %v1230_v41 = vld [vmem:[%s1449_s1 + $0x128] sm:$0xff]   ;;  %v1231_v44 = vld [vmem:[%s1449_s1 + $0x120] sm:$0xff]   ;;  %v1240_v49 = vld [vmem:[%s1386_s13 + $0x7c] ss:$20 sps:$4 sm:$0xff]  }
  0x1b   : > { %1090 = vmatpush3.bf16.msra.mxu1 %v1199_v15  ;;  %1051 = vmatprep.subr.bf16.mxu0 %v1200_v16  ;;  %v1232_v43 = vld [vmem:[%s1386_s13 + $0x54] ss:$20 sps:$4 sm:$0xff]   ;;  %v1237_v48 = vld [vmem:[%s1386_s13 + $0x58] ss:$20 sps:$4 sm:$0xff]   ;;  %v1248_v55 = vld [vmem:[%s1386_s13 + $0x10] ss:$20 sps:$4 sm:$0xff]  }
  0x1c   : > { %1091 = vmatprep.subr.bf16.mxu1 %v1201_v17  ;;  %v1242_v50 = vld [vmem:[%s1386_s13 + $0x84] ss:$20 sps:$4 sm:$0xff]   ;;  %v1239_v51 = vld [vmem:[%s1449_s1 + $0x110] sm:$0xff]   ;;  %v1246_v52 = vld [vmem:[%s1449_s1 + $0x108] sm:$0xff]  }
  0x1d   : > { %v1244_v53 = vld [vmem:[%s1386_s13 + $0x78] ss:$20 sps:$4 sm:$0xff]   ;;  %v1245_v54 = vld [vmem:[%s1386_s13 + $0x80] ss:$20 sps:$4 sm:$0xff]   ;;  %v1251_v59 = vld [vmem:[%s1386_s13 + $0x88] ss:$20 sps:$4 sm:$0xff]  }
  0x1e   : > { %1052 = vmatpush3.bf16.msra.mxu0 %v1202_v18  ;;  %v1249_v56 = vld [vmem:[%s1386_s13 + $0x60] ss:$20 sps:$4 sm:$0xff]   ;;  %v1250_v58 = vld [vmem:[%s1386_s13 + $0x38] ss:$20 sps:$4 sm:$0xff]  }
  0x1f   : > { %1092 = vmatpush3.bf16.msra.mxu1 %v1203_v19  ;;  %1053 = vmatprep.subr.bf16.mxu0 %v1204_v20  ;;  %v1247_v57 = vld [vmem:[%s1449_s1 + $0x100] sm:$0xff]  }
  0x20   : > { %1093 = vmatprep.subr.bf16.mxu1 %v1205_v21 }
  0x22   : > { %1054 = vmatpush3.bf16.msra.mxu0 %v1206_v22 }
  0x23   : > { %1094 = vmatpush3.bf16.msra.mxu1 %v1207_v23  ;;  %1055 = vmatprep.subr.bf16.mxu0 %v1208_v24 }
  0x24   : > { %1095 = vmatprep.subr.bf16.mxu1 %v1209_v25 }
  0x26   : > { %1056 = vmatpush3.bf16.msra.mxu0 %v1210_v26  ;;  %v941_v26 = vld [vmem:[%s1450_s2] ss:$0 sm:$0xff] }
  0x27   : > { %1096 = vmatpush3.bf16.msra.mxu1 %v1211_v27  ;;  %1057 = vmatprep.subr.bf16.mxu0 %v1212_v28 }
  0x28   : > { %1097 = vmatprep.subr.bf16.mxu1 %v1213_v29 }
  0x2a   : > { %1058 = vmatpush3.bf16.msra.mxu0 %v1214_v30 }
  0x2b   : > { %1098 = vmatpush3.bf16.msra.mxu1 %v1215_v31  ;;  %1135 = vmatprep.subr.bf16.mxu0 %v1222_v36 }
  0x2c   : > { %1159 = vmatprep.subr.bf16.mxu1 %v1222_v36 }
  0x2d   : > { %666 = vmatmul.mubr.bf16.vlgmr.msra.gmra.mxu0 %v1216_v32 }
  0x2e   : > { %731 = vmatmul.mubr.bf16.vlgmr.msra.gmra.mxu1 %v1219_v34  ;;  %1136 = vmatpush3.bf16.msra.mxu0 %v1222_v36 }
  0x2f   : > { %1167 = vmatpush3.bf16.msra.mxu1 %v1222_v36  ;;  %1137 = vmatprep.subr.bf16.mxu0 %v1223_v37 }
  0x30   : > { %1160 = vmatprep.subr.bf16.mxu1 %v1223_v37  ;;  %673 = vmatprep.mubr.bf16.mxu0 %v1224_v38 }
  0x31   : > { %738 = vmatprep.mubr.bf16.mxu1 %v1226_v39 }
  0x32   : > { %1138 = vmatpush3.bf16.msra.mxu0 %v1223_v37 }
  0x33   : > { %1168 = vmatpush3.bf16.msra.mxu1 %v1223_v37  ;;  %1139 = vmatprep.subr.bf16.mxu0 %v1230_v41 }
  0x34   : > { %1161 = vmatprep.subr.bf16.mxu1 %v1230_v41 }
  0x35   : > { %674 = vmatmul.mubr.bf16.gmra.mxu0 %v1228_v40 }
  0x36   : > { %739 = vmatmul.mubr.bf16.gmra.mxu1 %v1229_v42  ;;  %681 = vmatprep.mubr.bf16.mxu0 %v1232_v43 }
  0x37   : > { %1140 = vmatpush3.bf16.msra.mxu0 %v1230_v41  ;;  %746 = vmatprep.mubr.bf16.mxu1 %v1234_v45 }
  0x38   : > { %1169 = vmatpush3.bf16.msra.mxu1 %v1230_v41  ;;  %1141 = vmatprep.subr.bf16.mxu0 %v1231_v44 }
  0x39   : > { %1162 = vmatprep.subr.bf16.mxu1 %v1231_v44 }
  0x3b   : > { %1142 = vmatpush3.bf16.msra.mxu0 %v1231_v44 }
  0x3c   : > { %1170 = vmatpush3.bf16.msra.mxu1 %v1231_v44  ;;  %1143 = vmatprep.subr.bf16.mxu0 %v1238_v46 }
  0x3d   : > { %682 = vmatmul.mubr.bf16.gmra.mxu0 %v1236_v47  ;;  %1163 = vmatprep.subr.bf16.mxu1 %v1238_v46 }
  0x3e   : > { %747 = vmatmul.mubr.bf16.gmra.mxu1 %v1237_v48  ;;  %689 = vmatprep.mubr.bf16.mxu0 %v1240_v49 }
  0x3f   : > { %1144 = vmatpush3.bf16.msra.mxu0 %v1238_v46  ;;  %754 = vmatprep.mubr.bf16.mxu1 %v1242_v50 }
  0x40   : > { %1171 = vmatpush3.bf16.msra.mxu1 %v1238_v46  ;;  %1145 = vmatprep.subr.bf16.mxu0 %v1239_v51 }
  0x41   : > { %1164 = vmatprep.subr.bf16.mxu1 %v1239_v51 }
  0x43   : > { %1146 = vmatpush3.bf16.msra.mxu0 %v1239_v51 }
  0x44   : > { %1172 = vmatpush3.bf16.msra.mxu1 %v1239_v51  ;;  %1147 = vmatprep.subr.bf16.mxu0 %v1246_v52 }
  0x45   : > { %690 = vmatmul.mubr.bf16.gmra.mxu0 %v1244_v53  ;;  %1165 = vmatprep.subr.bf16.mxu1 %v1246_v52 }
  0x46   : > { %755 = vmatmul.mubr.bf16.gmra.mxu1 %v1245_v54  ;;  %1151 = vmatprep.mubr.bf16.mxu0 %v1248_v55 }
  0x47   : > { %1148 = vmatpush3.bf16.msra.mxu0 %v1246_v52  ;;  %1155 = vmatprep.mubr.bf16.mxu1 %v1249_v56 }
  0x48   : > { %1173 = vmatpush3.bf16.msra.mxu1 %v1246_v52  ;;  %1149 = vmatprep.subr.bf16.mxu0 %v1247_v57 }
  0x49   : > { %1166 = vmatprep.subr.bf16.mxu1 %v1247_v57 }
  0x4b   : > { %1150 = vmatpush3.bf16.msra.mxu0 %v1247_v57 }
  0x4c   : > { %1174 = vmatpush3.bf16.msra.mxu1 %v1247_v57 }
  0x4e   : > { %1152 = vmatmul.mubr.bf16.vlgmr.msra.gmra.mxu0 %v1250_v58 }
  0x4f   : > { %1156 = vmatmul.mubr.bf16.vlgmr.msra.gmra.mxu1 %v1251_v59 }
  0xed   : > { %v1059_v60 = vpop.f32.mrf.mxu0 }
  0xee   : > { %v1099_v61 = vpop.f32.mrf.mxu1 }
  0xef   : > { %v1060_v62 = vpop.f32.mrf.mxu0 }
  0xf0   : > { %v1100_v63 = vpop.f32.mrf.mxu1  ;;  %v1061_v27 = vadd.f32 %v1060_v62, %v1059_v60 }
  0xf1   : > { %v1062_v0 = vpop.f32.mrf.mxu0  ;;  %v1101_v48 = vadd.f32 %v1100_v63, %v1099_v61 }
  0xf2   : > { %v1102_v1 = vpop.f32.mrf.mxu1  ;;  %v668_v40 = vadd.f32 %v1061_v27, %v941_v26 }
  0xf3   : > { %v1063_v2 = vpop.f32.mrf.mxu0 }
  0xf4   : > { %v1103_v3 = vpop.f32.mrf.mxu1  ;;  %v1064_v33 = vadd.f32 %v1063_v2, %v1062_v0  ;;  %v733_v59 = vadd.f32 %v1101_v48, %v668_v40 }
  0xf5   : > { %v1065_v4 = vpop.f32.mrf.mxu0  ;;  %v1104_v57 = vadd.f32 %v1103_v3, %v1102_v1 }
  0xf6   : > { %v1105_v5 = vpop.f32.mrf.mxu1  ;;  %v671_v49 = vadd.f32 %v1064_v33, %v941_v26 }
  0xf7   : > { %v1066_v6 = vpop.f32.mrf.mxu0 }
  0xf8   : > { %v1106_v7 = vpop.f32.mrf.mxu1  ;;  %v1067_v22 = vadd.f32 %v1066_v6, %v1065_v4 }
  0xf9   : > { %v1068_v8 = vpop.f32.mrf.mxu0  ;;  %v1107_v41 = vadd.f32 %v1106_v7, %v1105_v5  ;;  %v736_v7 = vadd.f32 %v1104_v57, %v671_v49 }
  0xfa   : > { %v1108_v9 = vpop.f32.mrf.mxu1  ;;  %v676_v34 = vadd.f32 %v1067_v22, %v941_v26 }
  0xfb   : > { %v1069_v10 = vpop.f32.mrf.mxu0 }
  0xfc   : > { %v1109_v11 = vpop.f32.mrf.mxu1  ;;  %v1070_v28 = vadd.f32 %v1069_v10, %v1068_v8  ;;  %v741_v51 = vadd.f32 %v1107_v41, %v676_v34 }
  0xfd   : > { %v1071_v12 = vpop.f32.mrf.mxu0  ;;  %v1110_v50 = vadd.f32 %v1109_v11, %v1108_v9 }
  0xfe   : > { %v1111_v13 = vpop.f32.mrf.mxu1  ;;  %v679_v42 = vadd.f32 %v1070_v28, %v941_v26 }
  0xff   : > { %v1072_v14 = vpop.f32.mrf.mxu0 }
 0x100   : > { %v1112_v15 = vpop.f32.mrf.mxu1  ;;  %v1073_v30 = vadd.f32 %v1072_v14, %v1071_v12  ;;  %v744_v62 = vadd.f32 %v1110_v50, %v679_v42 }
 0x101   : > { %v1074_v16 = vpop.f32.mrf.mxu0  ;;  %v1113_v53 = vadd.f32 %v1112_v15, %v1111_v13 }
 0x102   : > { %v1114_v17 = vpop.f32.mrf.mxu1  ;;  %v684_v43 = vadd.f32 %v1073_v30, %v941_v26 }
 0x103   : > { %v1075_v18 = vpop.f32.mrf.mxu0 }
 0x104   : > { %v1115_v19 = vpop.f32.mrf.mxu1  ;;  %v1076_v36 = vadd.f32 %v1075_v18, %v1074_v16  ;;  %v749_v4 = vadd.f32 %v1113_v53, %v684_v43 }
 0x105   : > { %v1077_v20 = vpop.f32.mrf.mxu0  ;;  %v1116_v0 = vadd.f32 %v1115_v19, %v1114_v17 }
 0x106   : > { %v1117_v21 = vpop.f32.mrf.mxu1  ;;  %v687_v54 = vadd.f32 %v1076_v36, %v941_v26 }
 0x107   : > { %v1078_v23 = vpop.f32.mrf.mxu0 }
 0x108   : > { %v1079_v24 = vadd.f32 %v1078_v23, %v1077_v20  ;;  %v1118_v25 = vpop.f32.mrf.mxu1  ;;  %v752_v11 = vadd.f32 %v1116_v0, %v687_v54 }
 0x109   : > { %v1080_v29 = vpop.f32.mrf.mxu0  ;;  %v1119_v37 = vadd.f32 %v1118_v25, %v1117_v21 }
 0x10a   : > { %v692_v31 = vadd.f32 %v1079_v24, %v941_v26  ;;  %v1120_v32 = vpop.f32.mrf.mxu1 }
 0x10b   : > { %v1081_v35 = vpop.f32.mrf.mxu0 }
 0x10c   : > { %v1082_v38 = vadd.f32 %v1081_v35, %v1080_v29  ;;  %v1121_v39 = vpop.f32.mrf.mxu1  ;;  %v757_v47 = vadd.f32 %v1119_v37, %v692_v31 }
 0x10d   : > { %v1122_v45 = vadd.f32 %v1121_v39, %v1120_v32 }
 0x10e   : > { %v695_v44 = vadd.f32 %v1082_v38, %v941_v26  ;;  %v1153_v46 = vpop.f32.mrf.mxu0 }
 0x10f   : > { %v1157_v52 = vpop.f32.mrf.mxu1  ;;  %v806_v58 = vadd.f32 %v1153_v46, %v741_v51 }
 0x110   : > { %v797_v55 = vpop.f32.mrf.mxu0  ;;  %v760_v56 = vadd.f32 %v1122_v45, %v695_v44  ;;  %v822_v2 = vadd.f32 %v1157_v52, %v757_v47 }
 0x111   : > { %v813_v60 = vpop.f32.mrf.mxu1  ;;  %v798_v6 = vadd.f32 %v797_v55, %v733_v59  ;;  %v830_v12 = vmax.f32 %v806_v58, 0.0 }
 0x112   : > { %v1154_v5 = vpop.f32.mrf.mxu0  ;;  %v814_v8 = vadd.f32 %v813_v60, %v749_v4  ;;  %v834_v14 = vmax.f32 %v822_v2, 0.0 }
 0x113   : > { %v809_v61 = vadd.f32 %v1154_v5, %v744_v62  ;;  %v1158_v63 = vpop.f32.mrf.mxu1  ;;  %v828_v17 = vmax.f32 %v798_v6, 0.0 }
 0x114   : > { %v825_v9 = vadd.f32 %v1158_v63, %v760_v56  ;;  %v800_v10 = vpop.f32.mrf.mxu0  ;;  %v832_v20 = vmax.f32 %v814_v8, 0.0 }
 0x115   : > { %v831_v13 = vmax.f32 %v809_v61, 0.0  ;;  %v801_v1 = vadd.f32 %v800_v10, %v736_v7  ;;  %v816_v3 = vpop.f32.mrf.mxu1 }
 0x116   : > { %v835_v15 = vmax.f32 %v825_v9, 0.0  ;;  %v817_v16 = vadd.f32 %v816_v3, %v752_v11 }
 0x117   : > { %v1028_v18 = vpack.c.bf16 %v831_v13, %v830_v12  ;;  %v829_v19 = vmax.f32 %v801_v1, 0.0 }
 0x118   : > { %v1038_v21 = vpack.c.bf16 %v835_v15, %v834_v14  ;;  %v833_v22 = vmax.f32 %v817_v16, 0.0 }
 0x119   : > { %1040 = vst [vmem:[%s175_s28 + $0x8] sm:$0xff] %v1028_v18   ;;  %v1023_v23 = vpack.c.bf16 %v829_v19, %v828_v17 }
 0x11a   : > { %1042 = vst [vmem:[%s175_s28 + $0x18] sm:$0xff] %v1038_v21   ;;  %v1033_v24 = vpack.c.bf16 %v833_v22, %v832_v20 }
 0x11b   : > { %1024 = vst [vmem:[%s175_s28] sm:$0xff] %v1023_v23  }
 0x11c   : > { %1041 = vst [vmem:[%s175_s28 + $0x10] sm:$0xff] %v1033_v24  }
 0x11d PF: > { %s13_s12 = sadd.s32 1, %s1258_s12  }
 0x11e   : > { %p10_p4 = scmp.ge.s32.totalorder %s13_s12, 4  }
 0x120   :  { %12 = sbr.rel (!%p10_p4) target bundleno = 1 (0x1), region = 62 }

// kernel: vae_forward.19
= control target key start
LH: loop header
LB: loop body
LE: loop exit
PB: predicated region body
PF: predicated region fallthrough
CT: control target
= control target key end

     0   :  { %s1068_s12 = smov 0   ;;  %s1226_s0 = inlined_call_operand.vmem [shape: bf16[256,384], index: 0, kind: input, shape index: {}]   ;;  %s1227_s1 = inlined_call_operand.vmem [shape: bf16[384,128], index: 1, kind: input, shape index: {}]   ;;  %s1228_s2 = inlined_call_operand.vmem [shape: f32[1,128], index: 2, kind: input, shape index: {}]   ;;  %s1229_s3 = inlined_call_operand.vmem [shape: f32[256,128], index: 3, kind: output, shape index: {}]  }
   0x1 LB: > { %s803_s13 = sadd.s32 4294967295, %s1046_s12   ;;  %p807_p0 = scmp.ge.s32.totalorder %s1046_s12, 1  ;;  %s1046_s12 = sphi %s1068_s12, %s13_s12  }
   0x2   : > { %p139_p1 = scmp.lt.s32.totalorder %s1046_s12, 3 }
   0x4   : > { %p140_p2 = pnand %p807_p0, %p139_p1 }
   0x5   : > { %s808_s28 = sshll.u32 (!%p140_p2), %s803_s13, 4 }
   0x6   : > { %143 = sbr.rel (%p140_p2) target bundleno = 306 (0x132), region = 32  ;;  %p165_p3 = scmp.lt.s32.totalorder (!%p140_p2), %s808_s28, 31 }
   0xb   : > { %v984_v0 = vld [vmem:[%s1227_s1 + $0x78] sm:$0xff]   ;;  %v986_v2 = vld [vmem:[%s1227_s1 + $0x70] sm:$0xff]   ;;  %v989_v5 = vld [vmem:[%s1227_s1 + $0x68] sm:$0xff]   ;;  %s1231_s28 = smov (!%p165_p3, %s808_s28), 31 }
   0xc   : > { %v985_v1 = vld [vmem:[%s1227_s1 + $0x38] sm:$0xff]   ;;  %863 = vmatprep.subr.bf16.mxu0 %v984_v0  ;;  %v988_v4 = vld [vmem:[%s1227_s1 + $0x30] sm:$0xff]   ;;  %v991_v7 = vld [vmem:[%s1227_s1 + $0x28] sm:$0xff]   ;;  %s975_s21 = smul.u32 12, %s1231_s28  ;;  %s811_s18 = sshll.u32 %s1231_s28, 3 }
   0xd   : > { %864 = vmatpush3.bf16.msra.mxu0 %v985_v1  ;;  %v987_v3 = vld [vmem:[%s1227_s1 + $0xb8] sm:$0xff]   ;;  %v990_v6 = vld [vmem:[%s1227_s1 + $0xb0] sm:$0xff]   ;;  %v992_v8 = vld [vmem:[%s1227_s1 + $0x60] sm:$0xff]  }
   0xe   : > { %865 = vmatprep.subr.bf16.mxu0 %v986_v2  ;;  %943 = vmatprep.subr.bf16.mxu1 %v987_v3  ;;  %v993_v9 = vld [vmem:[%s1227_s1 + $0xa8] sm:$0xff]   ;;  %v994_v10 = vld [vmem:[%s1227_s1 + $0x20] sm:$0xff]   ;;  %v995_v11 = vld [vmem:[%s1227_s1 + $0x58] sm:$0xff]   ;;  %s1142_s6 = scalar_lea.vmem %s1226_s0, %s975_s21  ;;  %s1190_s21 = scalar_lea.vmem %s1229_s3, %s811_s18 }
   0xf   : > { %944 = vmatpush3.bf16.msra.mxu1 %v987_v3  ;;  %v996_v12 = vld [vmem:[%s1227_s1 + $0xa0] sm:$0xff]   ;;  %v997_v13 = vld [vmem:[%s1227_s1 + $0x18] sm:$0xff]   ;;  %v998_v15 = vld [vmem:[%s1227_s1 + $0x50] sm:$0xff]  }
  0x10   : > { %945 = vmatprep.subr.bf16.mxu1 %v990_v6  ;;  %v999_v14 = vld [vmem:[%s1227_s1 + $0x98] sm:$0xff]   ;;  %v1000_v16 = vld [vmem:[%s1227_s1 + $0x10] sm:$0xff]   ;;  %v1001_v18 = vld [vmem:[%s1227_s1 + $0x48] sm:$0xff]  }
  0x11   : > { %866 = vmatpush3.bf16.msra.mxu0 %v988_v4  ;;  %v1002_v17 = vld [vmem:[%s1227_s1 + $0x90] sm:$0xff]   ;;  %v1003_v19 = vld [vmem:[%s1227_s1 + $0x8] sm:$0xff]   ;;  %v1004_v20 = vld [vmem:[%s1227_s1 + $0x40] sm:$0xff]  }
  0x12   : > { %867 = vmatprep.subr.bf16.mxu0 %v989_v5  ;;  %v1005_v21 = vld [vmem:[%s1227_s1 + $0x88] sm:$0xff]   ;;  %v1009_v22 = vld [vmem:[%s1142_s6 + $0x4] ss:$12 sps:$4 sm:$0xff]   ;;  %v1016_v31 = vld [vmem:[%s1142_s6 + $0x34] ss:$12 sps:$4 sm:$0xff]  }
  0x13   : > { %946 = vmatpush3.bf16.msra.mxu1 %v990_v6  ;;  %v1006_v23 = vld [vmem:[%s1227_s1] sm:$0xff]   ;;  %569 = vmatprep.mubr.bf16.mxu0 %v1009_v22  ;;  %v1011_v24 = vld [vmem:[%s1142_s6 + $0x8] ss:$12 sps:$4 sm:$0xff]   ;;  %v1020_v32 = vld [vmem:[%s1142_s6 + $0x50] ss:$12 sps:$4 sm:$0xff]  }
  0x14   : > { %947 = vmatprep.subr.bf16.mxu1 %v993_v9  ;;  %v1010_v25 = vld [vmem:[%s1227_s1 + $0x80] sm:$0xff]   ;;  %959 = vmatprep.mubr.bf16.mxu1 %v1011_v24  ;;  %v1013_v27 = vld [vmem:[%s1142_s6 + $0x1c] ss:$12 sps:$4 sm:$0xff]   ;;  %v1021_v35 = vld [vmem:[%s1142_s6 + $0x4c] ss:$12 sps:$4 sm:$0xff]  }
  0x15   : > { %868 = vmatpush3.bf16.msra.mxu0 %v991_v7  ;;  %v1007_v26 = vld [vmem:[%s1142_s6] ss:$12 sps:$4 sm:$0xff]   ;;  %v1019_v29 = vld [vmem:[%s1142_s6 + $0x38] ss:$12 sps:$4 sm:$0xff]   ;;  %v1027_v33 = vld [vmem:[%s1142_s6 + $0x68] ss:$12 sps:$4 sm:$0xff]  }
  0x16   : > { %869 = vmatprep.subr.bf16.mxu0 %v992_v8  ;;  %v1012_v28 = vld [vmem:[%s1142_s6 + $0x20] ss:$12 sps:$4 sm:$0xff]   ;;  %v1015_v30 = vld [vmem:[%s1142_s6 + $0x18] ss:$12 sps:$4 sm:$0xff]   ;;  %v1018_v34 = vld [vmem:[%s1142_s6 + $0x30] ss:$12 sps:$4 sm:$0xff]  }
  0x17   : > { %948 = vmatpush3.bf16.msra.mxu1 %v993_v9  ;;  %v1028_v36 = vld [vmem:[%s1142_s6 + $0x80] ss:$12 sps:$4 sm:$0xff]   ;;  %v1035_v37 = vld [vmem:[%s1142_s6 + $0x98] ss:$12 sps:$4 sm:$0xff]   ;;  %v1023_v38 = vld [vmem:[%s1142_s6 + $0x48] ss:$12 sps:$4 sm:$0xff]  }
  0x18   : > { %949 = vmatprep.subr.bf16.mxu1 %v996_v12  ;;  %v1024_v39 = vld [vmem:[%s1142_s6 + $0x64] ss:$12 sps:$4 sm:$0xff]   ;;  %v1026_v41 = vld [vmem:[%s1142_s6 + $0x60] ss:$12 sps:$4 sm:$0xff]   ;;  %v1029_v42 = vld [vmem:[%s1142_s6 + $0x7c] ss:$12 sps:$4 sm:$0xff]  }
  0x19   : > { %870 = vmatpush3.bf16.msra.mxu0 %v994_v10  ;;  %v1036_v40 = vld [vmem:[%s1142_s6 + $0xb0] ss:$12 sps:$4 sm:$0xff]   ;;  %v1031_v43 = vld [vmem:[%s1142_s6 + $0x78] ss:$12 sps:$4 sm:$0xff]   ;;  %v1032_v44 = vld [vmem:[%s1142_s6 + $0x94] ss:$12 sps:$4 sm:$0xff]  }
  0x1a   : > { %871 = vmatprep.subr.bf16.mxu0 %v995_v11  ;;  %v1034_v45 = vld [vmem:[%s1142_s6 + $0x90] ss:$12 sps:$4 sm:$0xff]   ;;  %v1037_v46 = vld [vmem:[%s1142_s6 + $0xac] ss:$12 sps:$4 sm:$0xff]   ;;  %v1039_v47 = vld [vmem:[%s1142_s6 + $0xa8] ss:$12 sps:$4 sm:$0xff]  }
  0x1b   : > { %950 = vmatpush3.bf16.msra.mxu1 %v996_v12  ;;  %v1183_v50 = vld [vmem:[%s1228_s2] ss:$0 sm:$0xff] }
  0x1c   : > { %951 = vmatprep.subr.bf16.mxu1 %v999_v14 }
  0x1d   : > { %872 = vmatpush3.bf16.msra.mxu0 %v997_v13 }
  0x1e   : > { %873 = vmatprep.subr.bf16.mxu0 %v998_v15 }
  0x1f   : > { %952 = vmatpush3.bf16.msra.mxu1 %v999_v14 }
  0x20   : > { %953 = vmatprep.subr.bf16.mxu1 %v1002_v17 }
  0x21   : > { %874 = vmatpush3.bf16.msra.mxu0 %v1000_v16 }
  0x22   : > { %875 = vmatprep.subr.bf16.mxu0 %v1001_v18 }
  0x23   : > { %954 = vmatpush3.bf16.msra.mxu1 %v1002_v17 }
  0x24   : > { %955 = vmatprep.subr.bf16.mxu1 %v1005_v21 }
  0x25   : > { %876 = vmatpush3.bf16.msra.mxu0 %v1003_v19 }
  0x26   : > { %877 = vmatprep.subr.bf16.mxu0 %v1004_v20 }
  0x27   : > { %956 = vmatpush3.bf16.msra.mxu1 %v1005_v21 }
  0x28   : > { %957 = vmatprep.subr.bf16.mxu1 %v1010_v25 }
  0x29   : > { %878 = vmatpush3.bf16.msra.mxu0 %v1006_v23 }
  0x2b   : > { %958 = vmatpush3.bf16.msra.mxu1 %v1010_v25 }
  0x2c   : > { %570 = vmatmul.mubr.bf16.vlgmr.msra.gmra.mxu0 %v1007_v26 }
  0x2d   : > { %577 = vmatprep.mubr.bf16.mxu0 %v1013_v27 }
  0x2e   : > { %960 = vmatmul.mubr.bf16.vlgmr.msra.gmra.mxu1 %v1012_v28 }
  0x2f   : > { %963 = vmatprep.mubr.bf16.mxu1 %v1019_v29 }
  0x34   : > { %578 = vmatmul.mubr.bf16.gmra.mxu0 %v1015_v30 }
  0x35   : > { %585 = vmatprep.mubr.bf16.mxu0 %v1016_v31 }
  0x36   : > { %964 = vmatmul.mubr.bf16.gmra.mxu1 %v1020_v32 }
  0x37   : > { %967 = vmatprep.mubr.bf16.mxu1 %v1027_v33 }
  0x3c   : > { %586 = vmatmul.mubr.bf16.gmra.mxu0 %v1018_v34 }
  0x3d   : > { %593 = vmatprep.mubr.bf16.mxu0 %v1021_v35 }
  0x3e   : > { %968 = vmatmul.mubr.bf16.gmra.mxu1 %v1028_v36 }
  0x3f   : > { %971 = vmatprep.mubr.bf16.mxu1 %v1035_v37 }
  0x44   : > { %594 = vmatmul.mubr.bf16.gmra.mxu0 %v1023_v38 }
  0x45   : > { %601 = vmatprep.mubr.bf16.mxu0 %v1024_v39 }
  0x46   : > { %972 = vmatmul.mubr.bf16.gmra.mxu1 %v1036_v40 }
  0x4c   : > { %602 = vmatmul.mubr.bf16.gmra.mxu0 %v1026_v41 }
  0x4d   : > { %609 = vmatprep.mubr.bf16.mxu0 %v1029_v42 }
  0x54   : > { %610 = vmatmul.mubr.bf16.gmra.mxu0 %v1031_v43 }
  0x55   : > { %617 = vmatprep.mubr.bf16.mxu0 %v1032_v44 }
  0x5c   : > { %618 = vmatmul.mubr.bf16.gmra.mxu0 %v1034_v45 }
  0x5d   : > { %625 = vmatprep.mubr.bf16.mxu0 %v1037_v46 }
  0x64   : > { %626 = vmatmul.mubr.bf16.gmra.mxu0 %v1039_v47 }
  0xec   : > { %v879_v48 = vpop.f32.mrf.mxu0 }
  0xee   : > { %v880_v49 = vpop.f32.mrf.mxu0  ;;  %v961_v52 = vpop.f32.mrf.mxu1 }
  0xef   : > { %v881_v51 = vadd.f32 %v880_v49, %v879_v48 }
  0xf0   : > { %v882_v53 = vpop.f32.mrf.mxu0  ;;  %v668_v55 = vpop.f32.mrf.mxu1 }
  0xf1   : > { %v572_v54 = vadd.f32 %v881_v51, %v1183_v50 }
  0xf2   : > { %v883_v56 = vpop.f32.mrf.mxu0  ;;  %v962_v59 = vpop.f32.mrf.mxu1 }
  0xf3   : > { %v884_v57 = vadd.f32 %v883_v56, %v882_v53  ;;  %v669_v58 = vadd.f32 %v668_v55, %v572_v54 }
  0xf4   : > { %v885_v60 = vpop.f32.mrf.mxu0  ;;  %v671_v62 = vpop.f32.mrf.mxu1 }
  0xf5   : > { %731 = vst [vmem:[%s1190_s21] sm:$0xff] %v669_v58  ;;  %v575_v61 = vadd.f32 %v884_v57, %v1183_v50 }
  0xf6   : > { %v886_v63 = vpop.f32.mrf.mxu0  ;;  %v965_v3 = vpop.f32.mrf.mxu1 }
  0xf7   : > { %v887_v0 = vadd.f32 %v886_v63, %v885_v60  ;;  %v672_v1 = vadd.f32 %v671_v62, %v575_v61 }
  0xf8   : > { %v888_v2 = vpop.f32.mrf.mxu0  ;;  %v684_v9 = vpop.f32.mrf.mxu1 }
  0xf9   : > { %v580_v4 = vadd.f32 %v887_v0, %v1183_v50  ;;  %732 = vst [vmem:[%s1190_s21 + $0x8] sm:$0xff] %v672_v1 }
  0xfa   : > { %v889_v5 = vpop.f32.mrf.mxu0  ;;  %v966_v15 = vpop.f32.mrf.mxu1 }
  0xfb   : > { %v677_v6 = vadd.f32 %v961_v52, %v580_v4  ;;  %v890_v7 = vadd.f32 %v889_v5, %v888_v2 }
  0xfc   : > { %v891_v8 = vpop.f32.mrf.mxu0  ;;  %v687_v21 = vpop.f32.mrf.mxu1 }
  0xfd   : > { %733 = vst [vmem:[%s1190_s21 + $0x10] sm:$0xff] %v677_v6  ;;  %v583_v10 = vadd.f32 %v890_v7, %v1183_v50 }
  0xfe   : > { %v892_v11 = vpop.f32.mrf.mxu0  ;;  %v969_v27 = vpop.f32.mrf.mxu1 }
  0xff   : > { %v680_v12 = vadd.f32 %v962_v59, %v583_v10  ;;  %v893_v13 = vadd.f32 %v892_v11, %v891_v8 }
 0x100   : > { %v894_v14 = vpop.f32.mrf.mxu0  ;;  %v700_v33 = vpop.f32.mrf.mxu1 }
 0x101   : > { %734 = vst [vmem:[%s1190_s21 + $0x18] sm:$0xff] %v680_v12  ;;  %v588_v16 = vadd.f32 %v893_v13, %v1183_v50 }
 0x102   : > { %v895_v17 = vpop.f32.mrf.mxu0  ;;  %v970_v39 = vpop.f32.mrf.mxu1 }
 0x103   : > { %v896_v18 = vadd.f32 %v895_v17, %v894_v14  ;;  %v685_v19 = vadd.f32 %v684_v9, %v588_v16 }
 0x104   : > { %v897_v20 = vpop.f32.mrf.mxu0  ;;  %v703_v45 = vpop.f32.mrf.mxu1 }
 0x105   : > { %735 = vst [vmem:[%s1190_s21 + $0x20] sm:$0xff] %v685_v19  ;;  %v591_v22 = vadd.f32 %v896_v18, %v1183_v50 }
 0x106   : > { %v898_v23 = vpop.f32.mrf.mxu0  ;;  %v973_v52 = vpop.f32.mrf.mxu1 }
 0x107   : > { %v899_v24 = vadd.f32 %v898_v23, %v897_v20  ;;  %v688_v25 = vadd.f32 %v687_v21, %v591_v22 }
 0x108   : > { %v900_v26 = vpop.f32.mrf.mxu0  ;;  %v716_v58 = vpop.f32.mrf.mxu1 }
 0x109   : > { %v596_v28 = vadd.f32 %v899_v24, %v1183_v50  ;;  %736 = vst [vmem:[%s1190_s21 + $0x28] sm:$0xff] %v688_v25 }
 0x10a   : > { %v901_v29 = vpop.f32.mrf.mxu0  ;;  %v974_v0 = vpop.f32.mrf.mxu1 }
 0x10b   : > { %v693_v30 = vadd.f32 %v965_v3, %v596_v28  ;;  %v902_v31 = vadd.f32 %v901_v29, %v900_v26 }
 0x10c   : > { %v903_v32 = vpop.f32.mrf.mxu0  ;;  %v719_v6 = vpop.f32.mrf.mxu1 }
 0x10d   : > { %737 = vst [vmem:[%s1190_s21 + $0x30] sm:$0xff] %v693_v30  ;;  %v599_v34 = vadd.f32 %v902_v31, %v1183_v50 }
 0x10e   : > { %v904_v35 = vpop.f32.mrf.mxu0 }
 0x10f   : > { %v696_v36 = vadd.f32 %v966_v15, %v599_v34  ;;  %v905_v37 = vadd.f32 %v904_v35, %v903_v32 }
 0x110   : > { %v906_v38 = vpop.f32.mrf.mxu0 }
 0x111   : > { %738 = vst [vmem:[%s1190_s21 + $0x38] sm:$0xff] %v696_v36  ;;  %v604_v40 = vadd.f32 %v905_v37, %v1183_v50 }
 0x112   : > { %v907_v41 = vpop.f32.mrf.mxu0 }
 0x113   : > { %v908_v42 = vadd.f32 %v907_v41, %v906_v38  ;;  %v701_v43 = vadd.f32 %v700_v33, %v604_v40 }
 0x114   : > { %v909_v44 = vpop.f32.mrf.mxu0 }
 0x115   : > { %739 = vst [vmem:[%s1190_s21 + $0x40] sm:$0xff] %v701_v43  ;;  %v607_v46 = vadd.f32 %v908_v42, %v1183_v50 }
 0x116   : > { %v910_v47 = vpop.f32.mrf.mxu0 }
 0x117   : > { %v911_v48 = vadd.f32 %v910_v47, %v909_v44  ;;  %v704_v49 = vadd.f32 %v703_v45, %v607_v46 }
 0x118   : > { %v912_v51 = vpop.f32.mrf.mxu0 }
 0x119   : > { %v612_v53 = vadd.f32 %v911_v48, %v1183_v50  ;;  %740 = vst [vmem:[%s1190_s21 + $0x48] sm:$0xff] %v704_v49 }
 0x11a   : > { %v913_v54 = vpop.f32.mrf.mxu0 }
 0x11b   : > { %v709_v55 = vadd.f32 %v969_v27, %v612_v53  ;;  %v914_v56 = vadd.f32 %v913_v54, %v912_v51 }
 0x11c   : > { %v915_v57 = vpop.f32.mrf.mxu0 }
 0x11d   : > { %741 = vst [vmem:[%s1190_s21 + $0x50] sm:$0xff] %v709_v55  ;;  %v615_v59 = vadd.f32 %v914_v56, %v1183_v50 }
 0x11e   : > { %v916_v60 = vpop.f32.mrf.mxu0 }
 0x11f   : > { %v712_v61 = vadd.f32 %v970_v39, %v615_v59  ;;  %v917_v62 = vadd.f32 %v916_v60, %v915_v57 }
 0x120   : > { %v918_v63 = vpop.f32.mrf.mxu0 }
 0x121   : > { %742 = vst [vmem:[%s1190_s21 + $0x58] sm:$0xff] %v712_v61  ;;  %v620_v1 = vadd.f32 %v917_v62, %v1183_v50 }
 0x122   : > { %v919_v2 = vpop.f32.mrf.mxu0 }
 0x123   : > { %v920_v3 = vadd.f32 %v919_v2, %v918_v63  ;;  %v717_v4 = vadd.f32 %v716_v58, %v620_v1 }
 0x124   : > { %v921_v5 = vpop.f32.mrf.mxu0 }
 0x125   : > { %743 = vst [vmem:[%s1190_s21 + $0x60] sm:$0xff] %v717_v4  ;;  %v623_v7 = vadd.f32 %v920_v3, %v1183_v50 }
 0x126   : > { %v922_v8 = vpop.f32.mrf.mxu0 }
 0x127   : > { %v923_v9 = vadd.f32 %v922_v8, %v921_v5  ;;  %v720_v10 = vadd.f32 %v719_v6, %v623_v7 }
 0x128   : > { %v924_v11 = vpop.f32.mrf.mxu0 }
 0x129   : > { %v628_v12 = vadd.f32 %v923_v9, %v1183_v50  ;;  %744 = vst [vmem:[%s1190_s21 + $0x68] sm:$0xff] %v720_v10 }
 0x12a   : > { %v925_v13 = vpop.f32.mrf.mxu0 }
 0x12b   : > { %v725_v14 = vadd.f32 %v973_v52, %v628_v12  ;;  %v926_v15 = vadd.f32 %v925_v13, %v924_v11 }
 0x12d   : > { %745 = vst [vmem:[%s1190_s21 + $0x70] sm:$0xff] %v725_v14  ;;  %v631_v16 = vadd.f32 %v926_v15, %v1183_v50 }
 0x12f   : > { %v728_v17 = vadd.f32 %v974_v0, %v631_v16 }
 0x131   : > { %746 = vst [vmem:[%s1190_s21 + $0x78] sm:$0xff] %v728_v17 }
 0x132 PF: > { %s13_s12 = sadd.s32 1, %s1046_s12  }
 0x133   : > { %p10_p4 = scmp.ge.s32.totalorder %s13_s12, 4  }
 0x135   :  { %12 = sbr.rel (!%p10_p4) target bundleno = 1 (0x1), region = 62 }

</bundles_post_ra>
